<compile_context>
chip_gen: v7x
topology: tpu7x:2x2x1
jax: 0.10.0
libtpu: 0.0.40
codegen_flags: <defaults>
</compile_context>

<pallas_src>
import jax
import jax.numpy as jnp
from jax import lax
from jax.experimental import pallas as pl
from jax.experimental.pallas import tpu as pltpu


def seq2seq_kernel(xproj_ref, tok0_oh_ref, w_hh_e_ref, w_embih_ref, w_hh_d_ref,
                   b_dec_ref, w_out_ref, b_out_ref, out_ref):
    S, B, H = xproj_ref.shape          # per-batch-tile block: (S, B_BLK, H)
    V = out_ref.shape[2]
    f32 = jnp.float32

    # ---------------- encoder: h = tanh(xproj[t] + h @ Whh) -----------------
    # (input projection + bias already folded into xproj by the wrapper)
    def enc_step(t, h):
        return jnp.tanh(xproj_ref[t]
                        + jnp.dot(h, w_hh_e_ref[...], preferred_element_type=f32))

    h = lax.fori_loop(0, S, enc_step, jnp.zeros((B, H), f32), unroll=True)

    # ---------------- decoder: greedy decode for S steps --------------------
    # Python loop -> fully static store indices into the (B, S, V) output block.
    # TODO(synk): switch to a partially-unrolled fori_loop (unroll=2/4) if S grows beyond ~16.
    oh = tok0_oh_ref[...]                                    # (B, V) one-hot of source[:, 0]
    for t in range(S):
        # decoder embedding folded into w_embih = emb_dec @ W_ih_dec; two K=128 dots summed,
        # no per-step concatenate on the recurrent chain. Weights read at the dot sites.
        h = jnp.tanh(jnp.dot(oh, w_embih_ref[...], preferred_element_type=f32)
                     + jnp.dot(h, w_hh_d_ref[...], preferred_element_type=f32)
                     + b_dec_ref[...])                       # (1,H) sublane-broadcast add
        logits = (jnp.dot(h, w_out_ref[...], preferred_element_type=f32)
                  + b_out_ref[...])                          # (B, V)

        # greedy argmax directly on logits (== argmax of log_softmax), reusing the softmax
        # max m; first-index tie-break to match torch.argmax.
        m = jnp.max(logits, axis=-1, keepdims=True)
        iota = lax.broadcasted_iota(jnp.int32, logits.shape, 1)
        idx = jnp.min(jnp.where(logits == m, iota, V), axis=-1, keepdims=True)
        oh = (iota == idx).astype(f32)

        # log_softmax + store: off the recurrent h -> argmax chain.
        z = logits - m
        lse = jnp.log(jnp.sum(jnp.exp(z), axis=-1, keepdims=True))
        out_ref[:, t, :] = z - lse                           # lane-dense (V) store


def seq2seq_forward(source, params, *, b_blk=None):
    """source: (B, S) int32 token ids. Returns (B, S, V) log-probs."""
    B, S = source.shape
    E = params["emb_enc"].shape[1]
    H = params["w_hh_enc"].shape[0]
    V = params["w_out"].shape[1]

    if b_blk is None:
        # Prefer >=2 batch tiles so the "parallel" grid axis exists (megacore on v7x);
        # each tile must be a multiple of 8 sublanes.
        b_blk = next((c for c in (256, 128, 64, 32, 16, 8) if B % c == 0 and c < B), B)
    assert B % b_blk == 0 and b_blk % 8 == 0, (B, b_blk)

    hi = lax.Precision.HIGHEST

    # ---- non-recurrent prologue (plain JAX, a few large matmuls) ----
    # Encoder: embedding gather + input projection + bias, produced directly as (S, B, H)
    # (indexing with source.T removes the wrapper transpose).
    src_emb = params["emb_enc"][source.T].astype(jnp.float32)               # (S, B, E)
    xproj = (jnp.dot(src_emb.reshape(S * B, E), params["w_ih_enc"], precision=hi)
             + params["b_enc"]).reshape(S, B, H)

    # Decoder: fold the embedding into the input projection -> one (V, H) weight.
    w_embih = jnp.dot(params["emb_dec"], params["w_ih_dec"], precision=hi)  # (V, H)
    tok0_oh = jax.nn.one_hot(source[:, 0], V, dtype=jnp.float32)            # (B, V)

    grid_spec = pltpu.PrefetchScalarGridSpec(
        num_scalar_prefetch=0,
        grid=(B // b_blk,),
        in_specs=[
            pl.BlockSpec((S, b_blk, H), lambda b: (0, b, 0)),   # xproj, per batch tile
            pl.BlockSpec((b_blk, V), lambda b: (b, 0)),         # first-token one-hot
            pl.BlockSpec((H, H), lambda b: (0, 0)),             # w_hh_enc   (VMEM-resident)
            pl.BlockSpec((V, H), lambda b: (0, 0)),             # emb_dec @ w_ih_dec
            pl.BlockSpec((H, H), lambda b: (0, 0)),             # w_hh_dec
            pl.BlockSpec((1, H), lambda b: (0, 0)),             # b_dec (broadcast in-kernel)
            pl.BlockSpec((H, V), lambda b: (0, 0)),             # w_out
            pl.BlockSpec((1, V), lambda b: (0, 0)),             # b_out (broadcast in-kernel)
        ],
        out_specs=pl.BlockSpec((b_blk, S, V), lambda b: (b, 0, 0)),
    )

    return pl.pallas_call(
        seq2seq_kernel,
        out_shape=jax.ShapeDtypeStruct((B, S, V), jnp.float32),
        grid_spec=grid_spec,
        compiler_params=pltpu.CompilerParams(
            dimension_semantics=("parallel",),   # batch tiles independent -> both TCs on v7x
            vmem_limit_bytes=32 * 1024 * 1024,
        ),
    )(xproj, tok0_oh, params["w_hh_enc"], w_embih, params["w_hh_dec"],
      params["b_dec"], params["w_out"], params["b_out"])


def seq2seq_reference(source, params):
    """Pure-JAX reference with the original module's semantics (unfused)."""
    B, S = source.shape
    V = params["w_out"].shape[1]
    hi = lax.Precision.HIGHEST
    dot = lambda a, b: jnp.dot(a, b, precision=hi)

    x_seq = params["emb_enc"][source].astype(jnp.float32)                   # (B, S, E)
    h = jnp.zeros((B, params["w_hh_enc"].shape[0]), jnp.float32)
    for t in range(S):
        h = jnp.tanh(dot(x_seq[:, t, :], params["w_ih_enc"])
                     + dot(h, params["w_hh_enc"]) + params["b_enc"])

    oh = jax.nn.one_hot(source[:, 0], V, dtype=jnp.float32)
    outs = []
    for _ in range(S):
        x = dot(oh, params["emb_dec"])
        h = jnp.tanh(dot(x, params["w_ih_dec"]) + dot(h, params["w_hh_dec"])
                     + params["b_dec"])
        logits = dot(h, params["w_out"]) + params["b_out"]
        logp = jax.nn.log_softmax(logits, axis=-1)
        outs.append(logp)
        oh = jax.nn.one_hot(jnp.argmax(logp, axis=-1), V, dtype=jnp.float32)
    return jnp.stack(outs, axis=1)


def make_params(key, vocab_in, vocab_out, emb_dim, hidden):
    ks = jax.random.split(key, 9)
    s = 0.3
    return {
        "emb_enc":  s * jax.random.normal(ks[0], (vocab_in, emb_dim), jnp.float32),
        "w_ih_enc": s * jax.random.normal(ks[1], (emb_dim, hidden), jnp.float32),
        "w_hh_enc": s * jax.random.normal(ks[2], (hidden, hidden), jnp.float32),
        "b_enc":    s * jax.random.normal(ks[3], (1, hidden), jnp.float32),
        "emb_dec":  s * jax.random.normal(ks[4], (vocab_out, emb_dim), jnp.float32),
        "w_ih_dec": s * jax.random.normal(ks[5], (emb_dim, hidden), jnp.float32),
        "w_hh_dec": s * jax.random.normal(ks[6], (hidden, hidden), jnp.float32),
        "b_dec":    s * jax.random.normal(ks[7], (1, hidden), jnp.float32),
        "w_out":    s * jax.random.normal(ks[8], (hidden, vocab_out), jnp.float32),
        "b_out":    jnp.zeros((1, vocab_out), jnp.float32),
    }


if __name__ == "__main__":
    # Hardware-friendly demo shapes: B a multiple of 8 sublanes (raised 8 -> 64 per the perf
    # review to fill MXU rows; grid of 2 batch tiles exercises the parallel axis), E/H/V
    # multiples of 128 (lanes) so matmul operands are tile-aligned and stores are lane-dense.
    B, S = 64, 8
    VOCAB_IN, VOCAB_OUT, EMB, HID = 128, 128, 128, 128

    key = jax.random.PRNGKey(0)
    k_src, k_par = jax.random.split(key)
    source = jax.random.randint(k_src, (B, S), 0, VOCAB_IN, dtype=jnp.int32)
    params = make_params(k_par, VOCAB_IN, VOCAB_OUT, EMB, HID)

    out = jax.block_until_ready(jax.jit(seq2seq_forward)(source, params))
    assert out.shape == (B, S, VOCAB_OUT)

    ref = seq2seq_reference(source, params)
    assert jnp.allclose(out, ref, atol=1e-3, rtol=1e-3), "mismatch vs pure-JAX reference"

    print("KERNEL_OK")
</pallas_src>

<mosaic_0001>
module attributes {stable_mosaic.version = 11 : i64} {
  func.func @seq2seq_kernel(%arg0: i32, %arg1: memref<8x32x128xf32, #tpu.memory_space<vmem>>, %arg2: memref<32x128xf32, #tpu.memory_space<vmem>>, %arg3: memref<128x128xf32, #tpu.memory_space<vmem>>, %arg4: memref<128x128xf32, #tpu.memory_space<vmem>>, %arg5: memref<128x128xf32, #tpu.memory_space<vmem>>, %arg6: memref<1x128xf32, #tpu.memory_space<vmem>>, %arg7: memref<128x128xf32, #tpu.memory_space<vmem>>, %arg8: memref<1x128xf32, #tpu.memory_space<vmem>>, %arg9: memref<32x8x128xf32, #tpu.memory_space<vmem>>) attributes {dimension_semantics = [#tpu.dimension_semantics<parallel>], iteration_bounds = array<i64: 2>, scalar_prefetch = 0 : i64, scratch_operands = 0 : i64, tpu.core_type = #tpu.core_type<tc>, window_params = [{transform_indices = @transform_0, window_bounds = array<i64: 8, 32, 128>}, {transform_indices = @transform_1, window_bounds = array<i64: 32, 128>}, {pipeline_mode = #tpu.pipeline_mode<synchronous>, transform_indices = @transform_2, window_bounds = array<i64: 128, 128>}, {pipeline_mode = #tpu.pipeline_mode<synchronous>, transform_indices = @transform_3, window_bounds = array<i64: 128, 128>}, {pipeline_mode = #tpu.pipeline_mode<synchronous>, transform_indices = @transform_4, window_bounds = array<i64: 128, 128>}, {pipeline_mode = #tpu.pipeline_mode<synchronous>, transform_indices = @transform_5, window_bounds = array<i64: 1, 128>}, {pipeline_mode = #tpu.pipeline_mode<synchronous>, transform_indices = @transform_6, window_bounds = array<i64: 128, 128>}, {pipeline_mode = #tpu.pipeline_mode<synchronous>, transform_indices = @transform_7, window_bounds = array<i64: 1, 128>}, {transform_indices = @transform_8, window_bounds = array<i64: 32, 8, 128>}]} {
    %cst = arith.constant 0.000000e+00 : f32
    %0 = vector.broadcast %cst : f32 to vector<32x128xf32>
    %c0_i32 = arith.constant 0 : i32
    %1 = arith.index_cast %c0_i32 : i32 to index
    %c0 = arith.constant 0 : index
    %c0_0 = arith.constant 0 : index
    %2 = vector.load %arg1[%1, %c0, %c0_0] : memref<8x32x128xf32, #tpu.memory_space<vmem>>, vector<1x32x128xf32>
    %3 = vector.shape_cast %2 : vector<1x32x128xf32> to vector<32x128xf32>
    %c0_1 = arith.constant 0 : index
    %c0_2 = arith.constant 0 : index
    %4 = vector.load %arg3[%c0_1, %c0_2] : memref<128x128xf32, #tpu.memory_space<vmem>>, vector<128x128xf32>
    %cst_3 = arith.constant dense<0.000000e+00> : vector<32x128xf32>
    %5 = tpu.matmul %0, %4, %cst_3 {dimension_numbers = #tpu.dot_dimension_numbers<[1], [0], [0], [1], [0, 0, 1, 1], [], []>} : vector<32x128xf32>, vector<128x128xf32>, vector<32x128xf32> -> vector<32x128xf32>
    %6 = arith.addf %3, %5 : vector<32x128xf32>
    %7 = math.tanh %6 : vector<32x128xf32>
    %c1_i32 = arith.constant 1 : i32
    %8 = arith.index_cast %c1_i32 : i32 to index
    %c0_4 = arith.constant 0 : index
    %c0_5 = arith.constant 0 : index
    %9 = vector.load %arg1[%8, %c0_4, %c0_5] : memref<8x32x128xf32, #tpu.memory_space<vmem>>, vector<1x32x128xf32>
    %10 = vector.shape_cast %9 : vector<1x32x128xf32> to vector<32x128xf32>
    %c0_6 = arith.constant 0 : index
    %c0_7 = arith.constant 0 : index
    %11 = vector.load %arg3[%c0_6, %c0_7] : memref<128x128xf32, #tpu.memory_space<vmem>>, vector<128x128xf32>
    %cst_8 = arith.constant dense<0.000000e+00> : vector<32x128xf32>
    %12 = tpu.matmul %7, %11, %cst_8 {dimension_numbers = #tpu.dot_dimension_numbers<[1], [0], [0], [1], [0, 0, 1, 1], [], []>} : vector<32x128xf32>, vector<128x128xf32>, vector<32x128xf32> -> vector<32x128xf32>
    %13 = arith.addf %10, %12 : vector<32x128xf32>
    %14 = math.tanh %13 : vector<32x128xf32>
    %c2_i32 = arith.constant 2 : i32
    %15 = arith.index_cast %c2_i32 : i32 to index
    %c0_9 = arith.constant 0 : index
    %c0_10 = arith.constant 0 : index
    %16 = vector.load %arg1[%15, %c0_9, %c0_10] : memref<8x32x128xf32, #tpu.memory_space<vmem>>, vector<1x32x128xf32>
    %17 = vector.shape_cast %16 : vector<1x32x128xf32> to vector<32x128xf32>
    %c0_11 = arith.constant 0 : index
    %c0_12 = arith.constant 0 : index
    %18 = vector.load %arg3[%c0_11, %c0_12] : memref<128x128xf32, #tpu.memory_space<vmem>>, vector<128x128xf32>
    %cst_13 = arith.constant dense<0.000000e+00> : vector<32x128xf32>
    %19 = tpu.matmul %14, %18, %cst_13 {dimension_numbers = #tpu.dot_dimension_numbers<[1], [0], [0], [1], [0, 0, 1, 1], [], []>} : vector<32x128xf32>, vector<128x128xf32>, vector<32x128xf32> -> vector<32x128xf32>
    %20 = arith.addf %17, %19 : vector<32x128xf32>
    %21 = math.tanh %20 : vector<32x128xf32>
    %c3_i32 = arith.constant 3 : i32
    %22 = arith.index_cast %c3_i32 : i32 to index
    %c0_14 = arith.constant 0 : index
    %c0_15 = arith.constant 0 : index
    %23 = vector.load %arg1[%22, %c0_14, %c0_15] : memref<8x32x128xf32, #tpu.memory_space<vmem>>, vector<1x32x128xf32>
    %24 = vector.shape_cast %23 : vector<1x32x128xf32> to vector<32x128xf32>
    %c0_16 = arith.constant 0 : index
    %c0_17 = arith.constant 0 : index
    %25 = vector.load %arg3[%c0_16, %c0_17] : memref<128x128xf32, #tpu.memory_space<vmem>>, vector<128x128xf32>
    %cst_18 = arith.constant dense<0.000000e+00> : vector<32x128xf32>
    %26 = tpu.matmul %21, %25, %cst_18 {dimension_numbers = #tpu.dot_dimension_numbers<[1], [0], [0], [1], [0, 0, 1, 1], [], []>} : vector<32x128xf32>, vector<128x128xf32>, vector<32x128xf32> -> vector<32x128xf32>
    %27 = arith.addf %24, %26 : vector<32x128xf32>
    %28 = math.tanh %27 : vector<32x128xf32>
    %c4_i32 = arith.constant 4 : i32
    %29 = arith.index_cast %c4_i32 : i32 to index
    %c0_19 = arith.constant 0 : index
    %c0_20 = arith.constant 0 : index
    %30 = vector.load %arg1[%29, %c0_19, %c0_20] : memref<8x32x128xf32, #tpu.memory_space<vmem>>, vector<1x32x128xf32>
    %31 = vector.shape_cast %30 : vector<1x32x128xf32> to vector<32x128xf32>
    %c0_21 = arith.constant 0 : index
    %c0_22 = arith.constant 0 : index
    %32 = vector.load %arg3[%c0_21, %c0_22] : memref<128x128xf32, #tpu.memory_space<vmem>>, vector<128x128xf32>
    %cst_23 = arith.constant dense<0.000000e+00> : vector<32x128xf32>
    %33 = tpu.matmul %28, %32, %cst_23 {dimension_numbers = #tpu.dot_dimension_numbers<[1], [0], [0], [1], [0, 0, 1, 1], [], []>} : vector<32x128xf32>, vector<128x128xf32>, vector<32x128xf32> -> vector<32x128xf32>
    %34 = arith.addf %31, %33 : vector<32x128xf32>
    %35 = math.tanh %34 : vector<32x128xf32>
    %c5_i32 = arith.constant 5 : i32
    %36 = arith.index_cast %c5_i32 : i32 to index
    %c0_24 = arith.constant 0 : index
    %c0_25 = arith.constant 0 : index
    %37 = vector.load %arg1[%36, %c0_24, %c0_25] : memref<8x32x128xf32, #tpu.memory_space<vmem>>, vector<1x32x128xf32>
    %38 = vector.shape_cast %37 : vector<1x32x128xf32> to vector<32x128xf32>
    %c0_26 = arith.constant 0 : index
    %c0_27 = arith.constant 0 : index
    %39 = vector.load %arg3[%c0_26, %c0_27] : memref<128x128xf32, #tpu.memory_space<vmem>>, vector<128x128xf32>
    %cst_28 = arith.constant dense<0.000000e+00> : vector<32x128xf32>
    %40 = tpu.matmul %35, %39, %cst_28 {dimension_numbers = #tpu.dot_dimension_numbers<[1], [0], [0], [1], [0, 0, 1, 1], [], []>} : vector<32x128xf32>, vector<128x128xf32>, vector<32x128xf32> -> vector<32x128xf32>
    %41 = arith.addf %38, %40 : vector<32x128xf32>
    %42 = math.tanh %41 : vector<32x128xf32>
    %c6_i32 = arith.constant 6 : i32
    %43 = arith.index_cast %c6_i32 : i32 to index
    %c0_29 = arith.constant 0 : index
    %c0_30 = arith.constant 0 : index
    %44 = vector.load %arg1[%43, %c0_29, %c0_30] : memref<8x32x128xf32, #tpu.memory_space<vmem>>, vector<1x32x128xf32>
    %45 = vector.shape_cast %44 : vector<1x32x128xf32> to vector<32x128xf32>
    %c0_31 = arith.constant 0 : index
    %c0_32 = arith.constant 0 : index
    %46 = vector.load %arg3[%c0_31, %c0_32] : memref<128x128xf32, #tpu.memory_space<vmem>>, vector<128x128xf32>
    %cst_33 = arith.constant dense<0.000000e+00> : vector<32x128xf32>
    %47 = tpu.matmul %42, %46, %cst_33 {dimension_numbers = #tpu.dot_dimension_numbers<[1], [0], [0], [1], [0, 0, 1, 1], [], []>} : vector<32x128xf32>, vector<128x128xf32>, vector<32x128xf32> -> vector<32x128xf32>
    %48 = arith.addf %45, %47 : vector<32x128xf32>
    %49 = math.tanh %48 : vector<32x128xf32>
    %c7_i32 = arith.constant 7 : i32
    %50 = arith.index_cast %c7_i32 : i32 to index
    %c0_34 = arith.constant 0 : index
    %c0_35 = arith.constant 0 : index
    %51 = vector.load %arg1[%50, %c0_34, %c0_35] : memref<8x32x128xf32, #tpu.memory_space<vmem>>, vector<1x32x128xf32>
    %52 = vector.shape_cast %51 : vector<1x32x128xf32> to vector<32x128xf32>
    %c0_36 = arith.constant 0 : index
    %c0_37 = arith.constant 0 : index
    %53 = vector.load %arg3[%c0_36, %c0_37] : memref<128x128xf32, #tpu.memory_space<vmem>>, vector<128x128xf32>
    %cst_38 = arith.constant dense<0.000000e+00> : vector<32x128xf32>
    %54 = tpu.matmul %49, %53, %cst_38 {dimension_numbers = #tpu.dot_dimension_numbers<[1], [0], [0], [1], [0, 0, 1, 1], [], []>} : vector<32x128xf32>, vector<128x128xf32>, vector<32x128xf32> -> vector<32x128xf32>
    %55 = arith.addf %52, %54 : vector<32x128xf32>
    %56 = math.tanh %55 : vector<32x128xf32>
    %c8_i32 = arith.constant 8 : i32
    %c0_39 = arith.constant 0 : index
    %c0_40 = arith.constant 0 : index
    %57 = vector.load %arg2[%c0_39, %c0_40] : memref<32x128xf32, #tpu.memory_space<vmem>>, vector<32x128xf32>
    %c0_41 = arith.constant 0 : index
    %c0_42 = arith.constant 0 : index
    %58 = vector.load %arg4[%c0_41, %c0_42] : memref<128x128xf32, #tpu.memory_space<vmem>>, vector<128x128xf32>
    %cst_43 = arith.constant dense<0.000000e+00> : vector<32x128xf32>
    %59 = tpu.matmul %57, %58, %cst_43 {dimension_numbers = #tpu.dot_dimension_numbers<[1], [0], [0], [1], [0, 0, 1, 1], [], []>} : vector<32x128xf32>, vector<128x128xf32>, vector<32x128xf32> -> vector<32x128xf32>
    %c0_44 = arith.constant 0 : index
    %c0_45 = arith.constant 0 : index
    %60 = vector.load %arg5[%c0_44, %c0_45] : memref<128x128xf32, #tpu.memory_space<vmem>>, vector<128x128xf32>
    %cst_46 = arith.constant dense<0.000000e+00> : vector<32x128xf32>
    %61 = tpu.matmul %56, %60, %cst_46 {dimension_numbers = #tpu.dot_dimension_numbers<[1], [0], [0], [1], [0, 0, 1, 1], [], []>} : vector<32x128xf32>, vector<128x128xf32>, vector<32x128xf32> -> vector<32x128xf32>
    %62 = arith.addf %59, %61 : vector<32x128xf32>
    %c0_47 = arith.constant 0 : index
    %c0_48 = arith.constant 0 : index
    %63 = vector.load %arg6[%c0_47, %c0_48] : memref<1x128xf32, #tpu.memory_space<vmem>>, vector<1x128xf32>
    %64 = vector.broadcast %63 : vector<1x128xf32> to vector<32x128xf32>
    %65 = arith.addf %62, %64 : vector<32x128xf32>
    %66 = math.tanh %65 : vector<32x128xf32>
    %c0_49 = arith.constant 0 : index
    %c0_50 = arith.constant 0 : index
    %67 = vector.load %arg7[%c0_49, %c0_50] : memref<128x128xf32, #tpu.memory_space<vmem>>, vector<128x128xf32>
    %cst_51 = arith.constant dense<0.000000e+00> : vector<32x128xf32>
    %68 = tpu.matmul %66, %67, %cst_51 {dimension_numbers = #tpu.dot_dimension_numbers<[1], [0], [0], [1], [0, 0, 1, 1], [], []>} : vector<32x128xf32>, vector<128x128xf32>, vector<32x128xf32> -> vector<32x128xf32>
    %c0_52 = arith.constant 0 : index
    %c0_53 = arith.constant 0 : index
    %69 = vector.load %arg8[%c0_52, %c0_53] : memref<1x128xf32, #tpu.memory_space<vmem>>, vector<1x128xf32>
    %70 = vector.broadcast %69 : vector<1x128xf32> to vector<32x128xf32>
    %71 = arith.addf %68, %70 : vector<32x128xf32>
    %cst_54 = arith.constant dense<0xFF800000> : vector<32xf32>
    %72 = vector.multi_reduction <maximumf>, %71, %cst_54 [1] : vector<32x128xf32> to vector<32xf32>
    %73 = vector.shape_cast %72 : vector<32xf32> to vector<32x1xf32>
    %74 = tpu.iota {dimensions = array<i32: 1>} : vector<32x128xi32>
    %75 = vector.broadcast %73 : vector<32x1xf32> to vector<32x128xf32>
    %76 = arith.cmpf oeq, %71, %75 : vector<32x128xf32>
    %c128_i32 = arith.constant 128 : i32
    %77 = vector.broadcast %c128_i32 : i32 to vector<32x128xi32>
    %78 = arith.select %76, %74, %77 : vector<32x128xi1>, vector<32x128xi32>
    %cst_55 = arith.constant dense<2147483647> : vector<32xi32>
    %79 = vector.multi_reduction <minsi>, %78, %cst_55 [1] : vector<32x128xi32> to vector<32xi32>
    %80 = vector.shape_cast %79 : vector<32xi32> to vector<32x1xi32>
    %81 = vector.broadcast %80 : vector<32x1xi32> to vector<32x128xi32>
    %82 = arith.cmpi eq, %74, %81 : vector<32x128xi32>
    %83 = arith.extui %82 : vector<32x128xi1> to vector<32x128xi32>
    %84 = arith.sitofp %83 : vector<32x128xi32> to vector<32x128xf32>
    %85 = vector.broadcast %73 : vector<32x1xf32> to vector<32x128xf32>
    %86 = arith.subf %71, %85 : vector<32x128xf32>
    %87 = math.exp %86 : vector<32x128xf32>
    %cst_56 = arith.constant dense<0.000000e+00> : vector<32xf32>
    %88 = vector.multi_reduction <add>, %87, %cst_56 [1] : vector<32x128xf32> to vector<32xf32>
    %89 = vector.shape_cast %88 : vector<32xf32> to vector<32x1xf32>
    %90 = math.log %89 : vector<32x1xf32>
    %91 = vector.broadcast %90 : vector<32x1xf32> to vector<32x128xf32>
    %92 = arith.subf %86, %91 : vector<32x128xf32>
    %c0_57 = arith.constant 0 : index
    %c0_58 = arith.constant 0 : index
    %c0_59 = arith.constant 0 : index
    %93 = vector.load %arg9[%c0_57, %c0_58, %c0_59] : memref<32x8x128xf32, #tpu.memory_space<vmem>>, vector<32x1x128xf32>
    %94 = vector.shape_cast %93 : vector<32x1x128xf32> to vector<32x128xf32>
    %95 = vector.shape_cast %92 : vector<32x128xf32> to vector<32x1x128xf32>
    tpu.vector_store %arg9[%c0_57, %c0_58, %c0_59], %95 {strides = array<i32>} : memref<32x8x128xf32, #tpu.memory_space<vmem>>, vector<32x1x128xf32>,
    %c0_60 = arith.constant 0 : index
    %c0_61 = arith.constant 0 : index
    %96 = vector.load %arg4[%c0_60, %c0_61] : memref<128x128xf32, #tpu.memory_space<vmem>>, vector<128x128xf32>
    %cst_62 = arith.constant dense<0.000000e+00> : vector<32x128xf32>
    %97 = tpu.matmul %84, %96, %cst_62 {dimension_numbers = #tpu.dot_dimension_numbers<[1], [0], [0], [1], [0, 0, 1, 1], [], []>} : vector<32x128xf32>, vector<128x128xf32>, vector<32x128xf32> -> vector<32x128xf32>
    %c0_63 = arith.constant 0 : index
    %c0_64 = arith.constant 0 : index
    %98 = vector.load %arg5[%c0_63, %c0_64] : memref<128x128xf32, #tpu.memory_space<vmem>>, vector<128x128xf32>
    %cst_65 = arith.constant dense<0.000000e+00> : vector<32x128xf32>
    %99 = tpu.matmul %66, %98, %cst_65 {dimension_numbers = #tpu.dot_dimension_numbers<[1], [0], [0], [1], [0, 0, 1, 1], [], []>} : vector<32x128xf32>, vector<128x128xf32>, vector<32x128xf32> -> vector<32x128xf32>
    %100 = arith.addf %97, %99 : vector<32x128xf32>
    %c0_66 = arith.constant 0 : index
    %c0_67 = arith.constant 0 : index
    %101 = vector.load %arg6[%c0_66, %c0_67] : memref<1x128xf32, #tpu.memory_space<vmem>>, vector<1x128xf32>
    %102 = vector.broadcast %101 : vector<1x128xf32> to vector<32x128xf32>
    %103 = arith.addf %100, %102 : vector<32x128xf32>
    %104 = math.tanh %103 : vector<32x128xf32>
    %c0_68 = arith.constant 0 : index
    %c0_69 = arith.constant 0 : index
    %105 = vector.load %arg7[%c0_68, %c0_69] : memref<128x128xf32, #tpu.memory_space<vmem>>, vector<128x128xf32>
    %cst_70 = arith.constant dense<0.000000e+00> : vector<32x128xf32>
    %106 = tpu.matmul %104, %105, %cst_70 {dimension_numbers = #tpu.dot_dimension_numbers<[1], [0], [0], [1], [0, 0, 1, 1], [], []>} : vector<32x128xf32>, vector<128x128xf32>, vector<32x128xf32> -> vector<32x128xf32>
    %c0_71 = arith.constant 0 : index
    %c0_72 = arith.constant 0 : index
    %107 = vector.load %arg8[%c0_71, %c0_72] : memref<1x128xf32, #tpu.memory_space<vmem>>, vector<1x128xf32>
    %108 = vector.broadcast %107 : vector<1x128xf32> to vector<32x128xf32>
    %109 = arith.addf %106, %108 : vector<32x128xf32>
    %cst_73 = arith.constant dense<0xFF800000> : vector<32xf32>
    %110 = vector.multi_reduction <maximumf>, %109, %cst_73 [1] : vector<32x128xf32> to vector<32xf32>
    %111 = vector.shape_cast %110 : vector<32xf32> to vector<32x1xf32>
    %112 = tpu.iota {dimensions = array<i32: 1>} : vector<32x128xi32>
    %113 = vector.broadcast %111 : vector<32x1xf32> to vector<32x128xf32>
    %114 = arith.cmpf oeq, %109, %113 : vector<32x128xf32>
    %c128_i32_74 = arith.constant 128 : i32
    %115 = vector.broadcast %c128_i32_74 : i32 to vector<32x128xi32>
    %116 = arith.select %114, %112, %115 : vector<32x128xi1>, vector<32x128xi32>
    %cst_75 = arith.constant dense<2147483647> : vector<32xi32>
    %117 = vector.multi_reduction <minsi>, %116, %cst_75 [1] : vector<32x128xi32> to vector<32xi32>
    %118 = vector.shape_cast %117 : vector<32xi32> to vector<32x1xi32>
    %119 = vector.broadcast %118 : vector<32x1xi32> to vector<32x128xi32>
    %120 = arith.cmpi eq, %112, %119 : vector<32x128xi32>
    %121 = arith.extui %120 : vector<32x128xi1> to vector<32x128xi32>
    %122 = arith.sitofp %121 : vector<32x128xi32> to vector<32x128xf32>
    %123 = vector.broadcast %111 : vector<32x1xf32> to vector<32x128xf32>
    %124 = arith.subf %109, %123 : vector<32x128xf32>
    %125 = math.exp %124 : vector<32x128xf32>
    %cst_76 = arith.constant dense<0.000000e+00> : vector<32xf32>
    %126 = vector.multi_reduction <add>, %125, %cst_76 [1] : vector<32x128xf32> to vector<32xf32>
    %127 = vector.shape_cast %126 : vector<32xf32> to vector<32x1xf32>
    %128 = math.log %127 : vector<32x1xf32>
    %129 = vector.broadcast %128 : vector<32x1xf32> to vector<32x128xf32>
    %130 = arith.subf %124, %129 : vector<32x128xf32>
    %c0_77 = arith.constant 0 : index
    %c1 = arith.constant 1 : index
    %c0_78 = arith.constant 0 : index
    %131 = vector.load %arg9[%c0_77, %c1, %c0_78] : memref<32x8x128xf32, #tpu.memory_space<vmem>>, vector<32x1x128xf32>
    %132 = vector.shape_cast %131 : vector<32x1x128xf32> to vector<32x128xf32>
    %133 = vector.shape_cast %130 : vector<32x128xf32> to vector<32x1x128xf32>
    tpu.vector_store %arg9[%c0_77, %c1, %c0_78], %133 {strides = array<i32>} : memref<32x8x128xf32, #tpu.memory_space<vmem>>, vector<32x1x128xf32>,
    %c0_79 = arith.constant 0 : index
    %c0_80 = arith.constant 0 : index
    %134 = vector.load %arg4[%c0_79, %c0_80] : memref<128x128xf32, #tpu.memory_space<vmem>>, vector<128x128xf32>
    %cst_81 = arith.constant dense<0.000000e+00> : vector<32x128xf32>
    %135 = tpu.matmul %122, %134, %cst_81 {dimension_numbers = #tpu.dot_dimension_numbers<[1], [0], [0], [1], [0, 0, 1, 1], [], []>} : vector<32x128xf32>, vector<128x128xf32>, vector<32x128xf32> -> vector<32x128xf32>
    %c0_82 = arith.constant 0 : index
    %c0_83 = arith.constant 0 : index
    %136 = vector.load %arg5[%c0_82, %c0_83] : memref<128x128xf32, #tpu.memory_space<vmem>>, vector<128x128xf32>
    %cst_84 = arith.constant dense<0.000000e+00> : vector<32x128xf32>
    %137 = tpu.matmul %104, %136, %cst_84 {dimension_numbers = #tpu.dot_dimension_numbers<[1], [0], [0], [1], [0, 0, 1, 1], [], []>} : vector<32x128xf32>, vector<128x128xf32>, vector<32x128xf32> -> vector<32x128xf32>
    %138 = arith.addf %135, %137 : vector<32x128xf32>
    %c0_85 = arith.constant 0 : index
    %c0_86 = arith.constant 0 : index
    %139 = vector.load %arg6[%c0_85, %c0_86] : memref<1x128xf32, #tpu.memory_space<vmem>>, vector<1x128xf32>
    %140 = vector.broadcast %139 : vector<1x128xf32> to vector<32x128xf32>
    %141 = arith.addf %138, %140 : vector<32x128xf32>
    %142 = math.tanh %141 : vector<32x128xf32>
    %c0_87 = arith.constant 0 : index
    %c0_88 = arith.constant 0 : index
    %143 = vector.load %arg7[%c0_87, %c0_88] : memref<128x128xf32, #tpu.memory_space<vmem>>, vector<128x128xf32>
    %cst_89 = arith.constant dense<0.000000e+00> : vector<32x128xf32>
    %144 = tpu.matmul %142, %143, %cst_89 {dimension_numbers = #tpu.dot_dimension_numbers<[1], [0], [0], [1], [0, 0, 1, 1], [], []>} : vector<32x128xf32>, vector<128x128xf32>, vector<32x128xf32> -> vector<32x128xf32>
    %c0_90 = arith.constant 0 : index
    %c0_91 = arith.constant 0 : index
    %145 = vector.load %arg8[%c0_90, %c0_91] : memref<1x128xf32, #tpu.memory_space<vmem>>, vector<1x128xf32>
    %146 = vector.broadcast %145 : vector<1x128xf32> to vector<32x128xf32>
    %147 = arith.addf %144, %146 : vector<32x128xf32>
    %cst_92 = arith.constant dense<0xFF800000> : vector<32xf32>
    %148 = vector.multi_reduction <maximumf>, %147, %cst_92 [1] : vector<32x128xf32> to vector<32xf32>
    %149 = vector.shape_cast %148 : vector<32xf32> to vector<32x1xf32>
    %150 = tpu.iota {dimensions = array<i32: 1>} : vector<32x128xi32>
    %151 = vector.broadcast %149 : vector<32x1xf32> to vector<32x128xf32>
    %152 = arith.cmpf oeq, %147, %151 : vector<32x128xf32>
    %c128_i32_93 = arith.constant 128 : i32
    %153 = vector.broadcast %c128_i32_93 : i32 to vector<32x128xi32>
    %154 = arith.select %152, %150, %153 : vector<32x128xi1>, vector<32x128xi32>
    %cst_94 = arith.constant dense<2147483647> : vector<32xi32>
    %155 = vector.multi_reduction <minsi>, %154, %cst_94 [1] : vector<32x128xi32> to vector<32xi32>
    %156 = vector.shape_cast %155 : vector<32xi32> to vector<32x1xi32>
    %157 = vector.broadcast %156 : vector<32x1xi32> to vector<32x128xi32>
    %158 = arith.cmpi eq, %150, %157 : vector<32x128xi32>
    %159 = arith.extui %158 : vector<32x128xi1> to vector<32x128xi32>
    %160 = arith.sitofp %159 : vector<32x128xi32> to vector<32x128xf32>
    %161 = vector.broadcast %149 : vector<32x1xf32> to vector<32x128xf32>
    %162 = arith.subf %147, %161 : vector<32x128xf32>
    %163 = math.exp %162 : vector<32x128xf32>
    %cst_95 = arith.constant dense<0.000000e+00> : vector<32xf32>
    %164 = vector.multi_reduction <add>, %163, %cst_95 [1] : vector<32x128xf32> to vector<32xf32>
    %165 = vector.shape_cast %164 : vector<32xf32> to vector<32x1xf32>
    %166 = math.log %165 : vector<32x1xf32>
    %167 = vector.broadcast %166 : vector<32x1xf32> to vector<32x128xf32>
    %168 = arith.subf %162, %167 : vector<32x128xf32>
    %c0_96 = arith.constant 0 : index
    %c2 = arith.constant 2 : index
    %c0_97 = arith.constant 0 : index
    %169 = vector.load %arg9[%c0_96, %c2, %c0_97] : memref<32x8x128xf32, #tpu.memory_space<vmem>>, vector<32x1x128xf32>
    %170 = vector.shape_cast %169 : vector<32x1x128xf32> to vector<32x128xf32>
    %171 = vector.shape_cast %168 : vector<32x128xf32> to vector<32x1x128xf32>
    tpu.vector_store %arg9[%c0_96, %c2, %c0_97], %171 {strides = array<i32>} : memref<32x8x128xf32, #tpu.memory_space<vmem>>, vector<32x1x128xf32>,
    %c0_98 = arith.constant 0 : index
    %c0_99 = arith.constant 0 : index
    %172 = vector.load %arg4[%c0_98, %c0_99] : memref<128x128xf32, #tpu.memory_space<vmem>>, vector<128x128xf32>
    %cst_100 = arith.constant dense<0.000000e+00> : vector<32x128xf32>
    %173 = tpu.matmul %160, %172, %cst_100 {dimension_numbers = #tpu.dot_dimension_numbers<[1], [0], [0], [1], [0, 0, 1, 1], [], []>} : vector<32x128xf32>, vector<128x128xf32>, vector<32x128xf32> -> vector<32x128xf32>
    %c0_101 = arith.constant 0 : index
    %c0_102 = arith.constant 0 : index
    %174 = vector.load %arg5[%c0_101, %c0_102] : memref<128x128xf32, #tpu.memory_space<vmem>>, vector<128x128xf32>
    %cst_103 = arith.constant dense<0.000000e+00> : vector<32x128xf32>
    %175 = tpu.matmul %142, %174, %cst_103 {dimension_numbers = #tpu.dot_dimension_numbers<[1], [0], [0], [1], [0, 0, 1, 1], [], []>} : vector<32x128xf32>, vector<128x128xf32>, vector<32x128xf32> -> vector<32x128xf32>
    %176 = arith.addf %173, %175 : vector<32x128xf32>
    %c0_104 = arith.constant 0 : index
    %c0_105 = arith.constant 0 : index
    %177 = vector.load %arg6[%c0_104, %c0_105] : memref<1x128xf32, #tpu.memory_space<vmem>>, vector<1x128xf32>
    %178 = vector.broadcast %177 : vector<1x128xf32> to vector<32x128xf32>
    %179 = arith.addf %176, %178 : vector<32x128xf32>
    %180 = math.tanh %179 : vector<32x128xf32>
    %c0_106 = arith.constant 0 : index
    %c0_107 = arith.constant 0 : index
    %181 = vector.load %arg7[%c0_106, %c0_107] : memref<128x128xf32, #tpu.memory_space<vmem>>, vector<128x128xf32>
    %cst_108 = arith.constant dense<0.000000e+00> : vector<32x128xf32>
    %182 = tpu.matmul %180, %181, %cst_108 {dimension_numbers = #tpu.dot_dimension_numbers<[1], [0], [0], [1], [0, 0, 1, 1], [], []>} : vector<32x128xf32>, vector<128x128xf32>, vector<32x128xf32> -> vector<32x128xf32>
    %c0_109 = arith.constant 0 : index
    %c0_110 = arith.constant 0 : index
    %183 = vector.load %arg8[%c0_109, %c0_110] : memref<1x128xf32, #tpu.memory_space<vmem>>, vector<1x128xf32>
    %184 = vector.broadcast %183 : vector<1x128xf32> to vector<32x128xf32>
    %185 = arith.addf %182, %184 : vector<32x128xf32>
    %cst_111 = arith.constant dense<0xFF800000> : vector<32xf32>
    %186 = vector.multi_reduction <maximumf>, %185, %cst_111 [1] : vector<32x128xf32> to vector<32xf32>
    %187 = vector.shape_cast %186 : vector<32xf32> to vector<32x1xf32>
    %188 = tpu.iota {dimensions = array<i32: 1>} : vector<32x128xi32>
    %189 = vector.broadcast %187 : vector<32x1xf32> to vector<32x128xf32>
    %190 = arith.cmpf oeq, %185, %189 : vector<32x128xf32>
    %c128_i32_112 = arith.constant 128 : i32
    %191 = vector.broadcast %c128_i32_112 : i32 to vector<32x128xi32>
    %192 = arith.select %190, %188, %191 : vector<32x128xi1>, vector<32x128xi32>
    %cst_113 = arith.constant dense<2147483647> : vector<32xi32>
    %193 = vector.multi_reduction <minsi>, %192, %cst_113 [1] : vector<32x128xi32> to vector<32xi32>
    %194 = vector.shape_cast %193 : vector<32xi32> to vector<32x1xi32>
    %195 = vector.broadcast %194 : vector<32x1xi32> to vector<32x128xi32>
    %196 = arith.cmpi eq, %188, %195 : vector<32x128xi32>
    %197 = arith.extui %196 : vector<32x128xi1> to vector<32x128xi32>
    %198 = arith.sitofp %197 : vector<32x128xi32> to vector<32x128xf32>
    %199 = vector.broadcast %187 : vector<32x1xf32> to vector<32x128xf32>
    %200 = arith.subf %185, %199 : vector<32x128xf32>
    %201 = math.exp %200 : vector<32x128xf32>
    %cst_114 = arith.constant dense<0.000000e+00> : vector<32xf32>
    %202 = vector.multi_reduction <add>, %201, %cst_114 [1] : vector<32x128xf32> to vector<32xf32>
    %203 = vector.shape_cast %202 : vector<32xf32> to vector<32x1xf32>
    %204 = math.log %203 : vector<32x1xf32>
    %205 = vector.broadcast %204 : vector<32x1xf32> to vector<32x128xf32>
    %206 = arith.subf %200, %205 : vector<32x128xf32>
    %c0_115 = arith.constant 0 : index
    %c3 = arith.constant 3 : index
    %c0_116 = arith.constant 0 : index
    %207 = vector.load %arg9[%c0_115, %c3, %c0_116] : memref<32x8x128xf32, #tpu.memory_space<vmem>>, vector<32x1x128xf32>
    %208 = vector.shape_cast %207 : vector<32x1x128xf32> to vector<32x128xf32>
    %209 = vector.shape_cast %206 : vector<32x128xf32> to vector<32x1x128xf32>
    tpu.vector_store %arg9[%c0_115, %c3, %c0_116], %209 {strides = array<i32>} : memref<32x8x128xf32, #tpu.memory_space<vmem>>, vector<32x1x128xf32>,
    %c0_117 = arith.constant 0 : index
    %c0_118 = arith.constant 0 : index
    %210 = vector.load %arg4[%c0_117, %c0_118] : memref<128x128xf32, #tpu.memory_space<vmem>>, vector<128x128xf32>
    %cst_119 = arith.constant dense<0.000000e+00> : vector<32x128xf32>
    %211 = tpu.matmul %198, %210, %cst_119 {dimension_numbers = #tpu.dot_dimension_numbers<[1], [0], [0], [1], [0, 0, 1, 1], [], []>} : vector<32x128xf32>, vector<128x128xf32>, vector<32x128xf32> -> vector<32x128xf32>
    %c0_120 = arith.constant 0 : index
    %c0_121 = arith.constant 0 : index
    %212 = vector.load %arg5[%c0_120, %c0_121] : memref<128x128xf32, #tpu.memory_space<vmem>>, vector<128x128xf32>
    %cst_122 = arith.constant dense<0.000000e+00> : vector<32x128xf32>
    %213 = tpu.matmul %180, %212, %cst_122 {dimension_numbers = #tpu.dot_dimension_numbers<[1], [0], [0], [1], [0, 0, 1, 1], [], []>} : vector<32x128xf32>, vector<128x128xf32>, vector<32x128xf32> -> vector<32x128xf32>
    %214 = arith.addf %211, %213 : vector<32x128xf32>
    %c0_123 = arith.constant 0 : index
    %c0_124 = arith.constant 0 : index
    %215 = vector.load %arg6[%c0_123, %c0_124] : memref<1x128xf32, #tpu.memory_space<vmem>>, vector<1x128xf32>
    %216 = vector.broadcast %215 : vector<1x128xf32> to vector<32x128xf32>
    %217 = arith.addf %214, %216 : vector<32x128xf32>
    %218 = math.tanh %217 : vector<32x128xf32>
    %c0_125 = arith.constant 0 : index
    %c0_126 = arith.constant 0 : index
    %219 = vector.load %arg7[%c0_125, %c0_126] : memref<128x128xf32, #tpu.memory_space<vmem>>, vector<128x128xf32>
    %cst_127 = arith.constant dense<0.000000e+00> : vector<32x128xf32>
    %220 = tpu.matmul %218, %219, %cst_127 {dimension_numbers = #tpu.dot_dimension_numbers<[1], [0], [0], [1], [0, 0, 1, 1], [], []>} : vector<32x128xf32>, vector<128x128xf32>, vector<32x128xf32> -> vector<32x128xf32>
    %c0_128 = arith.constant 0 : index
    %c0_129 = arith.constant 0 : index
    %221 = vector.load %arg8[%c0_128, %c0_129] : memref<1x128xf32, #tpu.memory_space<vmem>>, vector<1x128xf32>
    %222 = vector.broadcast %221 : vector<1x128xf32> to vector<32x128xf32>
    %223 = arith.addf %220, %222 : vector<32x128xf32>
    %cst_130 = arith.constant dense<0xFF800000> : vector<32xf32>
    %224 = vector.multi_reduction <maximumf>, %223, %cst_130 [1] : vector<32x128xf32> to vector<32xf32>
    %225 = vector.shape_cast %224 : vector<32xf32> to vector<32x1xf32>
    %226 = tpu.iota {dimensions = array<i32: 1>} : vector<32x128xi32>
    %227 = vector.broadcast %225 : vector<32x1xf32> to vector<32x128xf32>
    %228 = arith.cmpf oeq, %223, %227 : vector<32x128xf32>
    %c128_i32_131 = arith.constant 128 : i32
    %229 = vector.broadcast %c128_i32_131 : i32 to vector<32x128xi32>
    %230 = arith.select %228, %226, %229 : vector<32x128xi1>, vector<32x128xi32>
    %cst_132 = arith.constant dense<2147483647> : vector<32xi32>
    %231 = vector.multi_reduction <minsi>, %230, %cst_132 [1] : vector<32x128xi32> to vector<32xi32>
    %232 = vector.shape_cast %231 : vector<32xi32> to vector<32x1xi32>
    %233 = vector.broadcast %232 : vector<32x1xi32> to vector<32x128xi32>
    %234 = arith.cmpi eq, %226, %233 : vector<32x128xi32>
    %235 = arith.extui %234 : vector<32x128xi1> to vector<32x128xi32>
    %236 = arith.sitofp %235 : vector<32x128xi32> to vector<32x128xf32>
    %237 = vector.broadcast %225 : vector<32x1xf32> to vector<32x128xf32>
    %238 = arith.subf %223, %237 : vector<32x128xf32>
    %239 = math.exp %238 : vector<32x128xf32>
    %cst_133 = arith.constant dense<0.000000e+00> : vector<32xf32>
    %240 = vector.multi_reduction <add>, %239, %cst_133 [1] : vector<32x128xf32> to vector<32xf32>
    %241 = vector.shape_cast %240 : vector<32xf32> to vector<32x1xf32>
    %242 = math.log %241 : vector<32x1xf32>
    %243 = vector.broadcast %242 : vector<32x1xf32> to vector<32x128xf32>
    %244 = arith.subf %238, %243 : vector<32x128xf32>
    %c0_134 = arith.constant 0 : index
    %c4 = arith.constant 4 : index
    %c0_135 = arith.constant 0 : index
    %245 = vector.load %arg9[%c0_134, %c4, %c0_135] : memref<32x8x128xf32, #tpu.memory_space<vmem>>, vector<32x1x128xf32>
    %246 = vector.shape_cast %245 : vector<32x1x128xf32> to vector<32x128xf32>
    %247 = vector.shape_cast %244 : vector<32x128xf32> to vector<32x1x128xf32>
    tpu.vector_store %arg9[%c0_134, %c4, %c0_135], %247 {strides = array<i32>} : memref<32x8x128xf32, #tpu.memory_space<vmem>>, vector<32x1x128xf32>,
    %c0_136 = arith.constant 0 : index
    %c0_137 = arith.constant 0 : index
    %248 = vector.load %arg4[%c0_136, %c0_137] : memref<128x128xf32, #tpu.memory_space<vmem>>, vector<128x128xf32>
    %cst_138 = arith.constant dense<0.000000e+00> : vector<32x128xf32>
    %249 = tpu.matmul %236, %248, %cst_138 {dimension_numbers = #tpu.dot_dimension_numbers<[1], [0], [0], [1], [0, 0, 1, 1], [], []>} : vector<32x128xf32>, vector<128x128xf32>, vector<32x128xf32> -> vector<32x128xf32>
    %c0_139 = arith.constant 0 : index
    %c0_140 = arith.constant 0 : index
    %250 = vector.load %arg5[%c0_139, %c0_140] : memref<128x128xf32, #tpu.memory_space<vmem>>, vector<128x128xf32>
    %cst_141 = arith.constant dense<0.000000e+00> : vector<32x128xf32>
    %251 = tpu.matmul %218, %250, %cst_141 {dimension_numbers = #tpu.dot_dimension_numbers<[1], [0], [0], [1], [0, 0, 1, 1], [], []>} : vector<32x128xf32>, vector<128x128xf32>, vector<32x128xf32> -> vector<32x128xf32>
    %252 = arith.addf %249, %251 : vector<32x128xf32>
    %c0_142 = arith.constant 0 : index
    %c0_143 = arith.constant 0 : index
    %253 = vector.load %arg6[%c0_142, %c0_143] : memref<1x128xf32, #tpu.memory_space<vmem>>, vector<1x128xf32>
    %254 = vector.broadcast %253 : vector<1x128xf32> to vector<32x128xf32>
    %255 = arith.addf %252, %254 : vector<32x128xf32>
    %256 = math.tanh %255 : vector<32x128xf32>
    %c0_144 = arith.constant 0 : index
    %c0_145 = arith.constant 0 : index
    %257 = vector.load %arg7[%c0_144, %c0_145] : memref<128x128xf32, #tpu.memory_space<vmem>>, vector<128x128xf32>
    %cst_146 = arith.constant dense<0.000000e+00> : vector<32x128xf32>
    %258 = tpu.matmul %256, %257, %cst_146 {dimension_numbers = #tpu.dot_dimension_numbers<[1], [0], [0], [1], [0, 0, 1, 1], [], []>} : vector<32x128xf32>, vector<128x128xf32>, vector<32x128xf32> -> vector<32x128xf32>
    %c0_147 = arith.constant 0 : index
    %c0_148 = arith.constant 0 : index
    %259 = vector.load %arg8[%c0_147, %c0_148] : memref<1x128xf32, #tpu.memory_space<vmem>>, vector<1x128xf32>
    %260 = vector.broadcast %259 : vector<1x128xf32> to vector<32x128xf32>
    %261 = arith.addf %258, %260 : vector<32x128xf32>
    %cst_149 = arith.constant dense<0xFF800000> : vector<32xf32>
    %262 = vector.multi_reduction <maximumf>, %261, %cst_149 [1] : vector<32x128xf32> to vector<32xf32>
    %263 = vector.shape_cast %262 : vector<32xf32> to vector<32x1xf32>
    %264 = tpu.iota {dimensions = array<i32: 1>} : vector<32x128xi32>
    %265 = vector.broadcast %263 : vector<32x1xf32> to vector<32x128xf32>
    %266 = arith.cmpf oeq, %261, %265 : vector<32x128xf32>
    %c128_i32_150 = arith.constant 128 : i32
    %267 = vector.broadcast %c128_i32_150 : i32 to vector<32x128xi32>
    %268 = arith.select %266, %264, %267 : vector<32x128xi1>, vector<32x128xi32>
    %cst_151 = arith.constant dense<2147483647> : vector<32xi32>
    %269 = vector.multi_reduction <minsi>, %268, %cst_151 [1] : vector<32x128xi32> to vector<32xi32>
    %270 = vector.shape_cast %269 : vector<32xi32> to vector<32x1xi32>
    %271 = vector.broadcast %270 : vector<32x1xi32> to vector<32x128xi32>
    %272 = arith.cmpi eq, %264, %271 : vector<32x128xi32>
    %273 = arith.extui %272 : vector<32x128xi1> to vector<32x128xi32>
    %274 = arith.sitofp %273 : vector<32x128xi32> to vector<32x128xf32>
    %275 = vector.broadcast %263 : vector<32x1xf32> to vector<32x128xf32>
    %276 = arith.subf %261, %275 : vector<32x128xf32>
    %277 = math.exp %276 : vector<32x128xf32>
    %cst_152 = arith.constant dense<0.000000e+00> : vector<32xf32>
    %278 = vector.multi_reduction <add>, %277, %cst_152 [1] : vector<32x128xf32> to vector<32xf32>
    %279 = vector.shape_cast %278 : vector<32xf32> to vector<32x1xf32>
    %280 = math.log %279 : vector<32x1xf32>
    %281 = vector.broadcast %280 : vector<32x1xf32> to vector<32x128xf32>
    %282 = arith.subf %276, %281 : vector<32x128xf32>
    %c0_153 = arith.constant 0 : index
    %c5 = arith.constant 5 : index
    %c0_154 = arith.constant 0 : index
    %283 = vector.load %arg9[%c0_153, %c5, %c0_154] : memref<32x8x128xf32, #tpu.memory_space<vmem>>, vector<32x1x128xf32>
    %284 = vector.shape_cast %283 : vector<32x1x128xf32> to vector<32x128xf32>
    %285 = vector.shape_cast %282 : vector<32x128xf32> to vector<32x1x128xf32>
    tpu.vector_store %arg9[%c0_153, %c5, %c0_154], %285 {strides = array<i32>} : memref<32x8x128xf32, #tpu.memory_space<vmem>>, vector<32x1x128xf32>,
    %c0_155 = arith.constant 0 : index
    %c0_156 = arith.constant 0 : index
    %286 = vector.load %arg4[%c0_155, %c0_156] : memref<128x128xf32, #tpu.memory_space<vmem>>, vector<128x128xf32>
    %cst_157 = arith.constant dense<0.000000e+00> : vector<32x128xf32>
    %287 = tpu.matmul %274, %286, %cst_157 {dimension_numbers = #tpu.dot_dimension_numbers<[1], [0], [0], [1], [0, 0, 1, 1], [], []>} : vector<32x128xf32>, vector<128x128xf32>, vector<32x128xf32> -> vector<32x128xf32>
    %c0_158 = arith.constant 0 : index
    %c0_159 = arith.constant 0 : index
    %288 = vector.load %arg5[%c0_158, %c0_159] : memref<128x128xf32, #tpu.memory_space<vmem>>, vector<128x128xf32>
    %cst_160 = arith.constant dense<0.000000e+00> : vector<32x128xf32>
    %289 = tpu.matmul %256, %288, %cst_160 {dimension_numbers = #tpu.dot_dimension_numbers<[1], [0], [0], [1], [0, 0, 1, 1], [], []>} : vector<32x128xf32>, vector<128x128xf32>, vector<32x128xf32> -> vector<32x128xf32>
    %290 = arith.addf %287, %289 : vector<32x128xf32>
    %c0_161 = arith.constant 0 : index
    %c0_162 = arith.constant 0 : index
    %291 = vector.load %arg6[%c0_161, %c0_162] : memref<1x128xf32, #tpu.memory_space<vmem>>, vector<1x128xf32>
    %292 = vector.broadcast %291 : vector<1x128xf32> to vector<32x128xf32>
    %293 = arith.addf %290, %292 : vector<32x128xf32>
    %294 = math.tanh %293 : vector<32x128xf32>
    %c0_163 = arith.constant 0 : index
    %c0_164 = arith.constant 0 : index
    %295 = vector.load %arg7[%c0_163, %c0_164] : memref<128x128xf32, #tpu.memory_space<vmem>>, vector<128x128xf32>
    %cst_165 = arith.constant dense<0.000000e+00> : vector<32x128xf32>
    %296 = tpu.matmul %294, %295, %cst_165 {dimension_numbers = #tpu.dot_dimension_numbers<[1], [0], [0], [1], [0, 0, 1, 1], [], []>} : vector<32x128xf32>, vector<128x128xf32>, vector<32x128xf32> -> vector<32x128xf32>
    %c0_166 = arith.constant 0 : index
    %c0_167 = arith.constant 0 : index
    %297 = vector.load %arg8[%c0_166, %c0_167] : memref<1x128xf32, #tpu.memory_space<vmem>>, vector<1x128xf32>
    %298 = vector.broadcast %297 : vector<1x128xf32> to vector<32x128xf32>
    %299 = arith.addf %296, %298 : vector<32x128xf32>
    %cst_168 = arith.constant dense<0xFF800000> : vector<32xf32>
    %300 = vector.multi_reduction <maximumf>, %299, %cst_168 [1] : vector<32x128xf32> to vector<32xf32>
    %301 = vector.shape_cast %300 : vector<32xf32> to vector<32x1xf32>
    %302 = tpu.iota {dimensions = array<i32: 1>} : vector<32x128xi32>
    %303 = vector.broadcast %301 : vector<32x1xf32> to vector<32x128xf32>
    %304 = arith.cmpf oeq, %299, %303 : vector<32x128xf32>
    %c128_i32_169 = arith.constant 128 : i32
    %305 = vector.broadcast %c128_i32_169 : i32 to vector<32x128xi32>
    %306 = arith.select %304, %302, %305 : vector<32x128xi1>, vector<32x128xi32>
    %cst_170 = arith.constant dense<2147483647> : vector<32xi32>
    %307 = vector.multi_reduction <minsi>, %306, %cst_170 [1] : vector<32x128xi32> to vector<32xi32>
    %308 = vector.shape_cast %307 : vector<32xi32> to vector<32x1xi32>
    %309 = vector.broadcast %308 : vector<32x1xi32> to vector<32x128xi32>
    %310 = arith.cmpi eq, %302, %309 : vector<32x128xi32>
    %311 = arith.extui %310 : vector<32x128xi1> to vector<32x128xi32>
    %312 = arith.sitofp %311 : vector<32x128xi32> to vector<32x128xf32>
    %313 = vector.broadcast %301 : vector<32x1xf32> to vector<32x128xf32>
    %314 = arith.subf %299, %313 : vector<32x128xf32>
    %315 = math.exp %314 : vector<32x128xf32>
    %cst_171 = arith.constant dense<0.000000e+00> : vector<32xf32>
    %316 = vector.multi_reduction <add>, %315, %cst_171 [1] : vector<32x128xf32> to vector<32xf32>
    %317 = vector.shape_cast %316 : vector<32xf32> to vector<32x1xf32>
    %318 = math.log %317 : vector<32x1xf32>
    %319 = vector.broadcast %318 : vector<32x1xf32> to vector<32x128xf32>
    %320 = arith.subf %314, %319 : vector<32x128xf32>
    %c0_172 = arith.constant 0 : index
    %c6 = arith.constant 6 : index
    %c0_173 = arith.constant 0 : index
    %321 = vector.load %arg9[%c0_172, %c6, %c0_173] : memref<32x8x128xf32, #tpu.memory_space<vmem>>, vector<32x1x128xf32>
    %322 = vector.shape_cast %321 : vector<32x1x128xf32> to vector<32x128xf32>
    %323 = vector.shape_cast %320 : vector<32x128xf32> to vector<32x1x128xf32>
    tpu.vector_store %arg9[%c0_172, %c6, %c0_173], %323 {strides = array<i32>} : memref<32x8x128xf32, #tpu.memory_space<vmem>>, vector<32x1x128xf32>,
    %c0_174 = arith.constant 0 : index
    %c0_175 = arith.constant 0 : index
    %324 = vector.load %arg4[%c0_174, %c0_175] : memref<128x128xf32, #tpu.memory_space<vmem>>, vector<128x128xf32>
    %cst_176 = arith.constant dense<0.000000e+00> : vector<32x128xf32>
    %325 = tpu.matmul %312, %324, %cst_176 {dimension_numbers = #tpu.dot_dimension_numbers<[1], [0], [0], [1], [0, 0, 1, 1], [], []>} : vector<32x128xf32>, vector<128x128xf32>, vector<32x128xf32> -> vector<32x128xf32>
    %c0_177 = arith.constant 0 : index
    %c0_178 = arith.constant 0 : index
    %326 = vector.load %arg5[%c0_177, %c0_178] : memref<128x128xf32, #tpu.memory_space<vmem>>, vector<128x128xf32>
    %cst_179 = arith.constant dense<0.000000e+00> : vector<32x128xf32>
    %327 = tpu.matmul %294, %326, %cst_179 {dimension_numbers = #tpu.dot_dimension_numbers<[1], [0], [0], [1], [0, 0, 1, 1], [], []>} : vector<32x128xf32>, vector<128x128xf32>, vector<32x128xf32> -> vector<32x128xf32>
    %328 = arith.addf %325, %327 : vector<32x128xf32>
    %c0_180 = arith.constant 0 : index
    %c0_181 = arith.constant 0 : index
    %329 = vector.load %arg6[%c0_180, %c0_181] : memref<1x128xf32, #tpu.memory_space<vmem>>, vector<1x128xf32>
    %330 = vector.broadcast %329 : vector<1x128xf32> to vector<32x128xf32>
    %331 = arith.addf %328, %330 : vector<32x128xf32>
    %332 = math.tanh %331 : vector<32x128xf32>
    %c0_182 = arith.constant 0 : index
    %c0_183 = arith.constant 0 : index
    %333 = vector.load %arg7[%c0_182, %c0_183] : memref<128x128xf32, #tpu.memory_space<vmem>>, vector<128x128xf32>
    %cst_184 = arith.constant dense<0.000000e+00> : vector<32x128xf32>
    %334 = tpu.matmul %332, %333, %cst_184 {dimension_numbers = #tpu.dot_dimension_numbers<[1], [0], [0], [1], [0, 0, 1, 1], [], []>} : vector<32x128xf32>, vector<128x128xf32>, vector<32x128xf32> -> vector<32x128xf32>
    %c0_185 = arith.constant 0 : index
    %c0_186 = arith.constant 0 : index
    %335 = vector.load %arg8[%c0_185, %c0_186] : memref<1x128xf32, #tpu.memory_space<vmem>>, vector<1x128xf32>
    %336 = vector.broadcast %335 : vector<1x128xf32> to vector<32x128xf32>
    %337 = arith.addf %334, %336 : vector<32x128xf32>
    %cst_187 = arith.constant dense<0xFF800000> : vector<32xf32>
    %338 = vector.multi_reduction <maximumf>, %337, %cst_187 [1] : vector<32x128xf32> to vector<32xf32>
    %339 = vector.shape_cast %338 : vector<32xf32> to vector<32x1xf32>
    %340 = vector.broadcast %339 : vector<32x1xf32> to vector<32x128xf32>
    %341 = arith.subf %337, %340 : vector<32x128xf32>
    %342 = math.exp %341 : vector<32x128xf32>
    %cst_188 = arith.constant dense<0.000000e+00> : vector<32xf32>
    %343 = vector.multi_reduction <add>, %342, %cst_188 [1] : vector<32x128xf32> to vector<32xf32>
    %344 = vector.shape_cast %343 : vector<32xf32> to vector<32x1xf32>
    %345 = math.log %344 : vector<32x1xf32>
    %346 = vector.broadcast %345 : vector<32x1xf32> to vector<32x128xf32>
    %347 = arith.subf %341, %346 : vector<32x128xf32>
    %c0_189 = arith.constant 0 : index
    %c7 = arith.constant 7 : index
    %c0_190 = arith.constant 0 : index
    %348 = vector.load %arg9[%c0_189, %c7, %c0_190] : memref<32x8x128xf32, #tpu.memory_space<vmem>>, vector<32x1x128xf32>
    %349 = vector.shape_cast %348 : vector<32x1x128xf32> to vector<32x128xf32>
    %350 = vector.shape_cast %347 : vector<32x128xf32> to vector<32x1x128xf32>
    tpu.vector_store %arg9[%c0_189, %c7, %c0_190], %350 {strides = array<i32>} : memref<32x8x128xf32, #tpu.memory_space<vmem>>, vector<32x1x128xf32>,
    return
  }
  func.func @transform_0(%arg0: i32) -> (i32, i32, i32) {
    %c0_i32 = arith.constant 0 : i32
    %c0_i32_0 = arith.constant 0 : i32
    %c0_i32_1 = arith.constant 0 : i32
    return %c0_i32, %arg0, %c0_i32_0 : i32, i32, i32
  }
  func.func @transform_1(%arg0: i32) -> (i32, i32) {
    %c0_i32 = arith.constant 0 : i32
    %c0_i32_0 = arith.constant 0 : i32
    return %arg0, %c0_i32 : i32, i32
  }
  func.func @transform_2(%arg0: i32) -> (i32, i32) {
    %c0_i32 = arith.constant 0 : i32
    %c0_i32_0 = arith.constant 0 : i32
    %c0_i32_1 = arith.constant 0 : i32
    return %c0_i32, %c0_i32_0 : i32, i32
  }
  func.func @transform_3(%arg0: i32) -> (i32, i32) {
    %c0_i32 = arith.constant 0 : i32
    %c0_i32_0 = arith.constant 0 : i32
    %c0_i32_1 = arith.constant 0 : i32
    return %c0_i32, %c0_i32_0 : i32, i32
  }
  func.func @transform_4(%arg0: i32) -> (i32, i32) {
    %c0_i32 = arith.constant 0 : i32
    %c0_i32_0 = arith.constant 0 : i32
    %c0_i32_1 = arith.constant 0 : i32
    return %c0_i32, %c0_i32_0 : i32, i32
  }
  func.func @transform_5(%arg0: i32) -> (i32, i32) {
    %c0_i32 = arith.constant 0 : i32
    %c0_i32_0 = arith.constant 0 : i32
    %c0_i32_1 = arith.constant 0 : i32
    return %c0_i32, %c0_i32_0 : i32, i32
  }
  func.func @transform_6(%arg0: i32) -> (i32, i32) {
    %c0_i32 = arith.constant 0 : i32
    %c0_i32_0 = arith.constant 0 : i32
    %c0_i32_1 = arith.constant 0 : i32
    return %c0_i32, %c0_i32_0 : i32, i32
  }
  func.func @transform_7(%arg0: i32) -> (i32, i32) {
    %c0_i32 = arith.constant 0 : i32
    %c0_i32_0 = arith.constant 0 : i32
    %c0_i32_1 = arith.constant 0 : i32
    return %c0_i32, %c0_i32_0 : i32, i32
  }
  func.func @transform_8(%arg0: i32) -> (i32, i32, i32) {
    %c0_i32 = arith.constant 0 : i32
    %c0_i32_0 = arith.constant 0 : i32
    %c0_i32_1 = arith.constant 0 : i32
    return %arg0, %c0_i32, %c0_i32_0 : i32, i32, i32
  }
}

</mosaic_0001>

<bundles_post_ra>
// kernel: seq2seq_forward.1
= control target key start
LH: loop header
LB: loop body
LE: loop exit
PB: predicated region body
PF: predicated region fallthrough
CT: control target
= control target key end

     0   :  { %13 = vsyncpa [#allocation4], 0  ;;  %s12931_s0 = inlined_call_operand.vmem [shape: f32[8,64,128], index: 0, kind: input, shape index: {}]   ;;  %s12932_s1 = inlined_call_operand.vmem [shape: f32[64,128], index: 1, kind: input, shape index: {}]   ;;  %s12933_s2 = inlined_call_operand.vmem [shape: f32[128,128], index: 2, kind: input, shape index: {}]   ;;  %s12934_s3 = inlined_call_operand.vmem [shape: f32[128,128], index: 3, kind: input, shape index: {}]   ;;  %s12935_s4 = inlined_call_operand.vmem [shape: f32[128,128], index: 4, kind: input, shape index: {}]   ;;  %s12936_s5 = inlined_call_operand.vmem [shape: f32[1,128], index: 5, kind: input, shape index: {}]   ;;  %s12937_s6 = inlined_call_operand.vmem [shape: f32[128,128], index: 6, kind: input, shape index: {}]   ;;  %s12938_s7 = inlined_call_operand.vmem [shape: f32[1,128], index: 7, kind: input, shape index: {}]   ;;  %s12939_s8 = inlined_call_operand.hbm [shape: f32[64,8,128], index: 8, kind: output, shape index: {}]  }
   0x1   :  { %15 = vsyncpa [#allocation4 + $0x1], 0  ;;  %s10523_s27 = smov 0   ;;  %s10525_s28 = smov 0  }
   0x2   :  { %s10527_s29 = smov 0   ;;  %s10529_s30 = smov 0  }
   0x3 LB: > { %s10544_s9 = sadd.s32 4294967295, %s10470_s30   ;;  %s6950_s10 = sadd.s32 4294967294, %s10470_s30   ;;  %s10470_s30 = sphi %s10529_s30, %s13037_s30   ;;  %s10466_s29 = sphi %s10527_s29, %s13036_s29   ;;  %s10462_s28 = sphi %s10525_s28, %s13035_s28   ;;  %s10458_s27 = sphi %s10523_s27, %s13034_s27  }
   0x4   : > { %s10548_s11 = sadd.s32 1, %s10470_s30   ;;  %s28_s12 = sadd.s32 1, %s10466_s29 }
   0x5   : > { %s25_s13 = ssub.s32 %s10470_s30, %s10548_s11  ;;  %p35_p0 = scmp.ne.s32.totalorder %s10466_s29, %s10462_s28 }
   0x6   : > { %p26_p1 = scmp.eq.s32.totalorder %s25_s13, 0  ;;  %p36_p2 = scmp.eq.s32.totalorder %s10470_s30, 0 }
   0x7   : > { %p217_p3 = scmp.eq.s32.totalorder %s10544_s9, 1  ;;  %p222_p4 = scmp.ne.s32.totalorder %s10462_s28, %s10458_s27 }
   0x8   : > { %s10560_s14 = scalar_select %p26_p1, %s10466_s29, %s28_s12  }
   0x9   : > { %p37_p5 = por %p36_p2, %p35_p0  ;;  %p10562_p6 = por %p217_p3, %p35_p0 }
   0xa   : > { %p223_p7 = scmp.eq.s32.totalorder %s6950_s10, 1  ;;  %p6952_p9 = scmp.ge.s32.totalorder %s10470_s30, 2 }
   0xc   : > { %p10566_p8 = por %p223_p7, %p222_p4  ;;  %257 = sbr.rel (%p6952_p9) target bundleno = 39 (0x27), region = 40 }
  0x13   : > { %260 = sbr.rel (!%p37_p5) target bundleno = 39 (0x27), region = 44  ;;  %s262_s17 = sand.u32 (%p37_p5), 1, %s10466_s29  }
  0x14   : > { %s7194_s18 = sshll.u32 (%p37_p5), %s10470_s30, 5  ;;  %s6953_s19 = sshll.u32 (%p37_p5), %s262_s17, 8 }
  0x15   : > { %s10578_s22 = scalar_lea.vmem (%p37_p5), %s12931_s0, %s7194_s18  ;;  %s10583_s23 = scalar_lea.vmem (%p37_p5), [#allocation2], %s6953_s19 }
  0x16   : > { %v357_v0 = vld [vmem:[%s10578_s22] sm:$0xff] (%p37_p5)  ;;  %v359_v1 = vld [vmem:[%s10578_s22 + $0x8] sm:$0xff] (%p37_p5)  ;;  %v361_v2 = vld [vmem:[%s10578_s22 + $0x10] sm:$0xff] (%p37_p5) }
  0x17   : > { %358 = vst [vmem:[%s10583_s23] sm:$0xff] (%p37_p5), %v357_v0  ;;  %360 = vst [vmem:[%s10583_s23 + $0x8] sm:$0xff] (%p37_p5), %v359_v1  ;;  %v363_v3 = vld [vmem:[%s10578_s22 + $0x18] sm:$0xff] (%p37_p5)  ;;  %v365_v4 = vld [vmem:[%s10578_s22 + $0x40] sm:$0xff] (%p37_p5) }
  0x18   : > { %362 = vst [vmem:[%s10583_s23 + $0x10] sm:$0xff] (%p37_p5), %v361_v2  ;;  %v367_v5 = vld [vmem:[%s10578_s22 + $0x48] sm:$0xff] (%p37_p5)  ;;  %364 = vst [vmem:[%s10583_s23 + $0x18] sm:$0xff] (%p37_p5), %v363_v3  ;;  %v369_v6 = vld [vmem:[%s10578_s22 + $0x50] sm:$0xff] (%p37_p5) }
  0x19   : > { %366 = vst [vmem:[%s10583_s23 + $0x20] sm:$0xff] (%p37_p5), %v365_v4  ;;  %368 = vst [vmem:[%s10583_s23 + $0x28] sm:$0xff] (%p37_p5), %v367_v5  ;;  %v371_v7 = vld [vmem:[%s10578_s22 + $0x58] sm:$0xff] (%p37_p5)  ;;  %v373_v8 = vld [vmem:[%s10578_s22 + $0x80] sm:$0xff] (%p37_p5) }
  0x1a   : > { %370 = vst [vmem:[%s10583_s23 + $0x30] sm:$0xff] %v369_v6  ;;  %372 = vst [vmem:[%s10583_s23 + $0x38] sm:$0xff] %v371_v7  ;;  %v375_v9 = vld [vmem:[%s10578_s22 + $0x88] sm:$0xff]  ;;  %v377_v10 = vld [vmem:[%s10578_s22 + $0x90] sm:$0xff] }
  0x1b   : > { %374 = vst [vmem:[%s10583_s23 + $0x40] sm:$0xff] %v373_v8  ;;  %v379_v11 = vld [vmem:[%s10578_s22 + $0x98] sm:$0xff]  ;;  %376 = vst [vmem:[%s10583_s23 + $0x48] sm:$0xff] %v375_v9  ;;  %v381_v12 = vld [vmem:[%s10578_s22 + $0xc0] sm:$0xff] }
  0x1c   : > { %378 = vst [vmem:[%s10583_s23 + $0x50] sm:$0xff] %v377_v10  ;;  %380 = vst [vmem:[%s10583_s23 + $0x58] sm:$0xff] %v379_v11  ;;  %v383_v13 = vld [vmem:[%s10578_s22 + $0xc8] sm:$0xff]  ;;  %v385_v14 = vld [vmem:[%s10578_s22 + $0xd0] sm:$0xff] }
  0x1d   : > { %382 = vst [vmem:[%s10583_s23 + $0x60] sm:$0xff] %v381_v12  ;;  %384 = vst [vmem:[%s10583_s23 + $0x68] sm:$0xff] %v383_v13  ;;  %v387_v15 = vld [vmem:[%s10578_s22 + $0xd8] sm:$0xff]  ;;  %v389_v16 = vld [vmem:[%s10578_s22 + $0x100] sm:$0xff] }
  0x1e   : > { %386 = vst [vmem:[%s10583_s23 + $0x70] sm:$0xff] %v385_v14  ;;  %v391_v17 = vld [vmem:[%s10578_s22 + $0x108] sm:$0xff]  ;;  %388 = vst [vmem:[%s10583_s23 + $0x78] sm:$0xff] %v387_v15  ;;  %v393_v18 = vld [vmem:[%s10578_s22 + $0x110] sm:$0xff] }
  0x1f   : > { %390 = vst [vmem:[%s10583_s23 + $0x80] sm:$0xff] %v389_v16  ;;  %392 = vst [vmem:[%s10583_s23 + $0x88] sm:$0xff] %v391_v17  ;;  %v395_v19 = vld [vmem:[%s10578_s22 + $0x118] sm:$0xff]  ;;  %v397_v20 = vld [vmem:[%s10578_s22 + $0x140] sm:$0xff] }
  0x20   : > { %394 = vst [vmem:[%s10583_s23 + $0x90] sm:$0xff] %v393_v18  ;;  %396 = vst [vmem:[%s10583_s23 + $0x98] sm:$0xff] %v395_v19  ;;  %v399_v21 = vld [vmem:[%s10578_s22 + $0x148] sm:$0xff]  ;;  %v401_v22 = vld [vmem:[%s10578_s22 + $0x150] sm:$0xff] }
  0x21   : > { %398 = vst [vmem:[%s10583_s23 + $0xa0] sm:$0xff] %v397_v20  ;;  %v403_v23 = vld [vmem:[%s10578_s22 + $0x158] sm:$0xff]  ;;  %400 = vst [vmem:[%s10583_s23 + $0xa8] sm:$0xff] %v399_v21  ;;  %v405_v24 = vld [vmem:[%s10578_s22 + $0x180] sm:$0xff] }
  0x22   : > { %402 = vst [vmem:[%s10583_s23 + $0xb0] sm:$0xff] %v401_v22  ;;  %404 = vst [vmem:[%s10583_s23 + $0xb8] sm:$0xff] %v403_v23  ;;  %v407_v25 = vld [vmem:[%s10578_s22 + $0x188] sm:$0xff]  ;;  %v409_v26 = vld [vmem:[%s10578_s22 + $0x190] sm:$0xff] }
  0x23   : > { %406 = vst [vmem:[%s10583_s23 + $0xc0] sm:$0xff] %v405_v24  ;;  %408 = vst [vmem:[%s10583_s23 + $0xc8] sm:$0xff] %v407_v25  ;;  %v411_v27 = vld [vmem:[%s10578_s22 + $0x198] sm:$0xff]  ;;  %v413_v28 = vld [vmem:[%s10578_s22 + $0x1c0] sm:$0xff] }
  0x24   : > { %410 = vst [vmem:[%s10583_s23 + $0xd0] sm:$0xff] %v409_v26  ;;  %v415_v29 = vld [vmem:[%s10578_s22 + $0x1c8] sm:$0xff]  ;;  %412 = vst [vmem:[%s10583_s23 + $0xd8] sm:$0xff] %v411_v27  ;;  %v417_v30 = vld [vmem:[%s10578_s22 + $0x1d0] sm:$0xff] }
  0x25   : > { %414 = vst [vmem:[%s10583_s23 + $0xe0] sm:$0xff] %v413_v28  ;;  %416 = vst [vmem:[%s10583_s23 + $0xe8] sm:$0xff] %v415_v29  ;;  %v419_v31 = vld [vmem:[%s10578_s22 + $0x1d8] sm:$0xff] }
  0x26   : > { %418 = vst [vmem:[%s10583_s23 + $0xf0] sm:$0xff] %v417_v30  ;;  %420 = vst [vmem:[%s10583_s23 + $0xf8] sm:$0xff] %v419_v31 }
  0x27 PF: > { %p6956_p10 = scmp.ge.s32.totalorder %s10470_s30, 1  ;;  %p434_p11 = scmp.lt.s32.totalorder %s10470_s30, 3 }
  0x29   : > { %p435_p12 = pnand %p6956_p10, %p434_p11 }
  0x2b   : > { %438 = sbr.rel (%p435_p12) target bundleno = 8900 (0x22c4), region = 86 }
  0x32   : > { %v491_v32 = vld [vmem:[%s12933_s2] sm:$0xff]  ;;  %v492_v33 = vld [vmem:[%s12933_s2 + $0x8] sm:$0xff]  ;;  %v493_v34 = vld [vmem:[%s12933_s2 + $0x10] sm:$0xff]  ;;  %v10472_v37 = vmov 0.0   ;;  %s441_s17 = sand.u32 1, %s10462_s28   ;;  %s6959_s26 = sshll.u32 %s10544_s9, 2 }
  0x33   : > { %v10657_v35 = vpack.c.bf16 %v492_v33, %v491_v32  ;;  %v494_v36 = vld [vmem:[%s12933_s2 + $0x18] sm:$0xff]  ;;  %7868 = vmatprep.mubr.f32.mxu0 %v10472_v37  ;;  %v495_v39 = vld [vmem:[%s12933_s2 + $0x20] sm:$0xff]  ;;  %v496_v40 = vld [vmem:[%s12933_s2 + $0x28] sm:$0xff]  ;;  %s10765_s18 = sshll.u32 %s441_s17, 8  ;;  %p481_p13 = scmp.lt.s32.totalorder %s6959_s26, 7 }
  0x34   : > { %v10662_v38 = vpack.c.bf16 %v494_v36, %v493_v34  ;;  %v10675_v41 = vpack.c.bf16 %v496_v40, %v495_v39  ;;  %v497_v42 = vld [vmem:[%s12933_s2 + $0x30] sm:$0xff]  ;;  %v498_v43 = vld [vmem:[%s12933_s2 + $0x38] sm:$0xff]  ;;  %v499_v45 = vld [vmem:[%s12933_s2 + $0x40] sm:$0xff]  ;;  %s10768_s19 = scalar_lea.vmem [#allocation2], %s10765_s18  ;;  %s12369_s23 = scalar_lea.vmem [#allocation3], %s10765_s18 }
  0x35   : > { %9053 = vmatprep.subr.bf16.mxu0 %v10657_v35  ;;  %9085 = vmatprep.subr.bf16.mxu1 %v10657_v35  ;;  %v10687_v44 = vpack.c.bf16 %v498_v43, %v497_v42  ;;  %v500_v46 = vld [vmem:[%s12933_s2 + $0x48] sm:$0xff]  ;;  %v501_v48 = vld [vmem:[%s12933_s2 + $0x50] sm:$0xff]  ;;  %v502_v49 = vld [vmem:[%s12933_s2 + $0x58] sm:$0xff]  ;;  %s13039_s26 = smov (!%p481_p13, %s6959_s26), 7  ;;  %s7195_s18 = sshll.u32 %s10544_s9, 12 }
  0x36   : > { %9055 = vmatpush3.bf16.msra.mxu0 %v10657_v35  ;;  %9087 = vmatpush3.bf16.msra.mxu1 %v10657_v35  ;;  %v10699_v47 = vpack.c.bf16 %v500_v46, %v499_v45  ;;  %v10711_v50 = vpack.c.bf16 %v502_v49, %v501_v48  ;;  %v503_v51 = vld [vmem:[%s12933_s2 + $0x60] sm:$0xff]  ;;  %v504_v52 = vld [vmem:[%s12933_s2 + $0x68] sm:$0xff]  ;;  %v505_v54 = vld [vmem:[%s12933_s2 + $0x70] sm:$0xff]  ;;  %s6960_s21 = sshll.u32 %s13039_s26, 3  ;;  %s6870_s24 = sshll.u32 %s12369_s23, 4  ;;  %s12881_s24 = int_to_ptr.vmem [resolvable:$true] %s6870_s24 }
  0x37   : > { %9057 = vmatprep.subr.bf16.mxu0 %v10662_v38  ;;  %9089 = vmatprep.subr.bf16.mxu1 %v10662_v38  ;;  %v10723_v53 = vpack.c.bf16 %v504_v52, %v503_v51  ;;  %v506_v55 = vld [vmem:[%s12933_s2 + $0x78] sm:$0xff]  ;;  %v488_v57 = vld [vmem:[%s10768_s19 + $0x8] sm:$0xff]  ;;  %v487_v58 = vld [vmem:[%s10768_s19] sm:$0xff]  ;;  %s11037_s12 = scalar_lea.vmem %s12932_s1, %s6960_s21  ;;  %s12879_s10 = scalar_lea.hbm %s12939_s8, %s7195_s18 }
  0x38   : > { %v10735_v56 = vpack.c.bf16 %v506_v55, %v505_v54  ;;  %v490_v63 = vld [vmem:[%s10768_s19 + $0x18] sm:$0xff]  ;;  %v489_v0 = vld [vmem:[%s10768_s19 + $0x10] sm:$0xff]  ;;  %v6962_v9 = vld [vmem:[%s10768_s19 + $0x28] sm:$0xff]  ;;  %s10408_s26 = scalar_lea.vmem %s12881_s24, 4096  ;;  %s10475_s13 = smov [#allocation3]  }
  0x39   : > { %v6961_v10 = vld [vmem:[%s10768_s19 + $0x20] sm:$0xff]  ;;  %v6964_v15 = vld [vmem:[%s10768_s19 + $0x38] sm:$0xff]  ;;  %v6963_v16 = vld [vmem:[%s10768_s19 + $0x30] sm:$0xff]  ;;  %p10409_p0 = scmp.ne.s32.totalorder %s12881_s24, %s10408_s26  ;;  %s10412_s20 = sshll.u32 %s10475_s13, 4  ;;  %s10413_s20 = int_to_ptr.vmem [resolvable:$false] %s10412_s20 }
  0x3a   : > { %9059 = vmatpush3.bf16.msra.mxu0 %v10662_v38  ;;  %9091 = vmatpush3.bf16.msra.mxu1 %v10662_v38  ;;  %v6966_v25 = vld [vmem:[%s10768_s19 + $0x48] sm:$0xff]  ;;  %v6965_v26 = vld [vmem:[%s10768_s19 + $0x40] sm:$0xff]  ;;  %v6968_v31 = vld [vmem:[%s10768_s19 + $0x58] sm:$0xff]  ;;  %p10415_p3 = scmp.lt.s32.totalorder %s12881_s24, %s10413_s20 }
  0x3b   : > { %9061 = vmatprep.subr.bf16.mxu0 %v10675_v41  ;;  %9093 = vmatprep.subr.bf16.mxu1 %v10675_v41  ;;  %v6967_v32 = vld [vmem:[%s10768_s19 + $0x50] sm:$0xff]  ;;  %v6970_v45 = vld [vmem:[%s10768_s19 + $0x68] sm:$0xff]  ;;  %v6969_v46 = vld [vmem:[%s10768_s19 + $0x60] sm:$0xff]  ;;  %p10410_p1 = pnand %p10409_p0, %p10562_p6 }
  0x3c   : > { %v6972_v54 = vld [vmem:[%s10768_s19 + $0x78] sm:$0xff]  ;;  %v6971_v55 = vld [vmem:[%s10768_s19 + $0x70] sm:$0xff] }
  0x3d   : > { %p10411_p2 = pneg %p10410_p1 }
  0x3e   : > { %9063 = vmatpush3.bf16.msra.mxu0 %v10675_v41  ;;  %9095 = vmatpush3.bf16.msra.mxu1 %v10675_v41 }
  0x3f   : > { %9065 = vmatprep.subr.bf16.mxu0 %v10687_v44  ;;  %9097 = vmatprep.subr.bf16.mxu1 %v10687_v44 }
  0x42   : > { %9067 = vmatpush3.bf16.msra.mxu0 %v10687_v44  ;;  %9099 = vmatpush3.bf16.msra.mxu1 %v10687_v44 }
  0x43   : > { %9069 = vmatprep.subr.bf16.mxu0 %v10699_v47  ;;  %9101 = vmatprep.subr.bf16.mxu1 %v10699_v47 }
  0x46   : > { %9071 = vmatpush3.bf16.msra.mxu0 %v10699_v47  ;;  %9103 = vmatpush3.bf16.msra.mxu1 %v10699_v47 }
  0x47   : > { %9073 = vmatprep.subr.bf16.mxu0 %v10711_v50  ;;  %9105 = vmatprep.subr.bf16.mxu1 %v10711_v50 }
  0x4a   : > { %9075 = vmatpush3.bf16.msra.mxu0 %v10711_v50  ;;  %9107 = vmatpush3.bf16.msra.mxu1 %v10711_v50 }
  0x4b   : > { %9077 = vmatprep.subr.bf16.mxu0 %v10723_v53  ;;  %9109 = vmatprep.subr.bf16.mxu1 %v10723_v53 }
  0x4e   : > { %9079 = vmatpush3.bf16.msra.mxu0 %v10723_v53  ;;  %9111 = vmatpush3.bf16.msra.mxu1 %v10723_v53 }
  0x4f   : > { %9081 = vmatprep.subr.bf16.mxu0 %v10735_v56  ;;  %9113 = vmatprep.subr.bf16.mxu1 %v10735_v56 }
  0x52   : > { %9083 = vmatpush3.bf16.msra.mxu0 %v10735_v56  ;;  %9115 = vmatpush3.bf16.msra.mxu1 %v10735_v56 }
  0x53   : > { %9117 = vmatprep.subr.bf16.mxu0 %v10657_v35  ;;  %9149 = vmatprep.subr.bf16.mxu1 %v10657_v35 }
  0x55   : > { %7869 = vmatmul.mubr.f32.vlgmr.msra.gmra.mrb[0].mxu0 %v10472_v37 }
  0x56   : > { %7871 = vmatprep.mubr.f32.mxu0 %v10472_v37  ;;  %9119 = vmatpush3.bf16.msra.mxu0 %v10657_v35 }
  0x57   : > { %9121 = vmatprep.subr.bf16.mxu0 %v10662_v38 }
  0x59   : > { %7872 = vmatmul.mubr.f32.gmra.mrb[2].mxu0 %v10472_v37 }
  0x5a   : > { %9123 = vmatpush3.bf16.msra.mxu0 %v10662_v38 }
  0x5b   : > { %9125 = vmatprep.subr.bf16.mxu0 %v10675_v41 }
  0x5e   : > { %9127 = vmatpush3.bf16.msra.mxu0 %v10675_v41 }
  0x5f   : > { %9129 = vmatprep.subr.bf16.mxu0 %v10687_v44 }
  0x62   : > { %9131 = vmatpush3.bf16.msra.mxu0 %v10687_v44 }
  0x63   : > { %9133 = vmatprep.subr.bf16.mxu0 %v10699_v47 }
  0x66   : > { %9135 = vmatpush3.bf16.msra.mxu0 %v10699_v47 }
  0x67   : > { %9137 = vmatprep.subr.bf16.mxu0 %v10711_v50 }
  0x6a   : > { %9139 = vmatpush3.bf16.msra.mxu0 %v10711_v50 }
  0x6b   : > { %9141 = vmatprep.subr.bf16.mxu0 %v10723_v53 }
  0x6e   : > { %9143 = vmatpush3.bf16.msra.mxu0 %v10723_v53 }
  0x6f   : > { %9145 = vmatprep.subr.bf16.mxu0 %v10735_v56 }
  0x72   : > { %9147 = vmatpush3.bf16.msra.mxu0 %v10735_v56 }
  0x73   : > { %9181 = vmatprep.subr.bf16.mxu0 %v10657_v35 }
 0x128   : > { %v7870_v59 = vpop.f32.mrb[0].mxu0 }
 0x129   : > { %v593_v60 = vadd.f32 %v7870_v59, %v488_v57  ;;  %v573_v61 = vpop.f32.mrb[1].mxu0 }
 0x12a   : > { %v592_v62 = vadd.f32 %v573_v61, %v487_v58 }
 0x12c   : > { %10152 = vtanh.f32 %v592_v62  ;;  %v7873_v1 = vpop.f32.mrb[2].mxu0 }
 0x12d   : > { %10154 = vtanh.f32 %v593_v60  ;;  %v595_v2 = vadd.f32 %v7873_v1, %v490_v63  ;;  %v583_v3 = vpop.f32.mrb[3].mxu0  ;;  %v6974_v1 = vld [vmem:[%s10768_s19 + $0x88] sm:$0xff] }
 0x12e   : > { %v594_v4 = vadd.f32 %v583_v3, %v489_v0 }
 0x12f   : > { %10156 = vtanh.f32 %v595_v2  ;;  %v6973_v2 = vld [vmem:[%s10768_s19 + $0x80] sm:$0xff] }
 0x130   : > { %10158 = vtanh.f32 %v594_v4 }
 0x136   : > { %v10153_v5 = vpop.eup %10152 }
 0x137   : > { %v10155_v6 = vpop.eup %10154  ;;  %7906 = vmatprep.mubr.f32.mxu1 %v10153_v5 }
 0x138   : > { %7907 = vmatmul.mubr.f32.vlgmr.msra.gmra.mrb[0].mxu1 %v10155_v6 }
 0x139   : > { %v10157_v7 = vpop.eup %10156  ;;  %9151 = vmatpush3.bf16.msra.mxu1 %v10657_v35 }
 0x13a   : > { %v10159_v8 = vpop.eup %10158  ;;  %9153 = vmatprep.subr.bf16.mxu1 %v10662_v38 }
 0x13b   : > { %7909 = vmatprep.mubr.f32.mxu1 %v10159_v8  ;;  %v6975_v8 = vld [vmem:[%s10768_s19 + $0x90] sm:$0xff] }
 0x13c   : > { %7910 = vmatmul.mubr.f32.gmra.mrb[2].mxu1 %v10157_v7  ;;  %v6976_v7 = vld [vmem:[%s10768_s19 + $0x98] sm:$0xff] }
 0x13d   : > { %9155 = vmatpush3.bf16.msra.mxu1 %v10662_v38 }
 0x13e   : > { %9157 = vmatprep.subr.bf16.mxu1 %v10675_v41 }
 0x141   : > { %9159 = vmatpush3.bf16.msra.mxu1 %v10675_v41 }
 0x142   : > { %9161 = vmatprep.subr.bf16.mxu1 %v10687_v44 }
 0x145   : > { %9163 = vmatpush3.bf16.msra.mxu1 %v10687_v44 }
 0x146   : > { %9165 = vmatprep.subr.bf16.mxu1 %v10699_v47 }
 0x149   : > { %9167 = vmatpush3.bf16.msra.mxu1 %v10699_v47 }
 0x14a   : > { %9169 = vmatprep.subr.bf16.mxu1 %v10711_v50 }
 0x14d   : > { %9171 = vmatpush3.bf16.msra.mxu1 %v10711_v50 }
 0x14e   : > { %9173 = vmatprep.subr.bf16.mxu1 %v10723_v53 }
 0x151   : > { %9175 = vmatpush3.bf16.msra.mxu1 %v10723_v53 }
 0x152   : > { %9177 = vmatprep.subr.bf16.mxu1 %v10735_v56 }
 0x155   : > { %9179 = vmatpush3.bf16.msra.mxu1 %v10735_v56 }
 0x156   : > { %9213 = vmatprep.subr.bf16.mxu1 %v10657_v35 }
 0x20b   : > { %v7908_v11 = vpop.f32.mrb[0].mxu1 }
 0x20c   : > { %v691_v12 = vadd.f32 %v7908_v11, %v6962_v9  ;;  %v671_v13 = vpop.f32.mrb[1].mxu1 }
 0x20d   : > { %v690_v14 = vadd.f32 %v6961_v10, %v671_v13 }
 0x20f   : > { %10160 = vtanh.f32 %v690_v14  ;;  %v7911_v17 = vpop.f32.mrb[2].mxu1 }
 0x210   : > { %10162 = vtanh.f32 %v691_v12  ;;  %v693_v18 = vadd.f32 %v7911_v17, %v6964_v15  ;;  %v681_v19 = vpop.f32.mrb[3].mxu1 }
 0x211   : > { %v692_v20 = vadd.f32 %v6963_v16, %v681_v19  ;;  %v6980_v19 = vld [vmem:[%s10768_s19 + $0xb8] sm:$0xff] }
 0x212   : > { %10164 = vtanh.f32 %v693_v18 }
 0x213   : > { %10166 = vtanh.f32 %v692_v20 }
 0x219   : > { %v10161_v21 = vpop.eup %10160 }
 0x21a   : > { %v10163_v22 = vpop.eup %10162  ;;  %7944 = vmatprep.mubr.f32.mxu0 %v10161_v21 }
 0x21b   : > { %7945 = vmatmul.mubr.f32.vlgmr.msra.gmra.mrb[4].mxu0 %v10163_v22 }
 0x21c   : > { %v10165_v23 = vpop.eup %10164  ;;  %9183 = vmatpush3.bf16.msra.mxu0 %v10657_v35 }
 0x21d   : > { %v10167_v24 = vpop.eup %10166  ;;  %9185 = vmatprep.subr.bf16.mxu0 %v10662_v38 }
 0x21e   : > { %7947 = vmatprep.mubr.f32.mxu0 %v10167_v24 }
 0x21f   : > { %7948 = vmatmul.mubr.f32.gmra.mrb[6].mxu0 %v10165_v23 }
 0x220   : > { %9187 = vmatpush3.bf16.msra.mxu0 %v10662_v38 }
 0x221   : > { %9189 = vmatprep.subr.bf16.mxu0 %v10675_v41 }
 0x224   : > { %9191 = vmatpush3.bf16.msra.mxu0 %v10675_v41 }
 0x225   : > { %9193 = vmatprep.subr.bf16.mxu0 %v10687_v44 }
 0x228   : > { %9195 = vmatpush3.bf16.msra.mxu0 %v10687_v44 }
 0x229   : > { %9197 = vmatprep.subr.bf16.mxu0 %v10699_v47 }
 0x22c   : > { %9199 = vmatpush3.bf16.msra.mxu0 %v10699_v47 }
 0x22d   : > { %9201 = vmatprep.subr.bf16.mxu0 %v10711_v50 }
 0x230   : > { %9203 = vmatpush3.bf16.msra.mxu0 %v10711_v50 }
 0x231   : > { %9205 = vmatprep.subr.bf16.mxu0 %v10723_v53 }
 0x234   : > { %9207 = vmatpush3.bf16.msra.mxu0 %v10723_v53 }
 0x235   : > { %9209 = vmatprep.subr.bf16.mxu0 %v10735_v56 }
 0x238   : > { %9211 = vmatpush3.bf16.msra.mxu0 %v10735_v56 }
 0x239   : > { %9245 = vmatprep.subr.bf16.mxu0 %v10657_v35 }
 0x2ee   : > { %v7946_v27 = vpop.f32.mrb[4].mxu0 }
 0x2ef   : > { %v789_v28 = vadd.f32 %v7946_v27, %v6966_v25  ;;  %v769_v29 = vpop.f32.mrb[5].mxu0  ;;  %v1306_v25 = vld [vmem:[%s12935_s4] sm:$0xff]  ;;  %v1308_v27 = vld [vmem:[%s12935_s4 + $0x10] sm:$0xff] }
 0x2f0   : > { %v788_v30 = vadd.f32 %v6965_v26, %v769_v29  ;;  %v1307_v26 = vld [vmem:[%s12935_s4 + $0x8] sm:$0xff]  ;;  %v1309_v29 = vld [vmem:[%s12935_s4 + $0x18] sm:$0xff] }
 0x2f2   : > { %10168 = vtanh.f32 %v788_v30  ;;  %v7949_v33 = vpop.f32.mrb[6].mxu0  ;;  %v10886_v30 = vpack.c.bf16 %v1309_v29, %v1308_v27 }
 0x2f3   : > { %10170 = vtanh.f32 %v789_v28  ;;  %v791_v34 = vadd.f32 %v7949_v33, %v6968_v31  ;;  %v779_v36 = vpop.f32.mrb[7].mxu0  ;;  %v10881_v28 = vpack.c.bf16 %v1307_v26, %v1306_v25  ;;  %v1310_v31 = vld [vmem:[%s12935_s4 + $0x20] sm:$0xff]  ;;  %v6988_v25 = vld [vmem:[%s10768_s19 + $0xf8] sm:$0xff]  ;;  %v6987_v26 = vld [vmem:[%s10768_s19 + $0xf0] sm:$0xff] }
 0x2f4   : > { %v790_v37 = vadd.f32 %v6967_v32, %v779_v36  ;;  %v1311_v32 = vld [vmem:[%s12935_s4 + $0x28] sm:$0xff]  ;;  %v1313_v36 = vld [vmem:[%s12935_s4 + $0x38] sm:$0xff] }
 0x2f5   : > { %10172 = vtanh.f32 %v791_v34  ;;  %v10897_v33 = vpack.c.bf16 %v1311_v32, %v1310_v31  ;;  %v1312_v34 = vld [vmem:[%s12935_s4 + $0x30] sm:$0xff] }
 0x2f6   : > { %10174 = vtanh.f32 %v790_v37  ;;  %v10907_v37 = vpack.c.bf16 %v1313_v36, %v1312_v34  ;;  %v1292_v34 = vld [vmem:[%s12934_s3 + $0x10] sm:$0xff]  ;;  %v1293_v36 = vld [vmem:[%s12934_s3 + $0x18] sm:$0xff] }
 0x2fc   : > { %v10169_v39 = vpop.eup %10168 }
 0x2fd   : > { %v10171_v40 = vpop.eup %10170  ;;  %7982 = vmatprep.mubr.f32.mxu1 %v10169_v39  ;;  %v1314_v39 = vld [vmem:[%s12935_s4 + $0x40] sm:$0xff] }
 0x2fe   : > { %7983 = vmatmul.mubr.f32.vlgmr.msra.gmra.mrb[4].mxu1 %v10171_v40  ;;  %v1315_v40 = vld [vmem:[%s12935_s4 + $0x48] sm:$0xff] }
 0x2ff   : > { %v10173_v42 = vpop.eup %10172  ;;  %9215 = vmatpush3.bf16.msra.mxu1 %v10657_v35 }
 0x300   : > { %v10175_v43 = vpop.eup %10174  ;;  %9217 = vmatprep.subr.bf16.mxu1 %v10662_v38 }
 0x301   : > { %7985 = vmatprep.mubr.f32.mxu1 %v10175_v43  ;;  %v6982_v43 = vld [vmem:[%s10768_s19 + $0xc8] sm:$0xff] }
 0x302   : > { %7986 = vmatmul.mubr.f32.gmra.mrb[6].mxu1 %v10173_v42  ;;  %v10917_v42 = vpack.c.bf16 %v1315_v40, %v1314_v39  ;;  %v11026_v40 = vpack.c.bf16 %v1293_v36, %v1292_v34  ;;  %v11192_v36 = vld [vmem:[%s12938_s7] ss:$0 sm:$0xff] }
 0x303   : > { %9219 = vmatpush3.bf16.msra.mxu1 %v10662_v38 }
 0x304   : > { %9221 = vmatprep.subr.bf16.mxu1 %v10675_v41 }
 0x307   : > { %9223 = vmatpush3.bf16.msra.mxu1 %v10675_v41 }
 0x308   : > { %9225 = vmatprep.subr.bf16.mxu1 %v10687_v44 }
 0x30b   : > { %9227 = vmatpush3.bf16.msra.mxu1 %v10687_v44 }
 0x30c   : > { %9229 = vmatprep.subr.bf16.mxu1 %v10699_v47 }
 0x30f   : > { %9231 = vmatpush3.bf16.msra.mxu1 %v10699_v47 }
 0x310   : > { %9233 = vmatprep.subr.bf16.mxu1 %v10711_v50 }
 0x313   : > { %9235 = vmatpush3.bf16.msra.mxu1 %v10711_v50 }
 0x314   : > { %9237 = vmatprep.subr.bf16.mxu1 %v10723_v53 }
 0x317   : > { %9239 = vmatpush3.bf16.msra.mxu1 %v10723_v53 }
 0x318   : > { %9241 = vmatprep.subr.bf16.mxu1 %v10735_v56 }
 0x31b   : > { %9243 = vmatpush3.bf16.msra.mxu1 %v10735_v56 }
 0x31c   : > { %9277 = vmatprep.subr.bf16.mxu1 %v10657_v35 }
 0x3d1   : > { %v7984_v48 = vpop.f32.mrb[4].mxu1 }
 0x3d2   : > { %v887_v49 = vadd.f32 %v7984_v48, %v6970_v45  ;;  %v867_v51 = vpop.f32.mrb[5].mxu1  ;;  %v6981_v45 = vld [vmem:[%s10768_s19 + $0xc0] sm:$0xff] }
 0x3d3   : > { %v886_v52 = vadd.f32 %v6969_v46, %v867_v51 }
 0x3d5   : > { %10176 = vtanh.f32 %v886_v52  ;;  %v7987_v57 = vpop.f32.mrb[6].mxu1  ;;  %v6984_v52 = vld [vmem:[%s10768_s19 + $0xd8] sm:$0xff] }
 0x3d6   : > { %10178 = vtanh.f32 %v887_v49  ;;  %v889_v58 = vadd.f32 %v7987_v57, %v6972_v54  ;;  %v877_v59 = vpop.f32.mrb[7].mxu1  ;;  %v6983_v54 = vld [vmem:[%s10768_s19 + $0xd0] sm:$0xff] }
 0x3d7   : > { %v888_v60 = vadd.f32 %v6971_v55, %v877_v59 }
 0x3d8   : > { %10180 = vtanh.f32 %v889_v58 }
 0x3d9   : > { %10182 = vtanh.f32 %v888_v60 }
 0x3df   : > { %v10177_v61 = vpop.eup %10176 }
 0x3e0   : > { %v10179_v62 = vpop.eup %10178  ;;  %8020 = vmatprep.mubr.f32.mxu0 %v10177_v61 }
 0x3e1   : > { %8021 = vmatmul.mubr.f32.vlgmr.msra.gmra.mrb[8].mxu0 %v10179_v62 }
 0x3e2   : > { %v10181_v63 = vpop.eup %10180  ;;  %9247 = vmatpush3.bf16.msra.mxu0 %v10657_v35 }
 0x3e3   : > { %v10183_v0 = vpop.eup %10182  ;;  %9249 = vmatprep.subr.bf16.mxu0 %v10662_v38 }
 0x3e4   : > { %8023 = vmatprep.mubr.f32.mxu0 %v10183_v0  ;;  %v1316_v0 = vld [vmem:[%s12935_s4 + $0x50] sm:$0xff] }
 0x3e5   : > { %8024 = vmatmul.mubr.f32.gmra.mrb[10].mxu0 %v10181_v63 }
 0x3e6   : > { %9251 = vmatpush3.bf16.msra.mxu0 %v10662_v38 }
 0x3e7   : > { %9253 = vmatprep.subr.bf16.mxu0 %v10675_v41 }
 0x3ea   : > { %9255 = vmatpush3.bf16.msra.mxu0 %v10675_v41 }
 0x3eb   : > { %9257 = vmatprep.subr.bf16.mxu0 %v10687_v44 }
 0x3ee   : > { %9259 = vmatpush3.bf16.msra.mxu0 %v10687_v44 }
 0x3ef   : > { %9261 = vmatprep.subr.bf16.mxu0 %v10699_v47 }
 0x3f2   : > { %9263 = vmatpush3.bf16.msra.mxu0 %v10699_v47 }
 0x3f3   : > { %9265 = vmatprep.subr.bf16.mxu0 %v10711_v50 }
 0x3f6   : > { %9267 = vmatpush3.bf16.msra.mxu0 %v10711_v50 }
 0x3f7   : > { %9269 = vmatprep.subr.bf16.mxu0 %v10723_v53 }
 0x3fa   : > { %9271 = vmatpush3.bf16.msra.mxu0 %v10723_v53 }
 0x3fb   : > { %9273 = vmatprep.subr.bf16.mxu0 %v10735_v56 }
 0x3fe   : > { %9275 = vmatpush3.bf16.msra.mxu0 %v10735_v56 }
 0x3ff   : > { %9309 = vmatprep.subr.bf16.mxu0 %v10881_v28 }
 0x4b4   : > { %v8022_v3 = vpop.f32.mrb[8].mxu0 }
 0x4b5   : > { %v985_v4 = vadd.f32 %v8022_v3, %v6974_v1  ;;  %v965_v5 = vpop.f32.mrb[9].mxu0  ;;  %v1317_v1 = vld [vmem:[%s12935_s4 + $0x58] sm:$0xff]  ;;  %v1318_v3 = vld [vmem:[%s12935_s4 + $0x60] sm:$0xff] }
 0x4b6   : > { %v984_v6 = vadd.f32 %v6973_v2, %v965_v5  ;;  %v10932_v2 = vpack.c.bf16 %v1317_v1, %v1316_v0  ;;  %v1302_v0 = vld [vmem:[%s12934_s3 + $0x60] sm:$0xff]  ;;  %v1303_v1 = vld [vmem:[%s12934_s3 + $0x68] sm:$0xff] }
 0x4b8   : > { %10184 = vtanh.f32 %v984_v6  ;;  %v8025_v9 = vpop.f32.mrb[10].mxu0  ;;  %v1320_v6 = vld [vmem:[%s12935_s4 + $0x70] sm:$0xff] }
 0x4b9   : > { %10186 = vtanh.f32 %v985_v4  ;;  %v987_v10 = vadd.f32 %v8025_v9, %v6976_v7  ;;  %v975_v11 = vpop.f32.mrb[11].mxu0  ;;  %v1319_v4 = vld [vmem:[%s12935_s4 + $0x68] sm:$0xff]  ;;  %v1321_v7 = vld [vmem:[%s12935_s4 + $0x78] sm:$0xff]  ;;  %v1290_v9 = vld [vmem:[%s12934_s3] sm:$0xff] }
 0x4ba   : > { %v986_v12 = vadd.f32 %v6975_v8, %v975_v11  ;;  %v10942_v5 = vpack.c.bf16 %v1319_v4, %v1318_v3  ;;  %v10952_v8 = vpack.c.bf16 %v1321_v7, %v1320_v6  ;;  %v11082_v3 = vpack.c.bf16 %v1303_v1, %v1302_v0  ;;  %v1304_v4 = vld [vmem:[%s12934_s3 + $0x70] sm:$0xff]  ;;  %v1305_v6 = vld [vmem:[%s12934_s3 + $0x78] sm:$0xff] }
 0x4bb   : > { %10188 = vtanh.f32 %v987_v10  ;;  %v1291_v10 = vld [vmem:[%s12934_s3 + $0x8] sm:$0xff]  ;;  %v11092_v7 = vpack.c.bf16 %v1305_v6, %v1304_v4 }
 0x4bc   : > { %10190 = vtanh.f32 %v986_v12  ;;  %v10962_v11 = vpack.c.bf16 %v1291_v10, %v1290_v9  ;;  %v1507_v12 = vld [vmem:[%s12937_s6] sm:$0xff]  ;;  %v1287_v9 = vld [vmem:[%s11037_s12 + $0x8] sm:$0xff]  ;;  %v1288_v10 = vld [vmem:[%s11037_s12 + $0x10] sm:$0xff] }
 0x4c2   : > { %v10185_v13 = vpop.eup %10184 }
 0x4c3   : > { %v10187_v14 = vpop.eup %10186  ;;  %8058 = vmatprep.mubr.f32.mxu1 %v10185_v13  ;;  %v1508_v13 = vld [vmem:[%s12937_s6 + $0x8] sm:$0xff] }
 0x4c4   : > { %8059 = vmatmul.mubr.f32.vlgmr.msra.gmra.mrb[8].mxu1 %v10187_v14  ;;  %v1509_v14 = vld [vmem:[%s12937_s6 + $0x10] sm:$0xff] }
 0x4c5   : > { %v10189_v15 = vpop.eup %10188  ;;  %9279 = vmatpush3.bf16.msra.mxu1 %v10657_v35  ;;  %v6978_v35 = vld [vmem:[%s10768_s19 + $0xa8] sm:$0xff] }
 0x4c6   : > { %v10191_v16 = vpop.eup %10190  ;;  %9281 = vmatprep.subr.bf16.mxu1 %v10662_v38 }
 0x4c7   : > { %8061 = vmatprep.mubr.f32.mxu1 %v10191_v16  ;;  %v1510_v16 = vld [vmem:[%s12937_s6 + $0x18] sm:$0xff] }
 0x4c8   : > { %8062 = vmatmul.mubr.f32.gmra.mrb[10].mxu1 %v10189_v15  ;;  %v10974_v15 = vpack.c.bf16 %v1508_v13, %v1507_v12  ;;  %v1289_v12 = vld [vmem:[%s11037_s12 + $0x18] sm:$0xff]  ;;  %v1517_v13 = vld [vmem:[%s12937_s6 + $0x50] sm:$0xff] }
 0x4c9   : > { %9283 = vmatpush3.bf16.msra.mxu1 %v10662_v38  ;;  %v6977_v38 = vld [vmem:[%s10768_s19 + $0xa0] sm:$0xff] }
 0x4ca   : > { %9285 = vmatprep.subr.bf16.mxu1 %v10675_v41 }
 0x4cd   : > { %9287 = vmatpush3.bf16.msra.mxu1 %v10675_v41 }
 0x4ce   : > { %9289 = vmatprep.subr.bf16.mxu1 %v10687_v44 }
 0x4d1   : > { %9291 = vmatpush3.bf16.msra.mxu1 %v10687_v44 }
 0x4d2   : > { %9293 = vmatprep.subr.bf16.mxu1 %v10699_v47 }
 0x4d5   : > { %9295 = vmatpush3.bf16.msra.mxu1 %v10699_v47  ;;  %v6979_v47 = vld [vmem:[%s10768_s19 + $0xb0] sm:$0xff] }
 0x4d6   : > { %9297 = vmatprep.subr.bf16.mxu1 %v10711_v50 }
 0x4d9   : > { %9299 = vmatpush3.bf16.msra.mxu1 %v10711_v50 }
 0x4da   : > { %9301 = vmatprep.subr.bf16.mxu1 %v10723_v53 }
 0x4dd   : > { %9303 = vmatpush3.bf16.msra.mxu1 %v10723_v53 }
 0x4de   : > { %9305 = vmatprep.subr.bf16.mxu1 %v10735_v56 }
 0x4e1   : > { %9307 = vmatpush3.bf16.msra.mxu1 %v10735_v56 }
 0x4e2   : > { %9373 = vmatprep.subr.bf16.mxu1 %v10974_v15 }
 0x597   : > { %v8060_v41 = vpop.f32.mrb[8].mxu1 }
 0x598   : > { %v1083_v44 = vadd.f32 %v8060_v41, %v6978_v35  ;;  %v1063_v17 = vpop.f32.mrb[9].mxu1  ;;  %v10979_v35 = vpack.c.bf16 %v1510_v16, %v1509_v14  ;;  %v1512_v41 = vld [vmem:[%s12937_s6 + $0x28] sm:$0xff]  ;;  %v1518_v14 = vld [vmem:[%s12937_s6 + $0x58] sm:$0xff] }
 0x599   : > { %v1082_v18 = vadd.f32 %v6977_v38, %v1063_v17  ;;  %v1511_v38 = vld [vmem:[%s12937_s6 + $0x20] sm:$0xff]  ;;  %v1513_v17 = vld [vmem:[%s12937_s6 + $0x30] sm:$0xff]  ;;  %v11116_v16 = vpack.c.bf16 %v1518_v14, %v1517_v13 }
 0x59b   : > { %10192 = vtanh.f32 %v1082_v18  ;;  %v8063_v20 = vpop.f32.mrb[10].mxu1  ;;  %v1514_v18 = vld [vmem:[%s12937_s6 + $0x38] sm:$0xff] }
 0x59c   : > { %10194 = vtanh.f32 %v1083_v44  ;;  %v1085_v50 = vadd.f32 %v8063_v20, %v6980_v19  ;;  %v1073_v21 = vpop.f32.mrb[11].mxu1  ;;  %v10990_v44 = vpack.c.bf16 %v1512_v41, %v1511_v38  ;;  %v11000_v19 = vpack.c.bf16 %v1514_v18, %v1513_v17  ;;  %v1516_v20 = vld [vmem:[%s12937_s6 + $0x48] sm:$0xff]  ;;  %v1519_v38 = vld [vmem:[%s12937_s6 + $0x60] sm:$0xff]  ;;  %v1521_v18 = vld [vmem:[%s12937_s6 + $0x70] sm:$0xff] }
 0x59d   : > { %v1084_v22 = vadd.f32 %v6979_v47, %v1073_v21  ;;  %v1515_v47 = vld [vmem:[%s12937_s6 + $0x40] sm:$0xff]  ;;  %v6986_v21 = vld [vmem:[%s10768_s19 + $0xe8] sm:$0xff] }
 0x59e   : > { %10196 = vtanh.f32 %v1085_v50  ;;  %v11010_v50 = vpack.c.bf16 %v1516_v20, %v1515_v47  ;;  %v1520_v41 = vld [vmem:[%s12937_s6 + $0x68] sm:$0xff]  ;;  %v1522_v47 = vld [vmem:[%s12937_s6 + $0x78] sm:$0xff] }
 0x59f   : > { %10198 = vtanh.f32 %v1084_v22  ;;  %v6985_v22 = vld [vmem:[%s10768_s19 + $0xe0] sm:$0xff]  ;;  %v11128_v17 = vpack.c.bf16 %v1520_v41, %v1519_v38  ;;  %v11140_v20 = vpack.c.bf16 %v1522_v47, %v1521_v18  ;;  %s10414_s19 = scalar_lea.vmem %s10413_s20, 8192 }
 0x5a0   : > { %p10416_p4 = scmp.lt.s32.totalorder %s10414_s19, %s10408_s26 }
 0x5a2   : > { %p10417_p5 = por %p10416_p4, %p10415_p3 }
 0x5a4   : > { %p10418_p7 = pnand %p10417_p5, %p10411_p2 }
 0x5a5   : > { %v10193_v53 = vpop.eup %10192 }
 0x5a6   : > { %v10195_v23 = vpop.eup %10194  ;;  %8096 = vmatprep.mubr.f32.mxu0 %v10193_v53 }
 0x5a7   : > { %8097 = vmatmul.mubr.f32.vlgmr.msra.gmra.mrb[12].mxu0 %v10195_v23 }
 0x5a8   : > { %v10197_v56 = vpop.eup %10196  ;;  %9311 = vmatpush3.bf16.msra.mxu0 %v10881_v28 }
 0x5a9   : > { %v10199_v24 = vpop.eup %10198  ;;  %9313 = vmatprep.subr.bf16.mxu0 %v10886_v30 }
 0x5aa   : > { %8099 = vmatprep.mubr.f32.mxu0 %v10199_v24 }
 0x5ab   : > { %8100 = vmatmul.mubr.f32.gmra.mrb[14].mxu0 %v10197_v56 }
 0x5ac   : > { %9315 = vmatpush3.bf16.msra.mxu0 %v10886_v30 }
 0x5ad   : > { %9317 = vmatprep.subr.bf16.mxu0 %v10897_v33 }
 0x5b0   : > { %9319 = vmatpush3.bf16.msra.mxu0 %v10897_v33 }
 0x5b1   : > { %9321 = vmatprep.subr.bf16.mxu0 %v10907_v37 }
 0x5b4   : > { %9323 = vmatpush3.bf16.msra.mxu0 %v10907_v37 }
 0x5b5   : > { %9325 = vmatprep.subr.bf16.mxu0 %v10917_v42 }
 0x5b8   : > { %9327 = vmatpush3.bf16.msra.mxu0 %v10917_v42 }
 0x5b9   : > { %9329 = vmatprep.subr.bf16.mxu0 %v10932_v2 }
 0x5bc   : > { %9331 = vmatpush3.bf16.msra.mxu0 %v10932_v2 }
 0x5bd   : > { %9333 = vmatprep.subr.bf16.mxu0 %v10942_v5 }
 0x5c0   : > { %9335 = vmatpush3.bf16.msra.mxu0 %v10942_v5 }
 0x5c1   : > { %9337 = vmatprep.subr.bf16.mxu0 %v10952_v8 }
 0x5c4   : > { %9339 = vmatpush3.bf16.msra.mxu0 %v10952_v8 }
 0x5c5   : > { %9341 = vmatprep.subr.bf16.mxu0 %v10962_v11 }
 0x67a   : > { %v8098_v46 = vpop.f32.mrb[12].mxu0 }
 0x67b   : > { %v1181_v48 = vadd.f32 %v8098_v46, %v6982_v43  ;;  %v1161_v49 = vpop.f32.mrb[13].mxu0  ;;  %v1295_v46 = vld [vmem:[%s12934_s3 + $0x28] sm:$0xff] }
 0x67c   : > { %v1180_v51 = vadd.f32 %v6981_v45, %v1161_v49  ;;  %v1294_v45 = vld [vmem:[%s12934_s3 + $0x20] sm:$0xff] }
 0x67e   : > { %10200 = vtanh.f32 %v1180_v51  ;;  %v8101_v55 = vpop.f32.mrb[14].mxu0  ;;  %v11041_v51 = vpack.c.bf16 %v1295_v46, %v1294_v45 }
 0x67f   : > { %10202 = vtanh.f32 %v1181_v48  ;;  %v1183_v57 = vadd.f32 %v8101_v55, %v6984_v52  ;;  %v1171_v58 = vpop.f32.mrb[15].mxu0  ;;  %v1286_v52 = vld [vmem:[%s11037_s12] sm:$0xff]  ;;  %v1297_v55 = vld [vmem:[%s12934_s3 + $0x38] sm:$0xff]  ;;  %s12889_s12 = scalar_lea.sflag [#allocation4], %s441_s17 }
 0x680   : > { %v1182_v59 = vadd.f32 %v6983_v54, %v1171_v58  ;;  %v1296_v54 = vld [vmem:[%s12934_s3 + $0x30] sm:$0xff]  ;;  %v1298_v58 = vld [vmem:[%s12934_s3 + $0x40] sm:$0xff] }
 0x681   : > { %10204 = vtanh.f32 %v1183_v57  ;;  %v11052_v57 = vpack.c.bf16 %v1297_v55, %v1296_v54  ;;  %v12940_v55 = vlaneseq }
 0x682   : > { %10206 = vtanh.f32 %v1182_v59  ;;  %v1299_v59 = vld [vmem:[%s12934_s3 + $0x48] sm:$0xff] }
 0x688   : > { %v10201_v60 = vpop.eup %10200 }
 0x689   : > { %v10203_v61 = vpop.eup %10202  ;;  %8134 = vmatprep.mubr.f32.mxu1 %v10201_v60  ;;  %v11062_v60 = vpack.c.bf16 %v1299_v59, %v1298_v58  ;;  %v11211_v58 = vand.u32 127, %v12940_v55 }
 0x68a   : > { %8135 = vmatmul.mubr.f32.vlgmr.msra.gmra.mrb[12].mxu1 %v10203_v61  ;;  %v1300_v61 = vld [vmem:[%s12934_s3 + $0x50] sm:$0xff] }
 0x68b   : > { %v10205_v62 = vpop.eup %10204  ;;  %9375 = vmatpush3.bf16.msra.mxu1 %v10974_v15 }
 0x68c   : > { %v10207_v63 = vpop.eup %10206  ;;  %9377 = vmatprep.subr.bf16.mxu1 %v10979_v35 }
 0x68d   : > { %8137 = vmatprep.mubr.f32.mxu1 %v10207_v63 }
 0x68e   : > { %8138 = vmatmul.mubr.f32.gmra.mrb[14].mxu1 %v10205_v62  ;;  %v1301_v62 = vld [vmem:[%s12934_s3 + $0x58] sm:$0xff] }
 0x68f   : > { %9379 = vmatpush3.bf16.msra.mxu1 %v10979_v35  ;;  %v11072_v63 = vpack.c.bf16 %v1301_v62, %v1300_v61 }
 0x690   : > { %9381 = vmatprep.subr.bf16.mxu1 %v10990_v44 }
 0x693   : > { %9383 = vmatpush3.bf16.msra.mxu1 %v10990_v44 }
 0x694   : > { %9385 = vmatprep.subr.bf16.mxu1 %v11000_v19 }
 0x697   : > { %9387 = vmatpush3.bf16.msra.mxu1 %v11000_v19 }
 0x698   : > { %9389 = vmatprep.subr.bf16.mxu1 %v11010_v50 }
 0x69b   : > { %9391 = vmatpush3.bf16.msra.mxu1 %v11010_v50 }
 0x69c   : > { %9393 = vmatprep.subr.bf16.mxu1 %v11116_v16 }
 0x69f   : > { %9395 = vmatpush3.bf16.msra.mxu1 %v11116_v16 }
 0x6a0   : > { %9397 = vmatprep.subr.bf16.mxu1 %v11128_v17 }
 0x6a3   : > { %9399 = vmatpush3.bf16.msra.mxu1 %v11128_v17 }
 0x6a4   : > { %9401 = vmatprep.subr.bf16.mxu1 %v11140_v20 }
 0x6a7   : > { %9403 = vmatpush3.bf16.msra.mxu1 %v11140_v20 }
 0x6a8   : > { %9405 = vmatprep.subr.bf16.mxu1 %v10881_v28 }
 0x75d   : > { %v8136_v53 = vpop.f32.mrb[12].mxu1 }
 0x75e   : > { %v1279_v23 = vadd.f32 %v8136_v53, %v6986_v21  ;;  %v1259_v56 = vpop.f32.mrb[13].mxu1  ;;  %v11151_v21 = vld [vmem:[%s12936_s5] ss:$0 sm:$0xff] }
 0x75f   : > { %v1278_v24 = vadd.f32 %v6985_v22, %v1259_v56 }
 0x761   : > { %10208 = vtanh.f32 %v1278_v24  ;;  %v8139_v27 = vpop.f32.mrb[14].mxu1 }
 0x762   : > { %10210 = vtanh.f32 %v1279_v23  ;;  %v1281_v29 = vadd.f32 %v8139_v27, %v6988_v25  ;;  %v1269_v31 = vpop.f32.mrb[15].mxu1 }
 0x763   : > { %v1280_v32 = vadd.f32 %v6987_v26, %v1269_v31 }
 0x764   : > { %10212 = vtanh.f32 %v1281_v29 }
 0x765   : > { %10214 = vtanh.f32 %v1280_v32 }
 0x76b   : > { %v10209_v39 = vpop.eup %10208 }
 0x76c   : > { %v10211_v43 = vpop.eup %10210  ;;  %8172 = vmatprep.mubr.f32.mxu0 %v10209_v39 }
 0x76d   : > { %8173 = vmatmul.mubr.f32.vlgmr.msra.gmra.mrb[16].mxu0 %v10211_v43 }
 0x76e   : > { %v10213_v48 = vpop.eup %10212  ;;  %9343 = vmatpush3.bf16.msra.mxu0 %v10962_v11 }
 0x76f   : > { %v10215_v49 = vpop.eup %10214  ;;  %9345 = vmatprep.subr.bf16.mxu0 %v11026_v40 }
 0x770   : > { %8175 = vmatprep.mubr.f32.mxu0 %v10215_v49 }
 0x771   : > { %8176 = vmatmul.mubr.f32.gmra.mrb[18].mxu0 %v10213_v48 }
 0x772   : > { %9347 = vmatpush3.bf16.msra.mxu0 %v11026_v40  ;;  %8210 = vmatprep.mubr.f32.mxu0 %v1286_v52 }
 0x773   : > { %9349 = vmatprep.subr.bf16.mxu0 %v11041_v51 }
 0x776   : > { %9351 = vmatpush3.bf16.msra.mxu0 %v11041_v51 }
 0x777   : > { %9353 = vmatprep.subr.bf16.mxu0 %v11052_v57 }
 0x77a   : > { %9355 = vmatpush3.bf16.msra.mxu0 %v11052_v57 }
 0x77b   : > { %9357 = vmatprep.subr.bf16.mxu0 %v11062_v60 }
 0x77e   : > { %9359 = vmatpush3.bf16.msra.mxu0 %v11062_v60 }
 0x77f   : > { %9361 = vmatprep.subr.bf16.mxu0 %v11072_v63 }
 0x782   : > { %9363 = vmatpush3.bf16.msra.mxu0 %v11072_v63 }
 0x783   : > { %9365 = vmatprep.subr.bf16.mxu0 %v11082_v3 }
 0x786   : > { %9367 = vmatpush3.bf16.msra.mxu0 %v11082_v3 }
 0x787   : > { %9369 = vmatprep.subr.bf16.mxu0 %v11092_v7 }
 0x78a   : > { %9371 = vmatpush3.bf16.msra.mxu0 %v11092_v7 }
 0x78b   : > { %9469 = vmatprep.subr.bf16.mxu0 %v10974_v15 }
 0x78d   : > { %8211 = vmatmul.mubr.f32.vlgmr.msra.gmra.mrb[16].mxu0 %v1287_v9 }
 0x78e   : > { %8213 = vmatprep.mubr.f32.mxu0 %v1288_v10  ;;  %9471 = vmatpush3.bf16.msra.mxu0 %v10974_v15 }
 0x78f   : > { %9473 = vmatprep.subr.bf16.mxu0 %v10979_v35 }
 0x791   : > { %8214 = vmatmul.mubr.f32.gmra.mrb[18].mxu0 %v1289_v12 }
 0x792   : > { %9475 = vmatpush3.bf16.msra.mxu0 %v10979_v35 }
 0x793   : > { %9477 = vmatprep.subr.bf16.mxu0 %v10990_v44 }
 0x796   : > { %9479 = vmatpush3.bf16.msra.mxu0 %v10990_v44 }
 0x797   : > { %9481 = vmatprep.subr.bf16.mxu0 %v11000_v19 }
 0x79a   : > { %9483 = vmatpush3.bf16.msra.mxu0 %v11000_v19 }
 0x79b   : > { %9485 = vmatprep.subr.bf16.mxu0 %v11010_v50 }
 0x79e   : > { %9487 = vmatpush3.bf16.msra.mxu0 %v11010_v50 }
 0x79f   : > { %9489 = vmatprep.subr.bf16.mxu0 %v11116_v16 }
 0x7a2   : > { %9491 = vmatpush3.bf16.msra.mxu0 %v11116_v16 }
 0x7a3   : > { %9493 = vmatprep.subr.bf16.mxu0 %v11128_v17 }
 0x7a6   : > { %9495 = vmatpush3.bf16.msra.mxu0 %v11128_v17 }
 0x7a7   : > { %9497 = vmatprep.subr.bf16.mxu0 %v11140_v20 }
 0x7aa   : > { %9499 = vmatpush3.bf16.msra.mxu0 %v11140_v20 }
 0x7ab   : > { %9501 = vmatprep.subr.bf16.mxu0 %v10881_v28 }
 0x860   : > { %v8212_v22 = vpop.f32.mrb[16].mxu0 }
 0x861   : > { %v1500_v53 = vadd.f32 %v8212_v22, %v11151_v21  ;;  %v1473_v23 = vpop.f32.mrb[17].mxu0 }
 0x862   : > { %v1499_v56 = vadd.f32 %v11151_v21, %v1473_v23 }
 0x864   : > { %10216 = vtanh.f32 %v1499_v56  ;;  %v8215_v24 = vpop.f32.mrb[18].mxu0 }
 0x865   : > { %10218 = vtanh.f32 %v1500_v53  ;;  %v1502_v25 = vadd.f32 %v8215_v24, %v11151_v21  ;;  %v1483_v26 = vpop.f32.mrb[19].mxu0 }
 0x866   : > { %v1501_v27 = vadd.f32 %v11151_v21, %v1483_v26 }
 0x868   : > { %10220 = vtanh.f32 %v1501_v27 }
 0x869   : > { %10222 = vtanh.f32 %v1502_v25 }
 0x86e   : > { %v10217_v29 = vpop.eup %10216 }
 0x86f   : > { %v10219_v31 = vpop.eup %10218  ;;  %8248 = vmatprep.mubr.f32.mxu1 %v10217_v29 }
 0x870   : > { %8249 = vmatmul.mubr.f32.vlgmr.msra.gmra.mrb[16].mxu1 %v10219_v31 }
 0x871   : > { %9407 = vmatpush3.bf16.msra.mxu1 %v10881_v28 }
 0x872   : > { %v10221_v32 = vpop.eup %10220  ;;  %9409 = vmatprep.subr.bf16.mxu1 %v10886_v30 }
 0x873   : > { %v10223_v34 = vpop.eup %10222  ;;  %8251 = vmatprep.mubr.f32.mxu1 %v10221_v32 }
 0x874   : > { %8252 = vmatmul.mubr.f32.gmra.mrb[18].mxu1 %v10223_v34 }
 0x875   : > { %9411 = vmatpush3.bf16.msra.mxu1 %v10886_v30  ;;  %8286 = vmatprep.mubr.f32.mxu1 %v10217_v29 }
 0x876   : > { %9413 = vmatprep.subr.bf16.mxu1 %v10897_v33 }
 0x879   : > { %9415 = vmatpush3.bf16.msra.mxu1 %v10897_v33 }
 0x87a   : > { %9417 = vmatprep.subr.bf16.mxu1 %v10907_v37 }
 0x87d   : > { %9419 = vmatpush3.bf16.msra.mxu1 %v10907_v37 }
 0x87e   : > { %9421 = vmatprep.subr.bf16.mxu1 %v10917_v42 }
 0x881   : > { %9423 = vmatpush3.bf16.msra.mxu1 %v10917_v42 }
 0x882   : > { %9425 = vmatprep.subr.bf16.mxu1 %v10932_v2 }
 0x885   : > { %9427 = vmatpush3.bf16.msra.mxu1 %v10932_v2 }
 0x886   : > { %9429 = vmatprep.subr.bf16.mxu1 %v10942_v5 }
 0x889   : > { %9431 = vmatpush3.bf16.msra.mxu1 %v10942_v5 }
 0x88a   : > { %9433 = vmatprep.subr.bf16.mxu1 %v10952_v8 }
 0x88d   : > { %9435 = vmatpush3.bf16.msra.mxu1 %v10952_v8 }
 0x88e   : > { %9437 = vmatprep.subr.bf16.mxu1 %v10962_v11 }
 0x890   : > { %8287 = vmatmul.mubr.f32.vlgmr.msra.gmra.mrb[20].mxu1 %v10219_v31 }
 0x891   : > { %8289 = vmatprep.mubr.f32.mxu1 %v10221_v32  ;;  %9439 = vmatpush3.bf16.msra.mxu1 %v10962_v11 }
 0x892   : > { %9441 = vmatprep.subr.bf16.mxu1 %v11026_v40 }
 0x894   : > { %8290 = vmatmul.mubr.f32.gmra.mrb[22].mxu1 %v10223_v34 }
 0x895   : > { %9443 = vmatpush3.bf16.msra.mxu1 %v11026_v40 }
 0x896   : > { %9445 = vmatprep.subr.bf16.mxu1 %v11041_v51 }
 0x899   : > { %9447 = vmatpush3.bf16.msra.mxu1 %v11041_v51 }
 0x89a   : > { %9449 = vmatprep.subr.bf16.mxu1 %v11052_v57 }
 0x89d   : > { %9451 = vmatpush3.bf16.msra.mxu1 %v11052_v57 }
 0x89e   : > { %9453 = vmatprep.subr.bf16.mxu1 %v11062_v60 }
 0x8a1   : > { %9455 = vmatpush3.bf16.msra.mxu1 %v11062_v60 }
 0x8a2   : > { %9457 = vmatprep.subr.bf16.mxu1 %v11072_v63 }
 0x8a5   : > { %9459 = vmatpush3.bf16.msra.mxu1 %v11072_v63 }
 0x8a6   : > { %9461 = vmatprep.subr.bf16.mxu1 %v11082_v3 }
 0x8a9   : > { %9463 = vmatpush3.bf16.msra.mxu1 %v11082_v3 }
 0x8aa   : > { %9465 = vmatprep.subr.bf16.mxu1 %v11092_v7 }
 0x8ad   : > { %9467 = vmatpush3.bf16.msra.mxu1 %v11092_v7 }
 0x8ae   : > { %9565 = vmatprep.subr.bf16.mxu1 %v10974_v15 }
 0x943   : > { %v8250_v39 = vpop.f32.mrb[16].mxu1 }
 0x944   : > { %v1596_v43 = vpop.f32.mrb[17].mxu1  ;;  %v11199_v49 = vadd.f32 %v8250_v39, %v11192_v36 }
 0x945   : > { %v11195_v45 = vadd.f32 %v11192_v36, %v1596_v43 }
 0x947   : > { %1615 = vmax.xlane.f32.xlu0 %v11195_v45  ;;  %v8253_v46 = vpop.f32.mrb[18].mxu1 }
 0x948   : > { %v1606_v48 = vpop.f32.mrb[19].mxu1  ;;  %v11207_v54 = vadd.f32 %v8253_v46, %v11192_v36 }
 0x949   : > { %v11202_v52 = vadd.f32 %v11192_v36, %v1606_v48 }
 0x94b   : > { %1617 = vmax.xlane.f32.xlu0 %v11199_v49  ;;  %1619 = vmax.xlane.f32.xlu1 %v11202_v52 }
 0x94f   : > { %1621 = vmax.xlane.f32.xlu1 %v11207_v54 }
 0x9d4   : > { %v11213_v59 = vpop.xlane.xlu0 %1615 }
 0x9d5   : > { %vm1625_vm0 = vcmp.eq.f32.partialorder %v11195_v45, %v11213_v59 }
 0x9d6   : > { %v1629_v61 = vsel %vm1625_vm0, %v11211_v58, 128 }
 0x9d7   : > { %v1634_v62 = vshra.s32 %v1629_v61, 16  ;;  %v1633_v22 = vand.u32 65535, %v1629_v61 }
 0x9d8   : > { %v11218_v0 = vpop.xlane.xlu0 %1617  ;;  %v11220_v1 = vpop.xlane.xlu1 %1619 }
 0x9d9   : > { %vm1626_vm1 = vcmp.eq.f32.partialorder %v11199_v49, %v11218_v0  ;;  %vm1627_vm2 = vcmp.eq.f32.partialorder %v11202_v52, %v11220_v1  ;;  %v1636_v4 = vcvt.s32.f32 %v1634_v62  ;;  %v1635_v56 = vcvt.s32.f32 %v1633_v22 }
 0x9da   : > { %v1630_v6 = vsel %vm1626_vm1, %v11211_v58, 128  ;;  %v1631_v9 = vsel %vm1627_vm2, %v11211_v58, 128 }
 0x9db   : > { %v1648_v10 = vshra.s32 %v1630_v6, 16  ;;  %v1662_v12 = vshra.s32 %v1631_v9, 16  ;;  %1637 = vmin.xlane.f32.xlu0 %v1636_v4  ;;  %v1647_v53 = vand.u32 65535, %v1630_v6  ;;  %v1661_v24 = vand.u32 65535, %v1631_v9 }
 0x9dc   : > { %v11228_v13 = vpop.xlane.xlu1 %1621 }
 0x9dd   : > { %vm1628_vm3 = vcmp.eq.f32.partialorder %v11207_v54, %v11228_v13  ;;  %v1650_v14 = vcvt.s32.f32 %v1648_v10  ;;  %v1664_v38 = vcvt.s32.f32 %v1662_v12  ;;  %v1649_v27 = vcvt.s32.f32 %v1647_v53 }
 0x9de   : > { %v1632_v41 = vsel %vm1628_vm3, %v11211_v58, 128  ;;  %v1663_v32 = vcvt.s32.f32 %v1661_v24 }
 0x9df   : > { %1651 = vmin.xlane.f32.xlu1 %v1650_v14  ;;  %v1676_v18 = vshra.s32 %v1632_v41, 16  ;;  %1665 = vmin.xlane.f32.xlu0 %v1664_v38  ;;  %v1675_v29 = vand.u32 65535, %v1632_v41 }
 0x9e1   : > { %v1678_v47 = vcvt.s32.f32 %v1676_v18  ;;  %v1677_v46 = vcvt.s32.f32 %v1675_v29 }
 0x9e3   : > { %1679 = vmin.xlane.f32.xlu1 %v1678_v47 }
 0xa68   : > { %v1638_v23 = vpop.xlane.xlu0 %1637 }
 0xa69   : > { %vm1639_vm4 = vcmp.eq.f32.partialorder %v1636_v4, %v1638_v23  ;;  %v1644_v61 = vcvt.f32.s32 %v1638_v23 }
 0xa6a   : > { %v1640_v25 = vsel %vm1639_vm4, %v1635_v56, inf }
 0xa6b   : > { %1641 = vmin.xlane.f32.xlu0 %v1640_v25  ;;  %v1645_v6 = vshll.u32 %v1644_v61, 16 }
 0xa6c   : > { %v1652_v26 = vpop.xlane.xlu1 %1651  ;;  %v1666_v31 = vpop.xlane.xlu0 %1665 }
 0xa6d   : > { %vm1653_vm5 = vcmp.eq.f32.partialorder %v1650_v14, %v1652_v26  ;;  %vm1667_vm6 = vcmp.eq.f32.partialorder %v1664_v38, %v1666_v31  ;;  %v1658_v62 = vcvt.f32.s32 %v1652_v26  ;;  %v1672_v9 = vcvt.f32.s32 %v1666_v31 }
 0xa6e   : > { %v1654_v34 = vsel %vm1653_vm5, %v1649_v27, inf  ;;  %v1668_v39 = vsel %vm1667_vm6, %v1663_v32, inf }
 0xa6f   : > { %1655 = vmin.xlane.f32.xlu1 %v1654_v34  ;;  %1669 = vmin.xlane.f32.xlu0 %v1668_v39  ;;  %v1659_v18 = vshll.u32 %v1658_v62, 16  ;;  %v1673_v53 = vshll.u32 %v1672_v9, 16 }
 0xa70   : > { %v1680_v43 = vpop.xlane.xlu1 %1679 }
 0xa71   : > { %vm1681_vm7 = vcmp.eq.f32.partialorder %v1678_v47, %v1680_v43  ;;  %v1686_v14 = vcvt.f32.s32 %v1680_v43  ;;  %v12941_v47 = vmov 1.0  }
 0xa72   : > { %v1682_v48 = vsel %vm1681_vm7, %v1677_v46, inf }
 0xa73   : > { %1683 = vmin.xlane.f32.xlu1 %v1682_v48  ;;  %v1687_v26 = vshll.u32 %v1686_v14, 16 }
 0xaf8   : > { %v1642_v4 = vpop.xlane.xlu0 %1641 }
 0xaf9   : > { %v1643_v10 = vcvt.f32.s32 %v1642_v4 }
 0xafb   : > { %v1646_v12 = vadd.s32 %v1645_v6, %v1643_v10 }
 0xafc   : > { %v1656_v41 = vpop.xlane.xlu1 %1655  ;;  %v1670_v38 = vpop.xlane.xlu0 %1669 }
 0xafd   : > { %v1657_v22 = vcvt.f32.s32 %v1656_v41  ;;  %v1671_v56 = vcvt.f32.s32 %v1670_v38  ;;  %vm1689_vm8 = vcmp.eq.s32.totalorder %v11211_v58, %v1646_v12 }
 0xafe   : > { %8324 = vmatprep.mubr.msk.f32.mxu1 %vm1689_vm8, %v12941_v47 }
 0xaff   : > { %v1660_v24 = vadd.s32 %v1659_v18, %v1657_v22  ;;  %v1674_v23 = vadd.s32 %v1673_v53, %v1671_v56 }
 0xb00   : > { %v1684_v25 = vpop.xlane.xlu1 %1683 }
 0xb01   : > { %vm1690_vm9 = vcmp.eq.s32.totalorder %v11211_v58, %v1660_v24  ;;  %v1685_v27 = vcvt.f32.s32 %v1684_v25  ;;  %vm1691_vm10 = vcmp.eq.s32.totalorder %v11211_v58, %v1674_v23 }
 0xb02   : > { %8325 = vmatmul.mubr.msk.f32.vlgmr.msra.gmra.mrb[20].mxu1 %vm1690_vm9, %v12941_v47 }
 0xb03   : > { %v1688_v29 = vadd.s32 %v1687_v26, %v1685_v27  ;;  %8327 = vmatprep.mubr.msk.f32.mxu1 %vm1691_vm10, %v12941_v47  ;;  %9567 = vmatpush3.bf16.msra.mxu1 %v10974_v15 }
 0xb04   : > { %9569 = vmatprep.subr.bf16.mxu1 %v10979_v35 }
 0xb05   : > { %vm1692_vm11 = vcmp.eq.s32.totalorder %v11211_v58, %v1688_v29 }
 0xb06   : > { %8328 = vmatmul.mubr.msk.f32.gmra.mrb[22].mxu1 %vm1692_vm11, %v12941_v47 }
 0xb07   : > { %9571 = vmatpush3.bf16.msra.mxu1 %v10979_v35 }
 0xb08   : > { %9573 = vmatprep.subr.bf16.mxu1 %v10990_v44 }
 0xb0b   : > { %9575 = vmatpush3.bf16.msra.mxu1 %v10990_v44 }
 0xb0c   : > { %9577 = vmatprep.subr.bf16.mxu1 %v11000_v19 }
 0xb0f   : > { %9579 = vmatpush3.bf16.msra.mxu1 %v11000_v19 }
 0xb10   : > { %9581 = vmatprep.subr.bf16.mxu1 %v11010_v50 }
 0xb13   : > { %9583 = vmatpush3.bf16.msra.mxu1 %v11010_v50 }
 0xb14   : > { %9585 = vmatprep.subr.bf16.mxu1 %v11116_v16 }
 0xb17   : > { %9587 = vmatpush3.bf16.msra.mxu1 %v11116_v16 }
 0xb18   : > { %9589 = vmatprep.subr.bf16.mxu1 %v11128_v17 }
 0xb1b   : > { %9591 = vmatpush3.bf16.msra.mxu1 %v11128_v17 }
 0xb1c   : > { %9593 = vmatprep.subr.bf16.mxu1 %v11140_v20 }
 0xb1f   : > { %9595 = vmatpush3.bf16.msra.mxu1 %v11140_v20 }
 0xbd5   : > { %v8326_v15 = vpop.f32.mrb[20].mxu1 }
 0xbd6   : > { %v2207_v35 = vadd.f32 %v8326_v15, %v11151_v21  ;;  %v2180_v44 = vpop.f32.mrb[21].mxu1 }
 0xbd7   : > { %v2206_v19 = vadd.f32 %v11151_v21, %v2180_v44 }
 0xbd9   : > { %10224 = vtanh.f32 %v2206_v19  ;;  %v8329_v50 = vpop.f32.mrb[22].mxu1 }
 0xbda   : > { %10226 = vtanh.f32 %v2207_v35  ;;  %v2209_v31 = vadd.f32 %v8329_v50, %v11151_v21  ;;  %v2190_v16 = vpop.f32.mrb[23].mxu1 }
 0xbdb   : > { %v2208_v32 = vadd.f32 %v11151_v21, %v2190_v16 }
 0xbdd   : > { %10228 = vtanh.f32 %v2208_v32 }
 0xbde   : > { %10230 = vtanh.f32 %v2209_v31 }
 0xbe3   : > { %v10225_v17 = vpop.eup %10224 }
 0xbe4   : > { %v10227_v34 = vpop.eup %10226  ;;  %8362 = vmatprep.mubr.f32.mxu0 %v10225_v17 }
 0xbe5   : > { %8363 = vmatmul.mubr.f32.vlgmr.msra.gmra.mrb[20].mxu0 %v10227_v34 }
 0xbe6   : > { %9503 = vmatpush3.bf16.msra.mxu0 %v10881_v28 }
 0xbe7   : > { %v10229_v20 = vpop.eup %10228  ;;  %9505 = vmatprep.subr.bf16.mxu0 %v10886_v30 }
 0xbe8   : > { %v10231_v39 = vpop.eup %10230  ;;  %8365 = vmatprep.mubr.f32.mxu0 %v10229_v20 }
 0xbe9   : > { %8366 = vmatmul.mubr.f32.gmra.mrb[22].mxu0 %v10231_v39 }
 0xbea   : > { %9507 = vmatpush3.bf16.msra.mxu0 %v10886_v30  ;;  %8400 = vmatprep.mubr.f32.mxu0 %v10225_v17 }
 0xbeb   : > { %9509 = vmatprep.subr.bf16.mxu0 %v10897_v33 }
 0xbee   : > { %9511 = vmatpush3.bf16.msra.mxu0 %v10897_v33 }
 0xbef   : > { %9513 = vmatprep.subr.bf16.mxu0 %v10907_v37 }
 0xbf2   : > { %9515 = vmatpush3.bf16.msra.mxu0 %v10907_v37 }
 0xbf3   : > { %9517 = vmatprep.subr.bf16.mxu0 %v10917_v42 }
 0xbf6   : > { %9519 = vmatpush3.bf16.msra.mxu0 %v10917_v42 }
 0xbf7   : > { %9521 = vmatprep.subr.bf16.mxu0 %v10932_v2 }
 0xbfa   : > { %9523 = vmatpush3.bf16.msra.mxu0 %v10932_v2 }
 0xbfb   : > { %9525 = vmatprep.subr.bf16.mxu0 %v10942_v5 }
 0xbfe   : > { %9527 = vmatpush3.bf16.msra.mxu0 %v10942_v5 }
 0xbff   : > { %9529 = vmatprep.subr.bf16.mxu0 %v10952_v8 }
 0xc02   : > { %9531 = vmatpush3.bf16.msra.mxu0 %v10952_v8 }
 0xc03   : > { %9533 = vmatprep.subr.bf16.mxu0 %v10962_v11 }
 0xc05   : > { %8401 = vmatmul.mubr.f32.vlgmr.msra.gmra.mrb[24].mxu0 %v10227_v34 }
 0xc06   : > { %8403 = vmatprep.mubr.f32.mxu0 %v10229_v20  ;;  %9535 = vmatpush3.bf16.msra.mxu0 %v10962_v11 }
 0xc07   : > { %9537 = vmatprep.subr.bf16.mxu0 %v11026_v40 }
 0xc09   : > { %8404 = vmatmul.mubr.f32.gmra.mrb[26].mxu0 %v10231_v39 }
 0xc0a   : > { %9539 = vmatpush3.bf16.msra.mxu0 %v11026_v40 }
 0xc0b   : > { %9541 = vmatprep.subr.bf16.mxu0 %v11041_v51 }
 0xc0e   : > { %9543 = vmatpush3.bf16.msra.mxu0 %v11041_v51 }
 0xc0f   : > { %9545 = vmatprep.subr.bf16.mxu0 %v11052_v57 }
 0xc12   : > { %9547 = vmatpush3.bf16.msra.mxu0 %v11052_v57 }
 0xc13   : > { %9549 = vmatprep.subr.bf16.mxu0 %v11062_v60 }
 0xc16   : > { %9551 = vmatpush3.bf16.msra.mxu0 %v11062_v60 }
 0xc17   : > { %9553 = vmatprep.subr.bf16.mxu0 %v11072_v63 }
 0xc1a   : > { %9555 = vmatpush3.bf16.msra.mxu0 %v11072_v63 }
 0xc1b   : > { %9557 = vmatprep.subr.bf16.mxu0 %v11082_v3 }
 0xc1e   : > { %9559 = vmatpush3.bf16.msra.mxu0 %v11082_v3 }
 0xc1f   : > { %9561 = vmatprep.subr.bf16.mxu0 %v11092_v7 }
 0xc22   : > { %9563 = vmatpush3.bf16.msra.mxu0 %v11092_v7 }
 0xcb8   : > { %v8364_v28 = vpop.f32.mrb[20].mxu0 }
 0xcb9   : > { %v11292_v30 = vadd.f32 %v8364_v28, %v11192_v36  ;;  %v2303_v33 = vpop.f32.mrb[21].mxu0 }
 0xcba   : > { %v11295_v37 = vadd.f32 %v11192_v36, %v2303_v33 }
 0xcbb   : > { %2324 = vmax.xlane.f32.xlu1 %v11292_v30 }
 0xcbc   : > { %2322 = vmax.xlane.f32.xlu0 %v11295_v37  ;;  %v8367_v42 = vpop.f32.mrb[22].mxu0 }
 0xcbd   : > { %v11300_v2 = vadd.f32 %v8367_v42, %v11192_v36  ;;  %v2313_v5 = vpop.f32.mrb[23].mxu0 }
 0xcbe   : > { %v11303_v8 = vadd.f32 %v11192_v36, %v2313_v5 }
 0xcbf   : > { %12974 = vst [vmem:[#allocation6_spill] sm:$0xff] %v11300_v2  ;;  %2328 = vmax.xlane.f32.xlu1 %v11300_v2 }
 0xcc0   : > { %12975 = vst [vmem:[#allocation7_spill] sm:$0xff] %v11303_v8  ;;  %2326 = vmax.xlane.f32.xlu0 %v11303_v8 }
 0xd48   : > { %v11307_v11 = vpop.xlane.xlu1 %2324 }
 0xd49   : > { %vm2331_vm12 = vcmp.eq.f32.partialorder %v11292_v30, %v11307_v11  ;;  %v11311_v40 = vpop.xlane.xlu0 %2322 }
 0xd4a   : > { %vm2330_vm13 = vcmp.eq.f32.partialorder %v11295_v37, %v11311_v40  ;;  %v2335_v51 = vsel %vm2331_vm12, %v11211_v58, 128 }
 0xd4b   : > { %v2353_v57 = vshra.s32 %v2335_v51, 16  ;;  %v2334_v60 = vsel %vm2330_vm13, %v11211_v58, 128  ;;  %v2352_v10 = vand.u32 65535, %v2335_v51 }
 0xd4c   : > { %v11317_v63 = vpop.xlane.xlu1 %2328  ;;  %v2339_v3 = vshra.s32 %v2334_v60, 16  ;;  %v2338_v12 = vand.u32 65535, %v2334_v60 }
 0xd4d   : > { %12976 = vst [vmem:[#allocation8_spill] sm:$0xff] %v11317_v63  ;;  %vm2333_vm14 = vcmp.eq.f32.partialorder %v11300_v2, %v11317_v63  ;;  %v11321_v7 = vpop.xlane.xlu0 %2326  ;;  %v2355_v43 = vcvt.s32.f32 %v2353_v57  ;;  %v2354_v18 = vcvt.s32.f32 %v2352_v10 }
 0xd4e   : > { %12977 = vst [vmem:[#allocation9_spill] sm:$0xff] %v11321_v7  ;;  %vm2332_vm15 = vcmp.eq.f32.partialorder %v11303_v8, %v11321_v7  ;;  %v2341_v46 = vcvt.s32.f32 %v2339_v3  ;;  %v2337_v48 = vsel %vm2333_vm14, %v11211_v58, 128  ;;  %v2340_v38 = vcvt.s32.f32 %v2338_v12 }
 0xd4f   : > { %2356 = vmin.xlane.f32.xlu1 %v2355_v43  ;;  %v2336_v61 = vsel %vm2332_vm15, %v11211_v58, 128  ;;  %v2381_v62 = vshra.s32 %v2337_v48, 16  ;;  %v2380_v22 = vand.u32 65535, %v2337_v48  ;;  %v3424_v48 = vld [vmem:[%s12935_s4 + $0x8] sm:$0xff] }
 0xd50   : > { %2342 = vmin.xlane.f32.xlu0 %v2341_v46  ;;  %v2367_v4 = vshra.s32 %v2336_v61, 16  ;;  %v2366_v53 = vand.u32 65535, %v2336_v61 }
 0xd51   : > { %v2383_v6 = vcvt.s32.f32 %v2381_v62  ;;  %v2382_v26 = vcvt.s32.f32 %v2380_v22 }
 0xd52   : > { %v2369_v9 = vcvt.s32.f32 %v2367_v4  ;;  %v2368_v27 = vcvt.s32.f32 %v2366_v53 }
 0xd53   : > { %2384 = vmin.xlane.f32.xlu1 %v2383_v6 }
 0xd54   : > { %2370 = vmin.xlane.f32.xlu0 %v2369_v9 }
 0xddc   : > { %v2357_v41 = vpop.xlane.xlu1 %2356 }
 0xddd   : > { %v2343_v14 = vpop.xlane.xlu0 %2342  ;;  %vm2358_vm0 = vcmp.eq.f32.partialorder %v2355_v43, %v2357_v41  ;;  %v2363_v35 = vcvt.f32.s32 %v2357_v41 }
 0xdde   : > { %v2359_v56 = vsel %vm2358_vm0, %v2354_v18, inf  ;;  %vm2344_vm1 = vcmp.eq.f32.partialorder %v2341_v46, %v2343_v14  ;;  %v2349_v44 = vcvt.f32.s32 %v2343_v14  ;;  %v3423_v46 = vld [vmem:[%s12935_s4] sm:$0xff]  ;;  %v3425_v14 = vld [vmem:[%s12935_s4 + $0x10] sm:$0xff] }
 0xddf   : > { %2360 = vmin.xlane.f32.xlu1 %v2359_v56  ;;  %v2345_v24 = vsel %vm2344_vm1, %v2340_v38, inf  ;;  %v2364_v50 = vshll.u32 %v2363_v35, 16  ;;  %v11341_v61 = vpack.c.bf16 %v3424_v48, %v3423_v46  ;;  %v3426_v38 = vld [vmem:[%s12935_s4 + $0x18] sm:$0xff]  ;;  %v3431_v35 = vld [vmem:[%s12935_s4 + $0x40] sm:$0xff] }
 0xde0   : > { %2346 = vmin.xlane.f32.xlu0 %v2345_v24  ;;  %v2385_v23 = vpop.xlane.xlu1 %2384  ;;  %v2350_v17 = vshll.u32 %v2349_v44, 16  ;;  %v11354_v53 = vpack.c.bf16 %v3426_v38, %v3425_v14  ;;  %v3427_v24 = vld [vmem:[%s12935_s4 + $0x20] sm:$0xff]  ;;  %v3432_v44 = vld [vmem:[%s12935_s4 + $0x48] sm:$0xff] }
 0xde1   : > { %v2371_v25 = vpop.xlane.xlu0 %2370  ;;  %vm2386_vm2 = vcmp.eq.f32.partialorder %v2383_v6, %v2385_v23  ;;  %v2391_v31 = vcvt.f32.s32 %v2385_v23  ;;  %9597 = vmatprep.subr.bf16.mxu1 %v11341_v61 }
 0xde2   : > { %vm2372_vm3 = vcmp.eq.f32.partialorder %v2369_v9, %v2371_v25  ;;  %v2387_v29 = vsel %vm2386_vm2, %v2382_v26, inf  ;;  %v2377_v34 = vcvt.f32.s32 %v2371_v25 }
 0xde3   : > { %v2373_v15 = vsel %vm2372_vm3, %v2368_v27, inf  ;;  %2388 = vmin.xlane.f32.xlu1 %v2387_v29  ;;  %v2392_v33 = vshll.u32 %v2391_v31, 16  ;;  %v3429_v27 = vld [vmem:[%s12935_s4 + $0x30] sm:$0xff]  ;;  %v3430_v29 = vld [vmem:[%s12935_s4 + $0x38] sm:$0xff] }
 0xde4   : > { %2374 = vmin.xlane.f32.xlu0 %v2373_v15  ;;  %v2378_v51 = vshll.u32 %v2377_v34, 16  ;;  %v11374_v15 = vpack.c.bf16 %v3430_v29, %v3429_v27  ;;  %v3434_v31 = vld [vmem:[%s12935_s4 + $0x58] sm:$0xff] }
 0xde5   : > { %v3410_v29 = vld [vmem:[%s12934_s3 + $0x18] sm:$0xff] }
 0xe6c   : > { %v2361_v19 = vpop.xlane.xlu1 %2360 }
 0xe6d   : > { %v2362_v16 = vcvt.f32.s32 %v2361_v19  ;;  %v2347_v32 = vpop.xlane.xlu0 %2346  ;;  %v11384_v19 = vpack.c.bf16 %v3432_v44, %v3431_v35  ;;  %v3411_v44 = vld [vmem:[%s12934_s3 + $0x20] sm:$0xff] }
 0xe6e   : > { %v2348_v20 = vcvt.f32.s32 %v2347_v32  ;;  %v3435_v32 = vld [vmem:[%s12935_s4 + $0x60] sm:$0xff] }
 0xe6f   : > { %v2365_v39 = vadd.s32 %v2364_v50, %v2362_v16  ;;  %v3433_v50 = vld [vmem:[%s12935_s4 + $0x50] sm:$0xff] }
 0xe70   : > { %v2351_v28 = vadd.s32 %v2350_v17, %v2348_v20  ;;  %v2389_v42 = vpop.xlane.xlu1 %2388  ;;  %v11394_v16 = vpack.c.bf16 %v3434_v31, %v3433_v50  ;;  %v3436_v17 = vld [vmem:[%s12935_s4 + $0x68] sm:$0xff]  ;;  %v3437_v20 = vld [vmem:[%s12935_s4 + $0x70] sm:$0xff] }
 0xe71   : > { %v2375_v5 = vpop.xlane.xlu0 %2374  ;;  %v2390_v57 = vcvt.f32.s32 %v2389_v42  ;;  %vm2395_vm5 = vcmp.eq.s32.totalorder %v11211_v58, %v2365_v39  ;;  %v11404_v34 = vpack.c.bf16 %v3436_v17, %v3435_v32  ;;  %v3438_v39 = vld [vmem:[%s12935_s4 + $0x78] sm:$0xff]  ;;  %v3412_v50 = vld [vmem:[%s12934_s3 + $0x28] sm:$0xff]  ;;  %v3413_v32 = vld [vmem:[%s12934_s3 + $0x30] sm:$0xff] }
 0xe72   : > { %v2376_v60 = vcvt.f32.s32 %v2375_v5  ;;  %vm2394_vm4 = vcmp.eq.s32.totalorder %v11211_v58, %v2351_v28  ;;  %v11414_v28 = vpack.c.bf16 %v3438_v39, %v3437_v20  ;;  %v11483_v31 = vpack.c.bf16 %v3412_v50, %v3411_v44  ;;  %v3414_v17 = vld [vmem:[%s12934_s3 + $0x38] sm:$0xff]  ;;  %v3415_v39 = vld [vmem:[%s12934_s3 + $0x40] sm:$0xff] }
 0xe73   : > { %8438 = vmatprep.mubr.msk.f32.mxu0 %vm2394_vm4, %v12941_v47  ;;  %v2393_v3 = vadd.s32 %v2392_v33, %v2390_v57  ;;  %v11493_v20 = vpack.c.bf16 %v3414_v17, %v3413_v32 }
 0xe74   : > { %v2379_v43 = vadd.s32 %v2378_v51, %v2376_v60  ;;  %8439 = vmatmul.mubr.msk.f32.vlgmr.msra.gmra.mrb[24].mxu0 %vm2395_vm5, %v12941_v47 }
 0xe75   : > { %vm2397_vm7 = vcmp.eq.s32.totalorder %v11211_v58, %v2393_v3 }
 0xe76   : > { %vm2396_vm6 = vcmp.eq.s32.totalorder %v11211_v58, %v2379_v43 }
 0xe77   : > { %8441 = vmatprep.mubr.msk.f32.mxu0 %vm2396_vm6, %v12941_v47 }
 0xe78   : > { %8442 = vmatmul.mubr.msk.f32.gmra.mrb[26].mxu0 %vm2397_vm7, %v12941_v47 }
 0xf47   : > { %v8440_v62 = vpop.f32.mrb[24].mxu0 }
 0xf48   : > { %v2912_v4 = vadd.f32 %v8440_v62, %v11151_v21  ;;  %v2885_v6 = vpop.f32.mrb[25].mxu0 }
 0xf49   : > { %v2911_v9 = vadd.f32 %v11151_v21, %v2885_v6 }
 0xf4b   : > { %10232 = vtanh.f32 %v2911_v9  ;;  %v8443_v10 = vpop.f32.mrb[26].mxu0 }
 0xf4c   : > { %10234 = vtanh.f32 %v2912_v4  ;;  %v2914_v12 = vadd.f32 %v8443_v10, %v11151_v21  ;;  %v2895_v41 = vpop.f32.mrb[27].mxu0 }
 0xf4d   : > { %v2913_v18 = vadd.f32 %v11151_v21, %v2895_v41  ;;  %v3428_v21 = vld [vmem:[%s12935_s4 + $0x28] sm:$0xff] }
 0xf4e   : > { %v11364_v25 = vpack.c.bf16 %v3428_v21, %v3427_v24  ;;  %v3407_v21 = vld [vmem:[%s12934_s3] sm:$0xff] }
 0xf4f   : > { %10236 = vtanh.f32 %v2913_v18 }
 0xf50   : > { %10238 = vtanh.f32 %v2914_v12 }
 0xf55   : > { %v10233_v22 = vpop.eup %10232 }
 0xf56   : > { %v10235_v56 = vpop.eup %10234  ;;  %8476 = vmatprep.mubr.f32.mxu1 %v10233_v22 }
 0xf57   : > { %8477 = vmatmul.mubr.f32.vlgmr.msra.gmra.mrb[24].mxu1 %v10235_v56 }
 0xf58   : > { %9599 = vmatpush3.bf16.msra.mxu1 %v11341_v61 }
 0xf59   : > { %v10237_v23 = vpop.eup %10236  ;;  %9601 = vmatprep.subr.bf16.mxu1 %v11354_v53 }
 0xf5a   : > { %v10239_v26 = vpop.eup %10238  ;;  %8479 = vmatprep.mubr.f32.mxu1 %v10237_v23 }
 0xf5b   : > { %8480 = vmatmul.mubr.f32.gmra.mrb[26].mxu1 %v10239_v26 }
 0xf5c   : > { %9603 = vmatpush3.bf16.msra.mxu1 %v11354_v53  ;;  %8514 = vmatprep.mubr.f32.mxu1 %v10233_v22 }
 0xf5d   : > { %9605 = vmatprep.subr.bf16.mxu1 %v11364_v25 }
 0xf60   : > { %9607 = vmatpush3.bf16.msra.mxu1 %v11364_v25 }
 0xf61   : > { %9609 = vmatprep.subr.bf16.mxu1 %v11374_v15 }
 0xf64   : > { %9611 = vmatpush3.bf16.msra.mxu1 %v11374_v15 }
 0xf65   : > { %9613 = vmatprep.subr.bf16.mxu1 %v11384_v19 }
 0xf68   : > { %9615 = vmatpush3.bf16.msra.mxu1 %v11384_v19 }
 0xf69   : > { %9617 = vmatprep.subr.bf16.mxu1 %v11394_v16 }
 0xf6c   : > { %9619 = vmatpush3.bf16.msra.mxu1 %v11394_v16 }
 0xf6d   : > { %9621 = vmatprep.subr.bf16.mxu1 %v11404_v34 }
 0xf70   : > { %9623 = vmatpush3.bf16.msra.mxu1 %v11404_v34 }
 0xf71   : > { %9625 = vmatprep.subr.bf16.mxu1 %v11414_v28 }
 0xf74   : > { %9627 = vmatpush3.bf16.msra.mxu1 %v11414_v28 }
 0xf77   : > { %8515 = vmatmul.mubr.f32.vlgmr.msra.gmra.mrb[28].mxu1 %v10235_v56 }
 0xf78   : > { %8517 = vmatprep.mubr.f32.mxu1 %v10237_v23  ;;  %v3408_v23 = vld [vmem:[%s12934_s3 + $0x8] sm:$0xff] }
 0xf79   : > { %v11467_v27 = vpack.c.bf16 %v3408_v23, %v3407_v21 }
 0xf7b   : > { %8518 = vmatmul.mubr.f32.gmra.mrb[30].mxu1 %v10239_v26  ;;  %v3409_v26 = vld [vmem:[%s12934_s3 + $0x10] sm:$0xff]  ;;  %9629 = vmatprep.subr.bf16.mxu1 %v11467_v27 }
 0xf7c   : > { %v11472_v35 = vpack.c.bf16 %v3410_v29, %v3409_v26  ;;  %9631 = vmatpush3.bf16.msra.mxu1 %v11467_v27 }
 0xf7e   : > { %9633 = vmatprep.subr.bf16.mxu1 %v11472_v35 }
 0xf80   : > { %9635 = vmatpush3.bf16.msra.mxu1 %v11472_v35 }
 0xf81   : > { %9637 = vmatprep.subr.bf16.mxu1 %v11483_v31 }
 0xf84   : > { %9639 = vmatpush3.bf16.msra.mxu1 %v11483_v31 }
 0xf85   : > { %9641 = vmatprep.subr.bf16.mxu1 %v11493_v20 }
 0xf88   : > { %9643 = vmatpush3.bf16.msra.mxu1 %v11493_v20 }
0x102a   : > { %v8478_v33 = vpop.f32.mrb[24].mxu1 }
0x102b   : > { %v11420_v42 = vadd.f32 %v8478_v33, %v11192_v36  ;;  %v3008_v5 = vpop.f32.mrb[25].mxu1  ;;  %v3416_v33 = vld [vmem:[%s12934_s3 + $0x48] sm:$0xff] }
0x102c   : > { %v11423_v51 = vadd.f32 %v11192_v36, %v3008_v5  ;;  %v11503_v5 = vpack.c.bf16 %v3416_v33, %v3415_v39 }
0x102d   : > { %12978 = vst [vmem:[#allocation10_spill] sm:$0xff] %v11420_v42  ;;  %3029 = vmax.xlane.f32.xlu1 %v11420_v42 }
0x102e   : > { %12979 = vst [vmem:[#allocation11_spill] sm:$0xff] %v11423_v51  ;;  %3027 = vmax.xlane.f32.xlu0 %v11423_v51  ;;  %v8481_v57 = vpop.f32.mrb[26].mxu1  ;;  %9645 = vmatprep.subr.bf16.mxu1 %v11503_v5 }
0x102f   : > { %v11428_v60 = vadd.f32 %v8481_v57, %v11192_v36  ;;  %v3018_v3 = vpop.f32.mrb[27].mxu1  ;;  %v3417_v57 = vld [vmem:[%s12934_s3 + $0x50] sm:$0xff]  ;;  %9647 = vmatpush3.bf16.msra.mxu1 %v11503_v5 }
0x1030   : > { %v11431_v43 = vadd.f32 %v11192_v36, %v3018_v3  ;;  %v3418_v3 = vld [vmem:[%s12934_s3 + $0x58] sm:$0xff] }
0x1031   : > { %12980 = vst [vmem:[#allocation12_spill] sm:$0xff] %v11428_v60  ;;  %3033 = vmax.xlane.f32.xlu1 %v11428_v60 }
0x1032   : > { %12981 = vst [vmem:[#allocation13_spill] sm:$0xff] %v11431_v43  ;;  %3031 = vmax.xlane.f32.xlu0 %v11431_v43 }
0x10ba   : > { %v11435_v46 = vpop.xlane.xlu1 %3029 }
0x10bb   : > { %12982 = vst [vmem:[#allocation14_spill] sm:$0xff] %v11435_v46  ;;  %vm3036_vm8 = vcmp.eq.f32.partialorder %v11420_v42, %v11435_v46  ;;  %v11439_v48 = vpop.xlane.xlu0 %3027 }
0x10bc   : > { %12983 = vst [vmem:[#allocation15_spill] sm:$0xff] %v11439_v48  ;;  %v3040_v62 = vsel %vm3036_vm8, %v11211_v58, 128  ;;  %vm3035_vm9 = vcmp.eq.f32.partialorder %v11423_v51, %v11439_v48 }
0x10bd   : > { %v3039_v4 = vsel %vm3035_vm9, %v11211_v58, 128  ;;  %v3058_v36 = vshra.s32 %v3040_v62, 16  ;;  %v3057_v21 = vand.u32 65535, %v3040_v62 }
0x10be   : > { %v11445_v6 = vpop.xlane.xlu1 %3033  ;;  %v3044_v9 = vshra.s32 %v3039_v4, 16  ;;  %v3043_v23 = vand.u32 65535, %v3039_v4 }
0x10bf   : > { %12984 = vst [vmem:[#allocation16_spill] sm:$0xff] %v11445_v6  ;;  %vm3038_vm10 = vcmp.eq.f32.partialorder %v11428_v60, %v11445_v6  ;;  %v11449_v10 = vpop.xlane.xlu0 %3031  ;;  %v3060_v12 = vcvt.s32.f32 %v3058_v36  ;;  %v11513_v36 = vpack.c.bf16 %v3418_v3, %v3417_v57  ;;  %v3059_v29 = vcvt.s32.f32 %v3057_v21 }
0x10c0   : > { %12985 = vst [vmem:[#allocation17_spill] sm:$0xff] %v11449_v10  ;;  %v3042_v41 = vsel %vm3038_vm10, %v11211_v58, 128  ;;  %vm3037_vm11 = vcmp.eq.f32.partialorder %v11431_v43, %v11449_v10  ;;  %v3046_v14 = vcvt.s32.f32 %v3044_v9  ;;  %v3419_v9 = vld [vmem:[%s12934_s3 + $0x60] sm:$0xff]  ;;  %v3045_v17 = vcvt.s32.f32 %v3043_v23  ;;  %v3627_v23 = vld [vmem:[%s12937_s6 + $0x18] sm:$0xff] }
0x10c1   : > { %v11455_v18 = vsel %vm3037_vm11, %v11211_v58, 128  ;;  %3061 = vmin.xlane.f32.xlu1 %v3060_v12  ;;  %v3086_v38 = vshra.s32 %v3042_v41, 16  ;;  %9649 = vmatprep.subr.bf16.mxu1 %v11513_v36  ;;  %v3085_v44 = vand.u32 65535, %v3042_v41  ;;  %v3422_v41 = vld [vmem:[%s12934_s3 + $0x78] sm:$0xff] }
0x10c2   : > { %v3072_v22 = vshra.s32 %v11455_v18, 16  ;;  %3047 = vmin.xlane.f32.xlu0 %v3046_v14  ;;  %9651 = vmatpush3.bf16.msra.mxu1 %v11513_v36  ;;  %v3071_v39 = vand.u32 65535, %v11455_v18 }
0x10c3   : > { %v3088_v56 = vcvt.s32.f32 %v3086_v38  ;;  %v3420_v38 = vld [vmem:[%s12934_s3 + $0x68] sm:$0xff]  ;;  %v3087_v3 = vcvt.s32.f32 %v3085_v44  ;;  %v3628_v44 = vld [vmem:[%s12937_s6 + $0x20] sm:$0xff] }
0x10c4   : > { %v3074_v24 = vcvt.s32.f32 %v3072_v22  ;;  %v11523_v22 = vpack.c.bf16 %v3420_v38, %v3419_v9  ;;  %v3073_v62 = vcvt.s32.f32 %v3071_v39  ;;  %v3630_v39 = vld [vmem:[%s12937_s6 + $0x30] sm:$0xff] }
0x10c5   : > { %3089 = vmin.xlane.f32.xlu1 %v3088_v56 }
0x10c6   : > { %3075 = vmin.xlane.f32.xlu0 %v3074_v24  ;;  %9653 = vmatprep.subr.bf16.mxu1 %v11523_v22 }
0x10c7   : > { %9655 = vmatpush3.bf16.msra.mxu1 %v11523_v22 }
0x114e   : > { %v3062_v26 = vpop.xlane.xlu1 %3061 }
0x114f   : > { %vm3063_vm12 = vcmp.eq.f32.partialorder %v3060_v12, %v3062_v26  ;;  %v3048_v50 = vpop.xlane.xlu0 %3047  ;;  %v3421_v12 = vld [vmem:[%s12934_s3 + $0x70] sm:$0xff] }
0x1150   : > { %v3064_v32 = vsel %vm3063_vm12, %v3059_v29, inf  ;;  %vm3049_vm13 = vcmp.eq.f32.partialorder %v3046_v14, %v3048_v50  ;;  %v11535_v18 = vpack.c.bf16 %v3422_v41, %v3421_v12  ;;  %v3624_v14 = vld [vmem:[%s12937_s6] sm:$0xff]  ;;  %v3068_v12 = vcvt.f32.s32 %v3062_v26 }
0x1151   : > { %3065 = vmin.xlane.f32.xlu1 %v3064_v32  ;;  %v3050_v33 = vsel %vm3049_vm13, %v3045_v17, inf  ;;  %v3629_v32 = vld [vmem:[%s12937_s6 + $0x28] sm:$0xff]  ;;  %v3054_v41 = vcvt.f32.s32 %v3048_v50  ;;  %v12986_v50 = vmov 1.0  }
0x1152   : > { %v3090_v57 = vpop.xlane.xlu1 %3089  ;;  %3051 = vmin.xlane.f32.xlu0 %v3050_v33  ;;  %9657 = vmatprep.subr.bf16.mxu1 %v11535_v18  ;;  %v11565_v17 = vpack.c.bf16 %v3629_v32, %v3628_v44  ;;  %v3631_v33 = vld [vmem:[%s12937_s6 + $0x38] sm:$0xff] }
0x1153   : > { %vm3091_vm14 = vcmp.eq.f32.partialorder %v3088_v56, %v3090_v57  ;;  %v3076_v9 = vpop.xlane.xlu0 %3075  ;;  %9659 = vmatpush3.bf16.msra.mxu1 %v11535_v18  ;;  %v3625_v56 = vld [vmem:[%s12937_s6 + $0x8] sm:$0xff]  ;;  %v3055_v32 = vshll.u32 %v3054_v41, 16 }
0x1154   : > { %v3092_v38 = vsel %vm3091_vm14, %v3087_v3, inf  ;;  %vm3077_vm15 = vcmp.eq.f32.partialorder %v3074_v24, %v3076_v9  ;;  %v3626_v24 = vld [vmem:[%s12937_s6 + $0x10] sm:$0xff]  ;;  %v11548_v21 = vpack.c.bf16 %v3625_v56, %v3624_v14  ;;  %v11575_v3 = vpack.c.bf16 %v3631_v33, %v3630_v39 }
0x1155   : > { %3093 = vmin.xlane.f32.xlu1 %v3092_v38  ;;  %v3078_v4 = vsel %vm3077_vm15, %v3073_v62, inf  ;;  %v11553_v29 = vpack.c.bf16 %v3627_v23, %v3626_v24  ;;  %v3632_v38 = vld [vmem:[%s12937_s6 + $0x40] sm:$0xff]  ;;  %v3633_v62 = vld [vmem:[%s12937_s6 + $0x48] sm:$0xff]  ;;  %v3069_v24 = vshll.u32 %v3068_v12, 16  ;;  %v3096_v23 = vcvt.f32.s32 %v3090_v57  ;;  %v3639_v12 = vld [vmem:[%s12937_s6 + $0x78] sm:$0xff] }
0x1156   : > { %3079 = vmin.xlane.f32.xlu0 %v3078_v4  ;;  %9661 = vmatprep.subr.bf16.mxu0 %v11548_v21  ;;  %v11585_v4 = vpack.c.bf16 %v3633_v62, %v3632_v38  ;;  %v3082_v39 = vcvt.f32.s32 %v3076_v9  ;;  %v3638_v9 = vld [vmem:[%s12937_s6 + $0x70] sm:$0xff] }
0x1157   : > { %9757 = vmatprep.subr.bf16.mxu1 %v11548_v21  ;;  %9663 = vmatpush3.bf16.msra.mxu0 %v11548_v21  ;;  %v3097_v43 = vshll.u32 %v3096_v23, 16  ;;  %v11634_v41 = vpack.c.bf16 %v3639_v12, %v3638_v9 }
0x1158   : > { %9665 = vmatprep.subr.bf16.mxu0 %v11553_v29  ;;  %v3083_v60 = vshll.u32 %v3082_v39, 16 }
0x115b   : > { %9667 = vmatpush3.bf16.msra.mxu0 %v11553_v29 }
0x115c   : > { %9669 = vmatprep.subr.bf16.mxu0 %v11565_v17 }
0x115f   : > { %9671 = vmatpush3.bf16.msra.mxu0 %v11565_v17 }
0x1160   : > { %9673 = vmatprep.subr.bf16.mxu0 %v11575_v3 }
0x1163   : > { %9675 = vmatpush3.bf16.msra.mxu0 %v11575_v3 }
0x1164   : > { %9677 = vmatprep.subr.bf16.mxu0 %v11585_v4 }
0x1167   : > { %9679 = vmatpush3.bf16.msra.mxu0 %v11585_v4 }
0x11de   : > { %v3066_v14 = vpop.xlane.xlu1 %3065 }
0x11df   : > { %v3067_v56 = vcvt.f32.s32 %v3066_v14  ;;  %v3052_v44 = vpop.xlane.xlu0 %3051  ;;  %v11648_v14 = vld [vmem:[%s12936_s5] ss:$0 sm:$0xff] }
0x11e0   : > { %v3053_v33 = vcvt.f32.s32 %v3052_v44 }
0x11e1   : > { %v3070_v55 = vadd.s32 %v3069_v24, %v3067_v56 }
0x11e2   : > { %v3094_v47 = vpop.xlane.xlu1 %3093  ;;  %v3056_v38 = vadd.s32 %v3055_v32, %v3053_v33 }
0x11e3   : > { %v3095_v62 = vcvt.f32.s32 %v3094_v47  ;;  %v3080_v10 = vpop.xlane.xlu0 %3079  ;;  %vm3100_vm1 = vcmp.eq.s32.totalorder %v11211_v58, %v3070_v55  ;;  %v3634_v55 = vld [vmem:[%s12937_s6 + $0x50] sm:$0xff]  ;;  %v3635_v47 = vld [vmem:[%s12937_s6 + $0x58] sm:$0xff] }
0x11e4   : > { %v3081_v6 = vcvt.f32.s32 %v3080_v10  ;;  %vm3099_vm0 = vcmp.eq.s32.totalorder %v11211_v58, %v3056_v38 }
0x11e5   : > { %v3098_v26 = vadd.s32 %v3097_v43, %v3095_v62  ;;  %8552 = vmatprep.mubr.msk.f32.mxu1 %vm3099_vm0, %v12986_v50  ;;  %v3636_v43 = vld [vmem:[%s12937_s6 + $0x60] sm:$0xff] }
0x11e6   : > { %v3084_v57 = vadd.s32 %v3083_v60, %v3081_v6  ;;  %8553 = vmatmul.mubr.msk.f32.vlgmr.msra.gmra.mrb[28].mxu1 %vm3100_vm1, %v12986_v50  ;;  %v11613_v60 = vpack.c.bf16 %v3635_v47, %v3634_v55  ;;  %v3637_v6 = vld [vmem:[%s12937_s6 + $0x68] sm:$0xff]  ;;  %v11689_v47 = vld [vmem:[%s12938_s7] ss:$0 sm:$0xff] }
0x11e7   : > { %9759 = vmatpush3.bf16.msra.mxu1 %v11548_v21  ;;  %vm3102_vm3 = vcmp.eq.s32.totalorder %v11211_v58, %v3098_v26  ;;  %v11625_v10 = vpack.c.bf16 %v3637_v6, %v3636_v43 }
0x11e8   : > { %vm3101_vm2 = vcmp.eq.s32.totalorder %v11211_v58, %v3084_v57  ;;  %9761 = vmatprep.subr.bf16.mxu1 %v11553_v29  ;;  %9681 = vmatprep.subr.bf16.mxu0 %v11613_v60 }
0x11e9   : > { %8555 = vmatprep.mubr.msk.f32.mxu1 %vm3101_vm2, %v12986_v50  ;;  %9683 = vmatpush3.bf16.msra.mxu0 %v11613_v60 }
0x11ea   : > { %8556 = vmatmul.mubr.msk.f32.gmra.mrb[30].mxu1 %vm3102_vm3, %v12986_v50  ;;  %9685 = vmatprep.subr.bf16.mxu0 %v11625_v10 }
0x11eb   : > { %9763 = vmatpush3.bf16.msra.mxu1 %v11553_v29 }
0x11ec   : > { %9765 = vmatprep.subr.bf16.mxu1 %v11565_v17 }
0x11ed   : > { %9687 = vmatpush3.bf16.msra.mxu0 %v11625_v10 }
0x11ee   : > { %9689 = vmatprep.subr.bf16.mxu0 %v11634_v41 }
0x11ef   : > { %9767 = vmatpush3.bf16.msra.mxu1 %v11565_v17 }
0x11f0   : > { %9769 = vmatprep.subr.bf16.mxu1 %v11575_v3 }
0x11f1   : > { %9691 = vmatpush3.bf16.msra.mxu0 %v11634_v41 }
0x11f2   : > { %9693 = vmatprep.subr.bf16.mxu0 %v11341_v61 }
0x11f3   : > { %9771 = vmatpush3.bf16.msra.mxu1 %v11575_v3 }
0x11f4   : > { %9773 = vmatprep.subr.bf16.mxu1 %v11585_v4 }
0x11f7   : > { %9775 = vmatpush3.bf16.msra.mxu1 %v11585_v4 }
0x11f8   : > { %9777 = vmatprep.subr.bf16.mxu1 %v11613_v60 }
0x11fb   : > { %9779 = vmatpush3.bf16.msra.mxu1 %v11613_v60 }
0x11fc   : > { %9781 = vmatprep.subr.bf16.mxu1 %v11625_v10 }
0x11ff   : > { %9783 = vmatpush3.bf16.msra.mxu1 %v11625_v10 }
0x1200   : > { %9785 = vmatprep.subr.bf16.mxu1 %v11634_v41 }
0x1203   : > { %9787 = vmatpush3.bf16.msra.mxu1 %v11634_v41 }
0x1204   : > { %9789 = vmatprep.subr.bf16.mxu1 %v11341_v61 }
0x12b9   : > { %v8554_v56 = vpop.f32.mrb[28].mxu1 }
0x12ba   : > { %v3617_v24 = vadd.f32 %v8554_v56, %v11648_v14  ;;  %v3590_v23 = vpop.f32.mrb[29].mxu1 }
0x12bb   : > { %v3616_v44 = vadd.f32 %v11648_v14, %v3590_v23 }
0x12bd   : > { %10240 = vtanh.f32 %v3616_v44  ;;  %v8557_v32 = vpop.f32.mrb[30].mxu1 }
0x12be   : > { %10242 = vtanh.f32 %v3617_v24  ;;  %v3619_v39 = vadd.f32 %v8557_v32, %v11648_v14  ;;  %v3600_v33 = vpop.f32.mrb[31].mxu1 }
0x12bf   : > { %v3618_v38 = vadd.f32 %v11648_v14, %v3600_v33 }
0x12c1   : > { %10244 = vtanh.f32 %v3618_v38 }
0x12c2   : > { %10246 = vtanh.f32 %v3619_v39 }
0x12c7   : > { %v10241_v62 = vpop.eup %10240 }
0x12c8   : > { %v10243_v26 = vpop.eup %10242  ;;  %8590 = vmatprep.mubr.f32.mxu0 %v10241_v62 }
0x12c9   : > { %8591 = vmatmul.mubr.f32.vlgmr.msra.gmra.mrb[28].mxu0 %v10243_v26 }
0x12ca   : > { %9695 = vmatpush3.bf16.msra.mxu0 %v11341_v61 }
0x12cb   : > { %v10245_v57 = vpop.eup %10244  ;;  %9697 = vmatprep.subr.bf16.mxu0 %v11354_v53 }
0x12cc   : > { %v10247_v55 = vpop.eup %10246  ;;  %8593 = vmatprep.mubr.f32.mxu0 %v10245_v57 }
0x12cd   : > { %8594 = vmatmul.mubr.f32.gmra.mrb[30].mxu0 %v10247_v55 }
0x12ce   : > { %9699 = vmatpush3.bf16.msra.mxu0 %v11354_v53  ;;  %8628 = vmatprep.mubr.f32.mxu0 %v10241_v62 }
0x12cf   : > { %9701 = vmatprep.subr.bf16.mxu0 %v11364_v25 }
0x12d2   : > { %9703 = vmatpush3.bf16.msra.mxu0 %v11364_v25 }
0x12d3   : > { %9705 = vmatprep.subr.bf16.mxu0 %v11374_v15 }
0x12d6   : > { %9707 = vmatpush3.bf16.msra.mxu0 %v11374_v15 }
0x12d7   : > { %9709 = vmatprep.subr.bf16.mxu0 %v11384_v19 }
0x12da   : > { %9711 = vmatpush3.bf16.msra.mxu0 %v11384_v19 }
0x12db   : > { %9713 = vmatprep.subr.bf16.mxu0 %v11394_v16 }
0x12de   : > { %9715 = vmatpush3.bf16.msra.mxu0 %v11394_v16 }
0x12df   : > { %9717 = vmatprep.subr.bf16.mxu0 %v11404_v34 }
0x12e2   : > { %9719 = vmatpush3.bf16.msra.mxu0 %v11404_v34 }
0x12e3   : > { %9721 = vmatprep.subr.bf16.mxu0 %v11414_v28 }
0x12e6   : > { %9723 = vmatpush3.bf16.msra.mxu0 %v11414_v28 }
0x12e7   : > { %9725 = vmatprep.subr.bf16.mxu0 %v11467_v27 }
0x12e9   : > { %8629 = vmatmul.mubr.f32.vlgmr.msra.gmra.mrb[32].mxu0 %v10243_v26 }
0x12ea   : > { %8631 = vmatprep.mubr.f32.mxu0 %v10245_v57  ;;  %9727 = vmatpush3.bf16.msra.mxu0 %v11467_v27 }
0x12eb   : > { %9729 = vmatprep.subr.bf16.mxu0 %v11472_v35 }
0x12ed   : > { %8632 = vmatmul.mubr.f32.gmra.mrb[34].mxu0 %v10247_v55 }
0x12ee   : > { %9731 = vmatpush3.bf16.msra.mxu0 %v11472_v35 }
0x12ef   : > { %9733 = vmatprep.subr.bf16.mxu0 %v11483_v31 }
0x12f2   : > { %9735 = vmatpush3.bf16.msra.mxu0 %v11483_v31 }
0x12f3   : > { %9737 = vmatprep.subr.bf16.mxu0 %v11493_v20 }
0x12f6   : > { %9739 = vmatpush3.bf16.msra.mxu0 %v11493_v20 }
0x12f7   : > { %9741 = vmatprep.subr.bf16.mxu0 %v11503_v5 }
0x12fa   : > { %9743 = vmatpush3.bf16.msra.mxu0 %v11503_v5 }
0x12fb   : > { %9745 = vmatprep.subr.bf16.mxu0 %v11513_v36 }
0x12fe   : > { %9747 = vmatpush3.bf16.msra.mxu0 %v11513_v36 }
0x12ff   : > { %9749 = vmatprep.subr.bf16.mxu0 %v11523_v22 }
0x1302   : > { %9751 = vmatpush3.bf16.msra.mxu0 %v11523_v22 }
0x1303   : > { %9753 = vmatprep.subr.bf16.mxu0 %v11535_v18 }
0x1306   : > { %9755 = vmatpush3.bf16.msra.mxu0 %v11535_v18 }
0x1307   : > { %9853 = vmatprep.subr.bf16.mxu0 %v11548_v21 }
0x139c   : > { %v8592_v43 = vpop.f32.mrb[28].mxu0 }
0x139d   : > { %v11692_v6 = vadd.f32 %v8592_v43, %v11689_v47  ;;  %v3713_v9 = vpop.f32.mrb[29].mxu0 }
0x139e   : > { %v11695_v12 = vadd.f32 %v11689_v47, %v3713_v9 }
0x139f   : > { %12987 = vst [vmem:[#allocation18_spill] sm:$0xff] %v11692_v6  ;;  %3734 = vmax.xlane.f32.xlu1 %v11692_v6 }
0x13a0   : > { %12988 = vst [vmem:[#allocation19_spill] sm:$0xff] %v11695_v12  ;;  %3732 = vmax.xlane.f32.xlu0 %v11695_v12  ;;  %v8595_v56 = vpop.f32.mrb[30].mxu0 }
0x13a1   : > { %v11700_v24 = vadd.f32 %v8595_v56, %v11689_v47  ;;  %v3723_v23 = vpop.f32.mrb[31].mxu0 }
0x13a2   : > { %v11703_v44 = vadd.f32 %v11689_v47, %v3723_v23 }
0x13a3   : > { %12989 = vst [vmem:[#allocation20_spill] sm:$0xff] %v11700_v24  ;;  %3738 = vmax.xlane.f32.xlu1 %v11700_v24 }
0x13a4   : > { %12990 = vst [vmem:[#allocation21_spill] sm:$0xff] %v11703_v44  ;;  %3736 = vmax.xlane.f32.xlu0 %v11703_v44 }
0x142c   : > { %v11707_v32 = vpop.xlane.xlu1 %3734 }
0x142d   : > { %12991 = vst [vmem:[#allocation22_spill] sm:$0xff] %v11707_v32  ;;  %vm3741_vm4 = vcmp.eq.f32.partialorder %v11692_v6, %v11707_v32  ;;  %v11711_v39 = vpop.xlane.xlu0 %3732 }
0x142e   : > { %12992 = vst [vmem:[#allocation23_spill] sm:$0xff] %v11711_v39  ;;  %v3745_v33 = vsel %vm3741_vm4, %v11211_v58, 128  ;;  %vm3740_vm5 = vcmp.eq.f32.partialorder %v11695_v12, %v11711_v39 }
0x142f   : > { %v3744_v38 = vsel %vm3740_vm5, %v11211_v58, 128  ;;  %v3763_v62 = vshra.s32 %v3745_v33, 16 }
0x1430   : > { %v11717_v26 = vpop.xlane.xlu1 %3738  ;;  %v3749_v57 = vshra.s32 %v3744_v38, 16 }
0x1431   : > { %12993 = vst [vmem:[#allocation24_spill] sm:$0xff] %v11717_v26  ;;  %vm3743_vm6 = vcmp.eq.f32.partialorder %v11700_v24, %v11717_v26  ;;  %v11721_v55 = vpop.xlane.xlu0 %3736  ;;  %v3765_v43 = vcvt.s32.f32 %v3763_v62  ;;  %v3762_v24 = vand.u32 65535, %v3745_v33  ;;  %v3748_v26 = vand.u32 65535, %v3744_v38 }
0x1432   : > { %12994 = vst [vmem:[#allocation25_spill] sm:$0xff] %v11721_v55  ;;  %v3747_v9 = vsel %vm3743_vm6, %v11211_v58, 128  ;;  %vm3742_vm7 = vcmp.eq.f32.partialorder %v11703_v44, %v11721_v55  ;;  %v3751_v23 = vcvt.s32.f32 %v3749_v57 }
0x1433   : > { %v3746_v56 = vsel %vm3742_vm7, %v11211_v58, 128  ;;  %3766 = vmin.xlane.f32.xlu1 %v3765_v43  ;;  %v3791_v12 = vshra.s32 %v3747_v9, 16  ;;  %v3764_v62 = vcvt.s32.f32 %v3762_v24  ;;  %v3790_v48 = vand.u32 65535, %v3747_v9 }
0x1434   : > { %v3777_v39 = vshra.s32 %v3746_v56, 16  ;;  %3752 = vmin.xlane.f32.xlu0 %v3751_v23  ;;  %v3750_v44 = vcvt.s32.f32 %v3748_v26  ;;  %v3776_v55 = vand.u32 65535, %v3746_v56 }
0x1435   : > { %v3793_v6 = vcvt.s32.f32 %v3791_v12  ;;  %v3792_v7 = vcvt.s32.f32 %v3790_v48 }
0x1436   : > { %v3779_v32 = vcvt.s32.f32 %v3777_v39  ;;  %v3778_v2 = vcvt.s32.f32 %v3776_v55 }
0x1437   : > { %3794 = vmin.xlane.f32.xlu1 %v3793_v6 }
0x1438   : > { %3780 = vmin.xlane.f32.xlu0 %v3779_v32 }
0x14c0   : > { %v3767_v51 = vpop.xlane.xlu1 %3766 }
0x14c1   : > { %vm3768_vm8 = vcmp.eq.f32.partialorder %v3765_v43, %v3767_v51  ;;  %v3753_v42 = vpop.xlane.xlu0 %3752  ;;  %v3773_v24 = vcvt.f32.s32 %v3767_v51 }
0x14c2   : > { %v3769_v46 = vsel %vm3768_vm8, %v3764_v62, inf  ;;  %vm3754_vm9 = vcmp.eq.f32.partialorder %v3751_v23, %v3753_v42  ;;  %v3759_v38 = vcvt.f32.s32 %v3753_v42 }
0x14c3   : > { %3770 = vmin.xlane.f32.xlu1 %v3769_v46  ;;  %v3755_v57 = vsel %vm3754_vm9, %v3750_v44, inf  ;;  %v3774_v26 = vshll.u32 %v3773_v24, 16 }
0x14c4   : > { %v3795_v8 = vpop.xlane.xlu1 %3794  ;;  %3756 = vmin.xlane.f32.xlu0 %v3755_v57  ;;  %v3760_v23 = vshll.u32 %v3759_v38, 16 }
0x14c5   : > { %vm3796_vm10 = vcmp.eq.f32.partialorder %v3793_v6, %v3795_v8  ;;  %v3781_v12 = vpop.xlane.xlu0 %3780  ;;  %v3801_v56 = vcvt.f32.s32 %v3795_v8 }
0x14c6   : > { %v3797_v39 = vsel %vm3796_vm10, %v3792_v7, inf  ;;  %vm3782_vm11 = vcmp.eq.f32.partialorder %v3779_v32, %v3781_v12  ;;  %v3787_v44 = vcvt.f32.s32 %v3781_v12 }
0x14c7   : > { %3798 = vmin.xlane.f32.xlu1 %v3797_v39  ;;  %v3783_v33 = vsel %vm3782_vm11, %v3778_v2, inf  ;;  %v3802_v7 = vshll.u32 %v3801_v56, 16 }
0x14c8   : > { %3784 = vmin.xlane.f32.xlu0 %v3783_v33  ;;  %v3788_v39 = vshll.u32 %v3787_v44, 16 }
0x1550   : > { %v3771_v43 = vpop.xlane.xlu1 %3770 }
0x1551   : > { %v3772_v9 = vcvt.f32.s32 %v3771_v43  ;;  %v3757_v46 = vpop.xlane.xlu0 %3756 }
0x1552   : > { %v3758_v62 = vcvt.f32.s32 %v3757_v46 }
0x1553   : > { %v3775_v48 = vadd.s32 %v3774_v26, %v3772_v9 }
0x1554   : > { %v3799_v57 = vpop.xlane.xlu1 %3798  ;;  %v3761_v6 = vadd.s32 %v3760_v23, %v3758_v62 }
0x1555   : > { %v3800_v63 = vcvt.f32.s32 %v3799_v57  ;;  %v3785_v55 = vpop.xlane.xlu0 %3784  ;;  %vm3805_vm13 = vcmp.eq.s32.totalorder %v11211_v58, %v3775_v48 }
0x1556   : > { %v3786_v32 = vcvt.f32.s32 %v3785_v55  ;;  %vm3804_vm12 = vcmp.eq.s32.totalorder %v11211_v58, %v3761_v6 }
0x1557   : > { %v3803_v2 = vadd.s32 %v3802_v7, %v3800_v63  ;;  %8666 = vmatprep.mubr.msk.f32.mxu0 %vm3804_vm12, %v12986_v50 }
0x1558   : > { %v3789_v8 = vadd.s32 %v3788_v39, %v3786_v32  ;;  %8667 = vmatmul.mubr.msk.f32.vlgmr.msra.gmra.mrb[32].mxu0 %vm3805_vm13, %v12986_v50 }
0x1559   : > { %9855 = vmatpush3.bf16.msra.mxu0 %v11548_v21  ;;  %vm3807_vm15 = vcmp.eq.s32.totalorder %v11211_v58, %v3803_v2 }
0x155a   : > { %vm3806_vm14 = vcmp.eq.s32.totalorder %v11211_v58, %v3789_v8  ;;  %9857 = vmatprep.subr.bf16.mxu0 %v11553_v29 }
0x155b   : > { %8669 = vmatprep.mubr.msk.f32.mxu0 %vm3806_vm14, %v12986_v50 }
0x155c   : > { %8670 = vmatmul.mubr.msk.f32.gmra.mrb[34].mxu0 %vm3807_vm15, %v12986_v50 }
0x155d   : > { %9859 = vmatpush3.bf16.msra.mxu0 %v11553_v29 }
0x155e   : > { %9861 = vmatprep.subr.bf16.mxu0 %v11565_v17 }
0x1561   : > { %9863 = vmatpush3.bf16.msra.mxu0 %v11565_v17 }
0x1562   : > { %9865 = vmatprep.subr.bf16.mxu0 %v11575_v3 }
0x1565   : > { %9867 = vmatpush3.bf16.msra.mxu0 %v11575_v3 }
0x1566   : > { %9869 = vmatprep.subr.bf16.mxu0 %v11585_v4 }
0x1569   : > { %9871 = vmatpush3.bf16.msra.mxu0 %v11585_v4 }
0x156a   : > { %9873 = vmatprep.subr.bf16.mxu0 %v11613_v60 }
0x156d   : > { %9875 = vmatpush3.bf16.msra.mxu0 %v11613_v60 }
0x156e   : > { %9877 = vmatprep.subr.bf16.mxu0 %v11625_v10 }
0x1571   : > { %9879 = vmatpush3.bf16.msra.mxu0 %v11625_v10 }
0x1572   : > { %9881 = vmatprep.subr.bf16.mxu0 %v11634_v41 }
0x1575   : > { %9883 = vmatpush3.bf16.msra.mxu0 %v11634_v41 }
0x162b   : > { %v8668_v63 = vpop.f32.mrb[32].mxu0 }
0x162c   : > { %v4322_v42 = vadd.f32 %v8668_v63, %v11648_v14  ;;  %v4295_v51 = vpop.f32.mrb[33].mxu0 }
0x162d   : > { %v4321_v21 = vadd.f32 %v11648_v14, %v4295_v51 }
0x162f   : > { %10248 = vtanh.f32 %v4321_v21  ;;  %v8671_v29 = vpop.f32.mrb[34].mxu0 }
0x1630   : > { %10250 = vtanh.f32 %v4322_v42  ;;  %v4324_v17 = vadd.f32 %v8671_v29, %v11648_v14  ;;  %v4305_v3 = vpop.f32.mrb[35].mxu0 }
0x1631   : > { %v4323_v4 = vadd.f32 %v11648_v14, %v4305_v3 }
0x1633   : > { %10252 = vtanh.f32 %v4323_v4 }
0x1634   : > { %10254 = vtanh.f32 %v4324_v17 }
0x1639   : > { %v10249_v60 = vpop.eup %10248 }
0x163a   : > { %v10251_v10 = vpop.eup %10250  ;;  %8704 = vmatprep.mubr.f32.mxu1 %v10249_v60 }
0x163b   : > { %8705 = vmatmul.mubr.f32.vlgmr.msra.gmra.mrb[32].mxu1 %v10251_v10 }
0x163c   : > { %9791 = vmatpush3.bf16.msra.mxu1 %v11341_v61 }
0x163d   : > { %v10253_v41 = vpop.eup %10252  ;;  %9793 = vmatprep.subr.bf16.mxu1 %v11354_v53 }
0x163e   : > { %v10255_v12 = vpop.eup %10254  ;;  %8707 = vmatprep.mubr.f32.mxu1 %v10253_v41 }
0x163f   : > { %8708 = vmatmul.mubr.f32.gmra.mrb[34].mxu1 %v10255_v12 }
0x1640   : > { %9795 = vmatpush3.bf16.msra.mxu1 %v11354_v53  ;;  %8742 = vmatprep.mubr.f32.mxu1 %v10249_v60 }
0x1641   : > { %9797 = vmatprep.subr.bf16.mxu1 %v11364_v25 }
0x1644   : > { %9799 = vmatpush3.bf16.msra.mxu1 %v11364_v25 }
0x1645   : > { %9801 = vmatprep.subr.bf16.mxu1 %v11374_v15 }
0x1648   : > { %9803 = vmatpush3.bf16.msra.mxu1 %v11374_v15 }
0x1649   : > { %9805 = vmatprep.subr.bf16.mxu1 %v11384_v19 }
0x164c   : > { %9807 = vmatpush3.bf16.msra.mxu1 %v11384_v19 }
0x164d   : > { %9809 = vmatprep.subr.bf16.mxu1 %v11394_v16 }
0x1650   : > { %9811 = vmatpush3.bf16.msra.mxu1 %v11394_v16 }
0x1651   : > { %9813 = vmatprep.subr.bf16.mxu1 %v11404_v34 }
0x1654   : > { %9815 = vmatpush3.bf16.msra.mxu1 %v11404_v34 }
0x1655   : > { %9817 = vmatprep.subr.bf16.mxu1 %v11414_v28 }
0x1658   : > { %9819 = vmatpush3.bf16.msra.mxu1 %v11414_v28 }
0x1659   : > { %9821 = vmatprep.subr.bf16.mxu1 %v11467_v27 }
0x165b   : > { %8743 = vmatmul.mubr.f32.vlgmr.msra.gmra.mrb[36].mxu1 %v10251_v10 }
0x165c   : > { %8745 = vmatprep.mubr.f32.mxu1 %v10253_v41  ;;  %9823 = vmatpush3.bf16.msra.mxu1 %v11467_v27 }
0x165d   : > { %9825 = vmatprep.subr.bf16.mxu1 %v11472_v35 }
0x165f   : > { %8746 = vmatmul.mubr.f32.gmra.mrb[38].mxu1 %v10255_v12 }
0x1660   : > { %9827 = vmatpush3.bf16.msra.mxu1 %v11472_v35 }
0x1661   : > { %9829 = vmatprep.subr.bf16.mxu1 %v11483_v31 }
0x1664   : > { %9831 = vmatpush3.bf16.msra.mxu1 %v11483_v31 }
0x1665   : > { %9833 = vmatprep.subr.bf16.mxu1 %v11493_v20 }
0x1668   : > { %9835 = vmatpush3.bf16.msra.mxu1 %v11493_v20 }
0x1669   : > { %9837 = vmatprep.subr.bf16.mxu1 %v11503_v5 }
0x166c   : > { %9839 = vmatpush3.bf16.msra.mxu1 %v11503_v5 }
0x166d   : > { %9841 = vmatprep.subr.bf16.mxu1 %v11513_v36 }
0x1670   : > { %9843 = vmatpush3.bf16.msra.mxu1 %v11513_v36 }
0x1671   : > { %9845 = vmatprep.subr.bf16.mxu1 %v11523_v22 }
0x1674   : > { %9847 = vmatpush3.bf16.msra.mxu1 %v11523_v22 }
0x1675   : > { %9849 = vmatprep.subr.bf16.mxu1 %v11535_v18 }
0x1678   : > { %9851 = vmatpush3.bf16.msra.mxu1 %v11535_v18 }
0x170e   : > { %v8706_v61 = vpop.f32.mrb[32].mxu1 }
0x170f   : > { %v11786_v53 = vadd.f32 %v8706_v61, %v11689_v47  ;;  %v4418_v25 = vpop.f32.mrb[33].mxu1 }
0x1710   : > { %v11789_v15 = vadd.f32 %v11689_v47, %v4418_v25 }
0x1711   : > { %4439 = vmax.xlane.f32.xlu1 %v11786_v53 }
0x1712   : > { %4437 = vmax.xlane.f32.xlu0 %v11789_v15  ;;  %v8709_v19 = vpop.f32.mrb[34].mxu1 }
0x1713   : > { %v11794_v16 = vadd.f32 %v8709_v19, %v11689_v47  ;;  %v4428_v34 = vpop.f32.mrb[35].mxu1 }
0x1714   : > { %v11797_v28 = vadd.f32 %v11689_v47, %v4428_v34 }
0x1715   : > { %4443 = vmax.xlane.f32.xlu1 %v11794_v16 }
0x1716   : > { %12995 = vst [vmem:[#allocation26_spill] sm:$0xff] %v11797_v28  ;;  %4441 = vmax.xlane.f32.xlu0 %v11797_v28 }
0x179e   : > { %v11801_v27 = vpop.xlane.xlu1 %4439 }
0x179f   : > { %vm4446_vm0 = vcmp.eq.f32.partialorder %v11786_v53, %v11801_v27  ;;  %v11805_v35 = vpop.xlane.xlu0 %4437 }
0x17a0   : > { %v4450_v31 = vsel %vm4446_vm0, %v11211_v58, 128  ;;  %vm4445_vm1 = vcmp.eq.f32.partialorder %v11789_v15, %v11805_v35 }
0x17a1   : > { %v4449_v20 = vsel %vm4445_vm1, %v11211_v58, 128  ;;  %v4468_v5 = vshra.s32 %v4450_v31, 16  ;;  %v4467_v23 = vand.u32 65535, %v4450_v31 }
0x17a2   : > { %v11811_v36 = vpop.xlane.xlu1 %4443  ;;  %v4454_v22 = vshra.s32 %v4449_v20, 16  ;;  %v4453_v44 = vand.u32 65535, %v4449_v20 }
0x17a3   : > { %vm4448_vm2 = vcmp.eq.f32.partialorder %v11794_v16, %v11811_v36  ;;  %v11815_v18 = vpop.xlane.xlu0 %4441  ;;  %v4470_v33 = vcvt.s32.f32 %v4468_v5  ;;  %v4469_v48 = vcvt.s32.f32 %v4467_v23 }
0x17a4   : > { %v4452_v24 = vsel %vm4448_vm2, %v11211_v58, 128  ;;  %vm4447_vm3 = vcmp.eq.f32.partialorder %v11797_v28, %v11815_v18  ;;  %v4456_v43 = vcvt.s32.f32 %v4454_v22  ;;  %v4455_v55 = vcvt.s32.f32 %v4453_v44 }
0x17a5   : > { %v4451_v38 = vsel %vm4447_vm3, %v11211_v58, 128  ;;  %4471 = vmin.xlane.f32.xlu1 %v4470_v33  ;;  %v4496_v9 = vshra.s32 %v4452_v24, 16  ;;  %v4495_v57 = vand.u32 65535, %v4452_v24 }
0x17a6   : > { %v4482_v26 = vshra.s32 %v4451_v38, 16  ;;  %4457 = vmin.xlane.f32.xlu0 %v4456_v43  ;;  %v4481_v39 = vand.u32 65535, %v4451_v38 }
0x17a7   : > { %v4498_v56 = vcvt.s32.f32 %v4496_v9  ;;  %v4497_v8 = vcvt.s32.f32 %v4495_v57  ;;  %v5538_v9 = vld [vmem:[%s12935_s4] sm:$0xff] }
0x17a8   : > { %v4484_v46 = vcvt.s32.f32 %v4482_v26  ;;  %v4483_v51 = vcvt.s32.f32 %v4481_v39  ;;  %v5539_v26 = vld [vmem:[%s12935_s4 + $0x8] sm:$0xff]  ;;  %v5541_v39 = vld [vmem:[%s12935_s4 + $0x18] sm:$0xff] }
0x17a9   : > { %4499 = vmin.xlane.f32.xlu1 %v4498_v56 }
0x17aa   : > { %4485 = vmin.xlane.f32.xlu0 %v4484_v46 }
0x1832   : > { %v4472_v62 = vpop.xlane.xlu1 %4471 }
0x1833   : > { %vm4473_vm4 = vcmp.eq.f32.partialorder %v4470_v33, %v4472_v62  ;;  %v4458_v6 = vpop.xlane.xlu0 %4457  ;;  %v4478_v29 = vcvt.f32.s32 %v4472_v62 }
0x1834   : > { %v4474_v7 = vsel %vm4473_vm4, %v4469_v48, inf  ;;  %vm4459_vm5 = vcmp.eq.f32.partialorder %v4456_v43, %v4458_v6  ;;  %v4464_v17 = vcvt.f32.s32 %v4458_v6 }
0x1835   : > { %4475 = vmin.xlane.f32.xlu1 %v4474_v7  ;;  %v4460_v32 = vsel %vm4459_vm5, %v4455_v55, inf  ;;  %v4479_v60 = vshll.u32 %v4478_v29, 16  ;;  %v5540_v55 = vld [vmem:[%s12935_s4 + $0x10] sm:$0xff] }
0x1836   : > { %v4500_v2 = vpop.xlane.xlu1 %4499  ;;  %4461 = vmin.xlane.f32.xlu0 %v4460_v32  ;;  %v4465_v12 = vshll.u32 %v4464_v17, 16  ;;  %v5544_v29 = vld [vmem:[%s12935_s4 + $0x30] sm:$0xff]  ;;  %v5545_v17 = vld [vmem:[%s12935_s4 + $0x38] sm:$0xff] }
0x1837   : > { %vm4501_vm6 = vcmp.eq.f32.partialorder %v4498_v56, %v4500_v2  ;;  %v4486_v63 = vpop.xlane.xlu0 %4485  ;;  %v4506_v10 = vcvt.f32.s32 %v4500_v2  ;;  %v11835_v56 = vpack.c.bf16 %v5539_v26, %v5538_v9  ;;  %v11848_v2 = vpack.c.bf16 %v5541_v39, %v5540_v55 }
0x1838   : > { %v4502_v42 = vsel %vm4501_vm6, %v4497_v8, inf  ;;  %vm4487_vm7 = vcmp.eq.f32.partialorder %v4484_v46, %v4486_v63  ;;  %v4492_v61 = vcvt.f32.s32 %v4486_v63  ;;  %v5542_v63 = vld [vmem:[%s12935_s4 + $0x20] sm:$0xff] }
0x1839   : > { %4503 = vmin.xlane.f32.xlu1 %v4502_v42  ;;  %v4488_v21 = vsel %vm4487_vm7, %v4483_v51, inf  ;;  %v4507_v5 = vshll.u32 %v4506_v10, 16  ;;  %9885 = vmatprep.subr.bf16.mxu0 %v11835_v56 }
0x183a   : > { %4489 = vmin.xlane.f32.xlu0 %v4488_v21  ;;  %v4493_v33 = vshll.u32 %v4492_v61, 16 }
0x18c2   : > { %v4476_v3 = vpop.xlane.xlu1 %4475 }
0x18c3   : > { %v4477_v4 = vcvt.f32.s32 %v4476_v3  ;;  %v4462_v41 = vpop.xlane.xlu0 %4461  ;;  %v11868_v3 = vpack.c.bf16 %v5545_v17, %v5544_v29  ;;  %v5522_v29 = vld [vmem:[%s12934_s3] sm:$0xff]  ;;  %v5523_v17 = vld [vmem:[%s12934_s3 + $0x8] sm:$0xff] }
0x18c4   : > { %v4463_v25 = vcvt.f32.s32 %v4462_v41  ;;  %v5548_v41 = vld [vmem:[%s12935_s4 + $0x50] sm:$0xff] }
0x18c5   : > { %v4480_v19 = vadd.s32 %v4479_v60, %v4477_v4  ;;  %v5546_v4 = vld [vmem:[%s12935_s4 + $0x40] sm:$0xff]  ;;  %v5547_v60 = vld [vmem:[%s12935_s4 + $0x48] sm:$0xff] }
0x18c6   : > { %v4504_v34 = vpop.xlane.xlu1 %4503  ;;  %v4466_v31 = vadd.s32 %v4465_v12, %v4463_v25  ;;  %v11878_v10 = vpack.c.bf16 %v5547_v60, %v5546_v4  ;;  %v5549_v12 = vld [vmem:[%s12935_s4 + $0x58] sm:$0xff]  ;;  %v5550_v25 = vld [vmem:[%s12935_s4 + $0x60] sm:$0xff]  ;;  %v5524_v4 = vld [vmem:[%s12934_s3 + $0x10] sm:$0xff]  ;;  %v11961_v60 = vpack.c.bf16 %v5523_v17, %v5522_v29 }
0x18c7   : > { %v4505_v20 = vcvt.f32.s32 %v4504_v34  ;;  %v4490_v22 = vpop.xlane.xlu0 %4489  ;;  %vm4510_vm9 = vcmp.eq.s32.totalorder %v11211_v58, %v4480_v19  ;;  %v11888_v61 = vpack.c.bf16 %v5549_v12, %v5548_v41  ;;  %v5551_v19 = vld [vmem:[%s12935_s4 + $0x68] sm:$0xff]  ;;  %v5525_v41 = vld [vmem:[%s12934_s3 + $0x18] sm:$0xff]  ;;  %v5534_v29 = vld [vmem:[%s12934_s3 + $0x60] sm:$0xff] }
0x18c8   : > { %v4491_v24 = vcvt.f32.s32 %v4490_v22  ;;  %vm4509_vm8 = vcmp.eq.s32.totalorder %v11211_v58, %v4466_v31  ;;  %v11898_v34 = vpack.c.bf16 %v5551_v19, %v5550_v25  ;;  %v5552_v31 = vld [vmem:[%s12935_s4 + $0x70] sm:$0xff]  ;;  %v11966_v12 = vpack.c.bf16 %v5525_v41, %v5524_v4  ;;  %v5526_v25 = vld [vmem:[%s12934_s3 + $0x20] sm:$0xff]  ;;  %v5527_v19 = vld [vmem:[%s12934_s3 + $0x28] sm:$0xff] }
0x18c9   : > { %v4508_v38 = vadd.s32 %v4507_v5, %v4505_v20  ;;  %8780 = vmatprep.mubr.msk.f32.mxu1 %vm4509_vm8, %v12986_v50  ;;  %v5553_v20 = vld [vmem:[%s12935_s4 + $0x78] sm:$0xff]  ;;  %v5535_v17 = vld [vmem:[%s12934_s3 + $0x68] sm:$0xff] }
0x18ca   : > { %v4494_v43 = vadd.s32 %v4493_v33, %v4491_v24  ;;  %8781 = vmatmul.mubr.msk.f32.vlgmr.msra.gmra.mrb[36].mxu1 %vm4510_vm9, %v12986_v50  ;;  %v11908_v5 = vpack.c.bf16 %v5553_v20, %v5552_v31  ;;  %v11977_v31 = vpack.c.bf16 %v5527_v19, %v5526_v25  ;;  %v5528_v20 = vld [vmem:[%s12934_s3 + $0x30] sm:$0xff]  ;;  %v12017_v4 = vpack.c.bf16 %v5535_v17, %v5534_v29 }
0x18cb   : > { %vm4512_vm11 = vcmp.eq.s32.totalorder %v11211_v58, %v4508_v38 }
0x18cc   : > { %vm4511_vm10 = vcmp.eq.s32.totalorder %v11211_v58, %v4494_v43 }
0x18cd   : > { %8783 = vmatprep.mubr.msk.f32.mxu1 %vm4511_vm10, %v12986_v50 }
0x18ce   : > { %8784 = vmatmul.mubr.msk.f32.gmra.mrb[38].mxu1 %vm4512_vm11, %v12986_v50 }
0x199d   : > { %v8782_v46 = vpop.f32.mrb[36].mxu1 }
0x199e   : > { %v5027_v23 = vadd.f32 %v8782_v46, %v11648_v14  ;;  %v5000_v44 = vpop.f32.mrb[37].mxu1 }
0x199f   : > { %v5026_v62 = vadd.f32 %v11648_v14, %v5000_v44 }
0x19a1   : > { %10256 = vtanh.f32 %v5026_v62  ;;  %v8785_v48 = vpop.f32.mrb[38].mxu1 }
0x19a2   : > { %10258 = vtanh.f32 %v5027_v23  ;;  %v5029_v57 = vadd.f32 %v8785_v48, %v11648_v14  ;;  %v5010_v6 = vpop.f32.mrb[39].mxu1 }
0x19a3   : > { %v5028_v7 = vadd.f32 %v11648_v14, %v5010_v6  ;;  %v5543_v14 = vld [vmem:[%s12935_s4 + $0x28] sm:$0xff] }
0x19a4   : > { %v11858_v51 = vpack.c.bf16 %v5543_v14, %v5542_v63 }
0x19a5   : > { %10260 = vtanh.f32 %v5028_v7 }
0x19a6   : > { %10262 = vtanh.f32 %v5029_v57 }
0x19ab   : > { %v10257_v32 = vpop.eup %10256 }
0x19ac   : > { %v10259_v8 = vpop.eup %10258  ;;  %8818 = vmatprep.mubr.f32.mxu0 %v10257_v32 }
0x19ad   : > { %8819 = vmatmul.mubr.f32.vlgmr.msra.gmra.mrb[36].mxu0 %v10259_v8 }
0x19ae   : > { %9887 = vmatpush3.bf16.msra.mxu0 %v11835_v56 }
0x19af   : > { %v10261_v42 = vpop.eup %10260  ;;  %9889 = vmatprep.subr.bf16.mxu0 %v11848_v2 }
0x19b0   : > { %v10263_v21 = vpop.eup %10262  ;;  %8821 = vmatprep.mubr.f32.mxu0 %v10261_v42 }
0x19b1   : > { %8822 = vmatmul.mubr.f32.gmra.mrb[38].mxu0 %v10263_v21 }
0x19b2   : > { %9891 = vmatpush3.bf16.msra.mxu0 %v11848_v2  ;;  %8856 = vmatprep.mubr.f32.mxu0 %v10257_v32 }
0x19b3   : > { %9893 = vmatprep.subr.bf16.mxu0 %v11858_v51 }
0x19b6   : > { %9895 = vmatpush3.bf16.msra.mxu0 %v11858_v51 }
0x19b7   : > { %9897 = vmatprep.subr.bf16.mxu0 %v11868_v3 }
0x19ba   : > { %9899 = vmatpush3.bf16.msra.mxu0 %v11868_v3 }
0x19bb   : > { %9901 = vmatprep.subr.bf16.mxu0 %v11878_v10 }
0x19be   : > { %9903 = vmatpush3.bf16.msra.mxu0 %v11878_v10 }
0x19bf   : > { %9905 = vmatprep.subr.bf16.mxu0 %v11888_v61 }
0x19c2   : > { %9907 = vmatpush3.bf16.msra.mxu0 %v11888_v61 }
0x19c3   : > { %9909 = vmatprep.subr.bf16.mxu0 %v11898_v34 }
0x19c6   : > { %9911 = vmatpush3.bf16.msra.mxu0 %v11898_v34 }
0x19c7   : > { %9913 = vmatprep.subr.bf16.mxu0 %v11908_v5 }
0x19ca   : > { %9915 = vmatpush3.bf16.msra.mxu0 %v11908_v5 }
0x19cb   : > { %9917 = vmatprep.subr.bf16.mxu0 %v11961_v60 }
0x19cd   : > { %8857 = vmatmul.mubr.f32.vlgmr.msra.gmra.mrb[40].mxu0 %v10259_v8 }
0x19ce   : > { %8859 = vmatprep.mubr.f32.mxu0 %v10261_v42  ;;  %9919 = vmatpush3.bf16.msra.mxu0 %v11961_v60 }
0x19cf   : > { %9921 = vmatprep.subr.bf16.mxu0 %v11966_v12 }
0x19d1   : > { %8860 = vmatmul.mubr.f32.gmra.mrb[42].mxu0 %v10263_v21 }
0x19d2   : > { %9923 = vmatpush3.bf16.msra.mxu0 %v11966_v12 }
0x19d3   : > { %9925 = vmatprep.subr.bf16.mxu0 %v11977_v31 }
0x19d6   : > { %9927 = vmatpush3.bf16.msra.mxu0 %v11977_v31 }
0x1a80   : > { %v8820_v22 = vpop.f32.mrb[36].mxu0 }
0x1a81   : > { %v11914_v33 = vadd.f32 %v8820_v22, %v11689_v47  ;;  %v5123_v24 = vpop.f32.mrb[37].mxu0  ;;  %v5529_v22 = vld [vmem:[%s12934_s3 + $0x38] sm:$0xff] }
0x1a82   : > { %v11917_v38 = vadd.f32 %v11689_v47, %v5123_v24  ;;  %v11987_v24 = vpack.c.bf16 %v5529_v22, %v5528_v20 }
0x1a83   : > { %12996 = vst [vmem:[#allocation27_spill] sm:$0xff] %v11914_v33  ;;  %5144 = vmax.xlane.f32.xlu1 %v11914_v33 }
0x1a84   : > { %12997 = vst [vmem:[#allocation28_spill] sm:$0xff] %v11917_v38  ;;  %5142 = vmax.xlane.f32.xlu0 %v11917_v38  ;;  %v8823_v43 = vpop.f32.mrb[38].mxu0  ;;  %9929 = vmatprep.subr.bf16.mxu0 %v11987_v24 }
0x1a85   : > { %v11922_v9 = vadd.f32 %v8823_v43, %v11689_v47  ;;  %v5133_v26 = vpop.f32.mrb[39].mxu0  ;;  %v5530_v43 = vld [vmem:[%s12934_s3 + $0x40] sm:$0xff]  ;;  %9931 = vmatpush3.bf16.msra.mxu0 %v11987_v24 }
0x1a86   : > { %v11925_v46 = vadd.f32 %v11689_v47, %v5133_v26  ;;  %v5531_v26 = vld [vmem:[%s12934_s3 + $0x48] sm:$0xff] }
0x1a87   : > { %12998 = vst [vmem:[#allocation29_spill] sm:$0xff] %v11922_v9  ;;  %5148 = vmax.xlane.f32.xlu1 %v11922_v9 }
0x1a88   : > { %12999 = vst [vmem:[#allocation30_spill] sm:$0xff] %v11925_v46  ;;  %5146 = vmax.xlane.f32.xlu0 %v11925_v46 }
0x1b10   : > { %v11929_v23 = vpop.xlane.xlu1 %5144 }
0x1b11   : > { %13000 = vst [vmem:[#allocation31_spill] sm:$0xff] %v11929_v23  ;;  %vm5151_vm12 = vcmp.eq.f32.partialorder %v11914_v33, %v11929_v23  ;;  %v11933_v44 = vpop.xlane.xlu0 %5142 }
0x1b12   : > { %13001 = vst [vmem:[#allocation32_spill] sm:$0xff] %v11933_v44  ;;  %v5155_v62 = vsel %vm5151_vm12, %v11211_v58, 128  ;;  %vm5150_vm13 = vcmp.eq.f32.partialorder %v11917_v38, %v11933_v44 }
0x1b13   : > { %v5154_v48 = vsel %vm5150_vm13, %v11211_v58, 128  ;;  %v5173_v47 = vshra.s32 %v5155_v62, 16  ;;  %v5172_v41 = vand.u32 65535, %v5155_v62 }
0x1b14   : > { %v11939_v57 = vpop.xlane.xlu1 %5148  ;;  %v5159_v6 = vshra.s32 %v5154_v48, 16  ;;  %v5158_v25 = vand.u32 65535, %v5154_v48 }
0x1b15   : > { %13002 = vst [vmem:[#allocation33_spill] sm:$0xff] %v11939_v57  ;;  %vm5153_vm14 = vcmp.eq.f32.partialorder %v11922_v9, %v11939_v57  ;;  %v11943_v7 = vpop.xlane.xlu0 %5146  ;;  %v5175_v55 = vcvt.s32.f32 %v5173_v47  ;;  %v11997_v47 = vpack.c.bf16 %v5531_v26, %v5530_v43  ;;  %v5174_v20 = vcvt.s32.f32 %v5172_v41 }
0x1b16   : > { %13003 = vst [vmem:[#allocation34_spill] sm:$0xff] %v11943_v7  ;;  %v5157_v39 = vsel %vm5153_vm14, %v11211_v58, 128  ;;  %vm5152_vm15 = vcmp.eq.f32.partialorder %v11925_v46, %v11943_v7  ;;  %v5161_v8 = vcvt.s32.f32 %v5159_v6  ;;  %v5532_v6 = vld [vmem:[%s12934_s3 + $0x50] sm:$0xff] }
0x1b17   : > { %v11949_v32 = vsel %vm5152_vm15, %v11211_v58, 128  ;;  %5176 = vmin.xlane.f32.xlu1 %v5175_v55  ;;  %v5201_v63 = vshra.s32 %v5157_v39, 16  ;;  %9933 = vmatprep.subr.bf16.mxu0 %v11997_v47  ;;  %v5200_v22 = vand.u32 65535, %v5157_v39  ;;  %v5537_v39 = vld [vmem:[%s12934_s3 + $0x78] sm:$0xff] }
0x1b18   : > { %v5187_v14 = vshra.s32 %v11949_v32, 16  ;;  %5162 = vmin.xlane.f32.xlu0 %v5161_v8  ;;  %9935 = vmatpush3.bf16.msra.mxu0 %v11997_v47 }
0x1b19   : > { %v5203_v42 = vcvt.s32.f32 %v5201_v63  ;;  %v5533_v63 = vld [vmem:[%s12934_s3 + $0x58] sm:$0xff]  ;;  %v5202_v46 = vcvt.s32.f32 %v5200_v22 }
0x1b1a   : > { %v5189_v21 = vcvt.s32.f32 %v5187_v14  ;;  %v12007_v14 = vpack.c.bf16 %v5533_v63, %v5532_v6  ;;  %v5160_v6 = vcvt.s32.f32 %v5158_v25  ;;  %v5186_v63 = vand.u32 65535, %v11949_v32  ;;  %v5743_v25 = vld [vmem:[%s12937_s6 + $0x20] sm:$0xff] }
0x1b1b   : > { %5204 = vmin.xlane.f32.xlu1 %v5203_v42 }
0x1b1c   : > { %5190 = vmin.xlane.f32.xlu0 %v5189_v21  ;;  %9937 = vmatprep.subr.bf16.mxu0 %v12007_v14  ;;  %v5188_v62 = vcvt.s32.f32 %v5186_v63 }
0x1b1d   : > { %9939 = vmatpush3.bf16.msra.mxu0 %v12007_v14 }
0x1b1e   : > { %9941 = vmatprep.subr.bf16.mxu0 %v12017_v4 }
0x1b21   : > { %9943 = vmatpush3.bf16.msra.mxu0 %v12017_v4 }
0x1ba4   : > { %v5177_v19 = vpop.xlane.xlu1 %5176 }
0x1ba5   : > { %vm5178_vm0 = vcmp.eq.f32.partialorder %v5175_v55, %v5177_v19  ;;  %v5163_v43 = vpop.xlane.xlu0 %5162  ;;  %v5536_v55 = vld [vmem:[%s12934_s3 + $0x70] sm:$0xff] }
0x1ba6   : > { %v5179_v26 = vsel %vm5178_vm0, %v5174_v20, inf  ;;  %vm5164_vm1 = vcmp.eq.f32.partialorder %v5161_v8, %v5163_v43  ;;  %v12029_v32 = vpack.c.bf16 %v5537_v39, %v5536_v55  ;;  %v5741_v8 = vld [vmem:[%s12937_s6 + $0x10] sm:$0xff]  ;;  %v5744_v20 = vld [vmem:[%s12937_s6 + $0x28] sm:$0xff]  ;;  %v5183_v55 = vcvt.f32.s32 %v5177_v19 }
0x1ba7   : > { %5180 = vmin.xlane.f32.xlu1 %v5179_v26  ;;  %v5165_v29 = vsel %vm5164_vm1, %v5160_v6, inf  ;;  %v9956_v22 = vpack.c.bf16 %v5744_v20, %v5743_v25  ;;  %v5745_v26 = vld [vmem:[%s12937_s6 + $0x30] sm:$0xff]  ;;  %v5746_v6 = vld [vmem:[%s12937_s6 + $0x38] sm:$0xff]  ;;  %v5169_v39 = vcvt.f32.s32 %v5163_v43 }
0x1ba8   : > { %v5205_v17 = vpop.xlane.xlu1 %5204  ;;  %5166 = vmin.xlane.f32.xlu0 %v5165_v29  ;;  %9945 = vmatprep.subr.bf16.mxu0 %v12029_v32  ;;  %v9960_v63 = vpack.c.bf16 %v5746_v6, %v5745_v26  ;;  %v5747_v29 = vld [vmem:[%s12937_s6 + $0x40] sm:$0xff] }
0x1ba9   : > { %vm5206_vm2 = vcmp.eq.f32.partialorder %v5203_v42, %v5205_v17  ;;  %v5191_v7 = vpop.xlane.xlu0 %5190  ;;  %9947 = vmatpush3.bf16.msra.mxu0 %v12029_v32  ;;  %v5170_v20 = vshll.u32 %v5169_v39, 16 }
0x1baa   : > { %v5207_v9 = vsel %vm5206_vm2, %v5202_v46, inf  ;;  %vm5192_vm3 = vcmp.eq.f32.partialorder %v5189_v21, %v5191_v7  ;;  %v5740_v46 = vld [vmem:[%s12937_s6 + $0x8] sm:$0xff]  ;;  %v5742_v21 = vld [vmem:[%s12937_s6 + $0x18] sm:$0xff]  ;;  %v5197_v26 = vcvt.f32.s32 %v5191_v7  ;;  %v5753_v7 = vld [vmem:[%s12937_s6 + $0x70] sm:$0xff] }
0x1bab   : > { %5208 = vmin.xlane.f32.xlu1 %v5207_v9  ;;  %v5193_v48 = vsel %vm5192_vm3, %v5188_v62, inf  ;;  %v5739_v9 = vld [vmem:[%s12937_s6] sm:$0xff]  ;;  %v9952_v41 = vpack.c.bf16 %v5742_v21, %v5741_v8  ;;  %v5748_v62 = vld [vmem:[%s12937_s6 + $0x48] sm:$0xff]  ;;  %v5184_v8 = vshll.u32 %v5183_v55, 16  ;;  %v5211_v21 = vcvt.f32.s32 %v5205_v17  ;;  %v5754_v17 = vld [vmem:[%s12937_s6 + $0x78] sm:$0xff] }
0x1bac   : > { %5194 = vmin.xlane.f32.xlu0 %v5193_v48  ;;  %v9948_v42 = vpack.c.bf16 %v5740_v46, %v5739_v9  ;;  %v9964_v48 = vpack.c.bf16 %v5748_v62, %v5747_v29  ;;  %v5198_v29 = vshll.u32 %v5197_v26, 16 }
0x1bad   : > { %v5212_v23 = vshll.u32 %v5211_v21, 16 }
0x1bae   : > { %9949 = vmatprep.subr.bf16.mxu1 %v9948_v42  ;;  %10045 = vmatprep.subr.bf16.mxu0 %v9948_v42 }
0x1baf   : > { %9951 = vmatpush3.bf16.msra.mxu1 %v9948_v42 }
0x1bb0   : > { %9953 = vmatprep.subr.bf16.mxu1 %v9952_v41 }
0x1bb3   : > { %9955 = vmatpush3.bf16.msra.mxu1 %v9952_v41 }
0x1bb4   : > { %9957 = vmatprep.subr.bf16.mxu1 %v9956_v22 }
0x1bb7   : > { %9959 = vmatpush3.bf16.msra.mxu1 %v9956_v22 }
0x1bb8   : > { %9961 = vmatprep.subr.bf16.mxu1 %v9960_v63 }
0x1bbb   : > { %9963 = vmatpush3.bf16.msra.mxu1 %v9960_v63 }
0x1bbc   : > { %9965 = vmatprep.subr.bf16.mxu1 %v9964_v48 }
0x1bbf   : > { %9967 = vmatpush3.bf16.msra.mxu1 %v9964_v48 }
0x1c34   : > { %v5181_v9 = vpop.xlane.xlu1 %5180 }
0x1c35   : > { %v5182_v46 = vcvt.f32.s32 %v5181_v9  ;;  %v5167_v25 = vpop.xlane.xlu0 %5166 }
0x1c36   : > { %v5168_v6 = vcvt.f32.s32 %v5167_v25 }
0x1c37   : > { %v5185_v57 = vadd.s32 %v5184_v8, %v5182_v46 }
0x1c38   : > { %v5209_v38 = vpop.xlane.xlu1 %5208  ;;  %v5171_v44 = vadd.s32 %v5170_v20, %v5168_v6 }
0x1c39   : > { %v5210_v33 = vcvt.f32.s32 %v5209_v38  ;;  %v5195_v28 = vpop.xlane.xlu0 %5194  ;;  %vm5215_vm5 = vcmp.eq.s32.totalorder %v11211_v58, %v5185_v57 }
0x1c3a   : > { %v5196_v62 = vcvt.f32.s32 %v5195_v28  ;;  %vm5214_vm4 = vcmp.eq.s32.totalorder %v11211_v58, %v5171_v44  ;;  %v5749_v28 = vld [vmem:[%s12937_s6 + $0x50] sm:$0xff]  ;;  %v5752_v44 = vld [vmem:[%s12937_s6 + $0x68] sm:$0xff] }
0x1c3b   : > { %v5213_v19 = vadd.s32 %v5212_v23, %v5210_v33  ;;  %8894 = vmatprep.mubr.msk.f32.mxu0 %vm5214_vm4, %v12986_v50  ;;  %v5750_v33 = vld [vmem:[%s12937_s6 + $0x58] sm:$0xff]  ;;  %v5751_v23 = vld [vmem:[%s12937_s6 + $0x60] sm:$0xff] }
0x1c3c   : > { %v5199_v43 = vadd.s32 %v5198_v29, %v5196_v62  ;;  %8895 = vmatmul.mubr.msk.f32.vlgmr.msra.gmra.mrb[40].mxu0 %vm5215_vm5, %v12986_v50  ;;  %v9968_v38 = vpack.c.bf16 %v5750_v33, %v5749_v28  ;;  %v9972_v57 = vpack.c.bf16 %v5752_v44, %v5751_v23 }
0x1c3d   : > { %10047 = vmatpush3.bf16.msra.mxu0 %v9948_v42  ;;  %vm5217_vm7 = vcmp.eq.s32.totalorder %v11211_v58, %v5213_v19  ;;  %v9976_v42 = vpack.c.bf16 %v5754_v17, %v5753_v7 }
0x1c3e   : > { %vm5216_vm6 = vcmp.eq.s32.totalorder %v11211_v58, %v5199_v43  ;;  %10049 = vmatprep.subr.bf16.mxu0 %v9952_v41  ;;  %9969 = vmatprep.subr.bf16.mxu1 %v9968_v38 }
0x1c3f   : > { %8897 = vmatprep.mubr.msk.f32.mxu0 %vm5216_vm6, %v12986_v50  ;;  %9971 = vmatpush3.bf16.msra.mxu1 %v9968_v38 }
0x1c40   : > { %8898 = vmatmul.mubr.msk.f32.gmra.mrb[42].mxu0 %vm5217_vm7, %v12986_v50  ;;  %9973 = vmatprep.subr.bf16.mxu1 %v9972_v57 }
0x1c41   : > { %10051 = vmatpush3.bf16.msra.mxu0 %v9952_v41  ;;  %v12093_v41 = vld [vmem:[%s12936_s5] ss:$0 sm:$0xff] }
0x1c42   : > { %10053 = vmatprep.subr.bf16.mxu0 %v9956_v22 }
0x1c43   : > { %9975 = vmatpush3.bf16.msra.mxu1 %v9972_v57 }
0x1c44   : > { %9977 = vmatprep.subr.bf16.mxu1 %v9976_v42 }
0x1c45   : > { %10055 = vmatpush3.bf16.msra.mxu0 %v9956_v22 }
0x1c46   : > { %10057 = vmatprep.subr.bf16.mxu0 %v9960_v63 }
0x1c47   : > { %9979 = vmatpush3.bf16.msra.mxu1 %v9976_v42 }
0x1c48   : > { %9981 = vmatprep.subr.bf16.mxu1 %v11835_v56 }
0x1c49   : > { %10059 = vmatpush3.bf16.msra.mxu0 %v9960_v63 }
0x1c4a   : > { %10061 = vmatprep.subr.bf16.mxu0 %v9964_v48 }
0x1c4d   : > { %10063 = vmatpush3.bf16.msra.mxu0 %v9964_v48 }
0x1c4e   : > { %10065 = vmatprep.subr.bf16.mxu0 %v9968_v38 }
0x1c51   : > { %10067 = vmatpush3.bf16.msra.mxu0 %v9968_v38 }
0x1c52   : > { %10069 = vmatprep.subr.bf16.mxu0 %v9972_v57 }
0x1c55   : > { %10071 = vmatpush3.bf16.msra.mxu0 %v9972_v57 }
0x1c56   : > { %10073 = vmatprep.subr.bf16.mxu0 %v9976_v42 }
0x1c59   : > { %10075 = vmatpush3.bf16.msra.mxu0 %v9976_v42 }
0x1d0f   : > { %v8896_v22 = vpop.f32.mrb[40].mxu0 }
0x1d10   : > { %v5732_v63 = vadd.f32 %v8896_v22, %v12093_v41  ;;  %v5705_v48 = vpop.f32.mrb[41].mxu0 }
0x1d11   : > { %v5731_v55 = vadd.f32 %v12093_v41, %v5705_v48 }
0x1d13   : > { %10264 = vtanh.f32 %v5731_v55  ;;  %v8899_v39 = vpop.f32.mrb[42].mxu0 }
0x1d14   : > { %10266 = vtanh.f32 %v5732_v63  ;;  %v5734_v9 = vadd.f32 %v8899_v39, %v12093_v41  ;;  %v5715_v46 = vpop.f32.mrb[43].mxu0 }
0x1d15   : > { %v5733_v8 = vadd.f32 %v12093_v41, %v5715_v46 }
0x1d17   : > { %10268 = vtanh.f32 %v5733_v8 }
0x1d18   : > { %10270 = vtanh.f32 %v5734_v9 }
0x1d1d   : > { %v10265_v21 = vpop.eup %10264 }
0x1d1e   : > { %v10267_v25 = vpop.eup %10266  ;;  %8932 = vmatprep.mubr.f32.mxu1 %v10265_v21 }
0x1d1f   : > { %8933 = vmatmul.mubr.f32.vlgmr.msra.gmra.mrb[40].mxu1 %v10267_v25 }
0x1d20   : > { %9983 = vmatpush3.bf16.msra.mxu1 %v11835_v56  ;;  %v12133_v56 = vld [vmem:[%s12938_s7] ss:$0 sm:$0xff] }
0x1d21   : > { %v10269_v20 = vpop.eup %10268  ;;  %9985 = vmatprep.subr.bf16.mxu1 %v11848_v2 }
0x1d22   : > { %v10271_v26 = vpop.eup %10270  ;;  %8935 = vmatprep.mubr.f32.mxu1 %v10269_v20 }
0x1d23   : > { %8936 = vmatmul.mubr.f32.gmra.mrb[42].mxu1 %v10271_v26 }
0x1d24   : > { %9987 = vmatpush3.bf16.msra.mxu1 %v11848_v2  ;;  %8970 = vmatprep.mubr.f32.mxu1 %v10265_v21 }
0x1d25   : > { %9989 = vmatprep.subr.bf16.mxu1 %v11858_v51 }
0x1d28   : > { %9991 = vmatpush3.bf16.msra.mxu1 %v11858_v51 }
0x1d29   : > { %9993 = vmatprep.subr.bf16.mxu1 %v11868_v3 }
0x1d2c   : > { %9995 = vmatpush3.bf16.msra.mxu1 %v11868_v3 }
0x1d2d   : > { %9997 = vmatprep.subr.bf16.mxu1 %v11878_v10 }
0x1d30   : > { %9999 = vmatpush3.bf16.msra.mxu1 %v11878_v10 }
0x1d31   : > { %10001 = vmatprep.subr.bf16.mxu1 %v11888_v61 }
0x1d34   : > { %10003 = vmatpush3.bf16.msra.mxu1 %v11888_v61 }
0x1d35   : > { %10005 = vmatprep.subr.bf16.mxu1 %v11898_v34 }
0x1d38   : > { %10007 = vmatpush3.bf16.msra.mxu1 %v11898_v34 }
0x1d39   : > { %10009 = vmatprep.subr.bf16.mxu1 %v11908_v5 }
0x1d3c   : > { %10011 = vmatpush3.bf16.msra.mxu1 %v11908_v5 }
0x1d3d   : > { %10013 = vmatprep.subr.bf16.mxu1 %v11961_v60 }
0x1d3f   : > { %8971 = vmatmul.mubr.f32.vlgmr.msra.gmra.mrb[44].mxu1 %v10267_v25 }
0x1d40   : > { %8973 = vmatprep.mubr.f32.mxu1 %v10269_v20  ;;  %10015 = vmatpush3.bf16.msra.mxu1 %v11961_v60 }
0x1d41   : > { %10017 = vmatprep.subr.bf16.mxu1 %v11966_v12 }
0x1d43   : > { %8974 = vmatmul.mubr.f32.gmra.mrb[46].mxu1 %v10271_v26 }
0x1d44   : > { %10019 = vmatpush3.bf16.msra.mxu1 %v11966_v12 }
0x1d45   : > { %10021 = vmatprep.subr.bf16.mxu1 %v11977_v31 }
0x1d48   : > { %10023 = vmatpush3.bf16.msra.mxu1 %v11977_v31 }
0x1d49   : > { %10025 = vmatprep.subr.bf16.mxu1 %v11987_v24 }
0x1d4c   : > { %10027 = vmatpush3.bf16.msra.mxu1 %v11987_v24 }
0x1d4d   : > { %10029 = vmatprep.subr.bf16.mxu1 %v11997_v47 }
0x1d50   : > { %10031 = vmatpush3.bf16.msra.mxu1 %v11997_v47 }
0x1d51   : > { %10033 = vmatprep.subr.bf16.mxu1 %v12007_v14 }
0x1d54   : > { %10035 = vmatpush3.bf16.msra.mxu1 %v12007_v14 }
0x1d55   : > { %10037 = vmatprep.subr.bf16.mxu1 %v12017_v4 }
0x1d58   : > { %10039 = vmatpush3.bf16.msra.mxu1 %v12017_v4 }
0x1d59   : > { %10041 = vmatprep.subr.bf16.mxu1 %v12029_v32 }
0x1d5c   : > { %10043 = vmatpush3.bf16.msra.mxu1 %v12029_v32 }
0x1df2   : > { %v8934_v2 = vpop.f32.mrb[40].mxu1 }
0x1df3   : > { %v12136_v51 = vadd.f32 %v8934_v2, %v12133_v56  ;;  %v5828_v3 = vpop.f32.mrb[41].mxu1 }
0x1df4   : > { %v12139_v10 = vadd.f32 %v12133_v56, %v5828_v3 }
0x1df5   : > { %5849 = vmax.xlane.f32.xlu1 %v12136_v51 }
0x1df6   : > { %5847 = vmax.xlane.f32.xlu0 %v12139_v10  ;;  %v8937_v61 = vpop.f32.mrb[42].mxu1 }
0x1df7   : > { %v12144_v34 = vadd.f32 %v8937_v61, %v12133_v56  ;;  %v5838_v5 = vpop.f32.mrb[43].mxu1 }
0x1df8   : > { %v12147_v60 = vadd.f32 %v12133_v56, %v5838_v5 }
0x1df9   : > { %5853 = vmax.xlane.f32.xlu1 %v12144_v34 }
0x1dfa   : > { %5851 = vmax.xlane.f32.xlu0 %v12147_v60 }
0x1e82   : > { %v12151_v12 = vpop.xlane.xlu1 %5849 }
0x1e83   : > { %vm5856_vm8 = vcmp.eq.f32.partialorder %v12136_v51, %v12151_v12  ;;  %v12155_v31 = vpop.xlane.xlu0 %5847 }
0x1e84   : > { %v5860_v24 = vsel %vm5856_vm8, %v11211_v58, 128  ;;  %vm5855_vm9 = vcmp.eq.f32.partialorder %v12139_v10, %v12155_v31 }
0x1e85   : > { %v5859_v47 = vsel %vm5855_vm9, %v11211_v58, 128  ;;  %v5878_v14 = vshra.s32 %v5860_v24, 16  ;;  %v5877_v44 = vand.u32 65535, %v5860_v24 }
0x1e86   : > { %v12161_v4 = vpop.xlane.xlu1 %5853  ;;  %v5864_v32 = vshra.s32 %v5859_v47, 16  ;;  %v5863_v57 = vand.u32 65535, %v5859_v47 }
0x1e87   : > { %vm5858_vm10 = vcmp.eq.f32.partialorder %v12144_v34, %v12161_v4  ;;  %v12165_v6 = vpop.xlane.xlu0 %5851  ;;  %v5880_v29 = vcvt.s32.f32 %v5878_v14  ;;  %v5879_v17 = vcvt.s32.f32 %v5877_v44 }
0x1e88   : > { %v5862_v62 = vsel %vm5858_vm10, %v11211_v58, 128  ;;  %vm5857_vm11 = vcmp.eq.f32.partialorder %v12147_v60, %v12165_v6  ;;  %v5866_v43 = vcvt.s32.f32 %v5864_v32  ;;  %v5865_v48 = vcvt.s32.f32 %v5863_v57 }
0x1e89   : > { %v5861_v19 = vsel %vm5857_vm11, %v11211_v58, 128  ;;  %5881 = vmin.xlane.f32.xlu1 %v5880_v29  ;;  %v5906_v28 = vshra.s32 %v5862_v62, 16  ;;  %v5905_v42 = vand.u32 65535, %v5862_v62 }
0x1e8a   : > { %v5892_v33 = vshra.s32 %v5861_v19, 16  ;;  %5867 = vmin.xlane.f32.xlu0 %v5866_v43  ;;  %v5891_v55 = vand.u32 65535, %v5861_v19 }
0x1e8b   : > { %v5908_v38 = vcvt.s32.f32 %v5906_v28  ;;  %v5907_v46 = vcvt.s32.f32 %v5905_v42 }
0x1e8c   : > { %v5894_v23 = vcvt.s32.f32 %v5892_v33  ;;  %v5893_v25 = vcvt.s32.f32 %v5891_v55 }
0x1e8d   : > { %5909 = vmin.xlane.f32.xlu1 %v5908_v38 }
0x1e8e   : > { %5895 = vmin.xlane.f32.xlu0 %v5894_v23 }
0x1f16   : > { %v5882_v7 = vpop.xlane.xlu1 %5881 }
0x1f17   : > { %vm5883_vm12 = vcmp.eq.f32.partialorder %v5880_v29, %v5882_v7  ;;  %v5868_v22 = vpop.xlane.xlu0 %5867  ;;  %v5888_v26 = vcvt.f32.s32 %v5882_v7 }
0x1f18   : > { %v5884_v63 = vsel %vm5883_vm12, %v5879_v17, inf  ;;  %vm5869_vm13 = vcmp.eq.f32.partialorder %v5866_v43, %v5868_v22  ;;  %v5874_v2 = vcvt.f32.s32 %v5868_v22 }
0x1f19   : > { %5885 = vmin.xlane.f32.xlu1 %v5884_v63  ;;  %v5870_v39 = vsel %vm5869_vm13, %v5865_v48, inf  ;;  %v5889_v5 = vshll.u32 %v5888_v26, 16 }
0x1f1a   : > { %v5910_v9 = vpop.xlane.xlu1 %5909  ;;  %5871 = vmin.xlane.f32.xlu0 %v5870_v39  ;;  %v5875_v14 = vshll.u32 %v5874_v2, 16  ;;  %v12199_v2 = vsub.f32 %v11202_v52, %v11220_v1 }
0x1f1b   : > { %vm5911_vm14 = vcmp.eq.f32.partialorder %v5908_v38, %v5910_v9  ;;  %v5896_v8 = vpop.xlane.xlu0 %5895  ;;  %v5916_v24 = vcvt.f32.s32 %v5910_v9 }
0x1f1c   : > { %v5912_v21 = vsel %vm5911_vm14, %v5907_v46, inf  ;;  %vm5897_vm15 = vcmp.eq.f32.partialorder %v5894_v23, %v5896_v8  ;;  %v5902_v32 = vcvt.f32.s32 %v5896_v8 }
0x1f1d   : > { %5913 = vmin.xlane.f32.xlu1 %v5912_v21  ;;  %v5898_v20 = vsel %vm5897_vm15, %v5893_v25, inf  ;;  %v5917_v33 = vshll.u32 %v5916_v24, 16  ;;  %v12185_v21 = vsub.f32 %v11199_v49, %v11218_v0  ;;  %v12189_v25 = vsub.f32 %v11195_v45, %v11213_v59  ;;  %v13007_v24 = vld [vmem:[#allocation7_spill] sm:$0xff] }
0x1f1e   : > { %5899 = vmin.xlane.f32.xlu0 %v5898_v20  ;;  %v5903_v44 = vshll.u32 %v5902_v32, 16  ;;  %v12194_v20 = vsub.f32 %v11207_v54, %v11228_v13  ;;  %v12204_v0 = vsub.f32 %v11292_v30, %v11307_v11  ;;  %v1709_v59 = vmul.f32 1.442695, %v12199_v2  ;;  %v13004_v11 = vld [vmem:[#allocation8_spill] sm:$0xff] }
0x1f1f   : > { %v1705_v26 = vmul.f32 1.442695, %v12189_v25  ;;  %v12209_v54 = vsub.f32 %v11295_v37, %v11311_v40 }
0x1f20   : > { %v1711_v49 = vmul.f32 1.442695, %v12194_v20  ;;  %v2412_v30 = vmul.f32 1.442695, %v12204_v0 }
0x1f21   : > { %v2410_v40 = vmul.f32 1.442695, %v12209_v54 }
0x1fa6   : > { %v5886_v3 = vpop.xlane.xlu1 %5885 }
0x1fa7   : > { %v5887_v61 = vcvt.f32.s32 %v5886_v3  ;;  %v5872_v47 = vpop.xlane.xlu0 %5871  ;;  %v13005_v3 = vld [vmem:[#allocation6_spill] sm:$0xff] }
0x1fa8   : > { %v5873_v29 = vcvt.f32.s32 %v5872_v47 }
0x1fa9   : > { %v5890_v62 = vadd.s32 %v5889_v5, %v5887_v61  ;;  %v12221_v61 = vsub.f32 %v13005_v3, %v13004_v11  ;;  %v13006_v5 = vld [vmem:[#allocation9_spill] sm:$0xff]  ;;  %v13020_v3 = vld [vmem:[#allocation24_spill] sm:$0xff] }
0x1faa   : > { %v5914_v19 = vpop.xlane.xlu1 %5913  ;;  %v5876_v43 = vadd.s32 %v5875_v14, %v5873_v29  ;;  %v12227_v47 = vsub.f32 %v13007_v24, %v13006_v5  ;;  %v13022_v24 = vld [vmem:[#allocation25_spill] sm:$0xff] }
0x1fab   : > { %v5915_v28 = vcvt.f32.s32 %v5914_v19  ;;  %v5900_v38 = vpop.xlane.xlu0 %5899  ;;  %vm5920_vm1 = vcmp.eq.s32.totalorder %v11211_v58, %v5890_v62  ;;  %v2416_v62 = vmul.f32 1.442695, %v12221_v61  ;;  %v13008_v19 = vld [vmem:[#allocation14_spill] sm:$0xff] }
0x1fac   : > { %v5901_v23 = vcvt.f32.s32 %v5900_v38  ;;  %vm5919_vm0 = vcmp.eq.s32.totalorder %v11211_v58, %v5876_v43  ;;  %v13009_v43 = vld [vmem:[#allocation10_spill] sm:$0xff]  ;;  %v13010_v38 = vld [vmem:[#allocation15_spill] sm:$0xff] }
0x1fad   : > { %v5918_v57 = vadd.s32 %v5917_v33, %v5915_v28  ;;  %9008 = vmatprep.mubr.msk.f32.mxu1 %vm5919_vm0, %v12986_v50  ;;  %v12239_v28 = vsub.f32 %v13009_v43, %v13008_v19  ;;  %v2414_v33 = vmul.f32 1.442695, %v12227_v47 }
0x1fae   : > { %v5904_v7 = vadd.s32 %v5903_v44, %v5901_v23  ;;  %9009 = vmatmul.mubr.msk.f32.vlgmr.msra.gmra.mrb[44].mxu1 %vm5920_vm1, %v12986_v50  ;;  %v13011_v44 = vld [vmem:[#allocation11_spill] sm:$0xff] }
0x1faf   : > { %vm5922_vm3 = vcmp.eq.s32.totalorder %v11211_v58, %v5918_v57  ;;  %v12245_v23 = vsub.f32 %v13011_v44, %v13010_v38  ;;  %v12280_v38 = vsub.f32 %v11786_v53, %v11801_v27  ;;  %v13024_v27 = vld [vmem:[#allocation26_spill] sm:$0xff] }
0x1fb0   : > { %vm5921_vm2 = vcmp.eq.s32.totalorder %v11211_v58, %v5904_v7  ;;  %v3117_v7 = vmul.f32 1.442695, %v12239_v28 }
0x1fb1   : > { %9011 = vmatprep.mubr.msk.f32.mxu1 %vm5921_vm2, %v12986_v50 }
0x1fb2   : > { %9012 = vmatmul.mubr.msk.f32.gmra.mrb[46].mxu1 %vm5922_vm3, %v12986_v50 }
0x2081   : > { %v9010_v17 = vpop.f32.mrb[44].mxu1 }
0x2082   : > { %v6437_v42 = vadd.f32 %v9010_v17, %v12093_v41  ;;  %v6410_v22 = vpop.f32.mrb[45].mxu1  ;;  %v13012_v17 = vld [vmem:[#allocation16_spill] sm:$0xff] }
0x2083   : > { %v6436_v63 = vadd.f32 %v12093_v41, %v6410_v22 }
0x2085   : > { %10272 = vtanh.f32 %v6436_v63  ;;  %v9013_v48 = vpop.f32.mrb[46].mxu1  ;;  %v3115_v63 = vmul.f32 1.442695, %v12245_v23 }
0x2086   : > { %10274 = vtanh.f32 %v6437_v42  ;;  %v6439_v55 = vadd.f32 %v9013_v48, %v12093_v41  ;;  %v6420_v39 = vpop.f32.mrb[47].mxu1  ;;  %v13013_v42 = vld [vmem:[#allocation12_spill] sm:$0xff]  ;;  %v13014_v48 = vld [vmem:[#allocation17_spill] sm:$0xff] }
0x2087   : > { %v6438_v9 = vadd.f32 %v12093_v41, %v6420_v39  ;;  %v1707_v41 = vmul.f32 1.442695, %v12185_v21  ;;  %v12250_v22 = vsub.f32 %v13013_v42, %v13012_v17  ;;  %v4527_v17 = vmul.f32 1.442695, %v12280_v38 }
0x2088   : > { %v12290_v42 = vsub.f32 %v11794_v16, %v11811_v36  ;;  %v13027_v36 = vld [vmem:[#allocation32_spill] sm:$0xff] }
0x2089   : > { %10276 = vtanh.f32 %v6438_v9 }
0x208a   : > { %10278 = vtanh.f32 %v6439_v55  ;;  %v13015_v55 = vld [vmem:[#allocation13_spill] sm:$0xff] }
0x208b   : > { %10280 = vpow2.f32 %v1707_v41  ;;  %v12255_v39 = vsub.f32 %v13015_v55, %v13014_v48  ;;  %v4531_v48 = vmul.f32 1.442695, %v12290_v42  ;;  %v13025_v55 = vld [vmem:[#allocation31_spill] sm:$0xff] }
0x208c   : > { %10282 = vpow2.f32 %v1705_v26 }
0x208d   : > { %10284 = vpow2.f32 %v1711_v49  ;;  %v3119_v26 = vmul.f32 1.442695, %v12255_v39  ;;  %v13018_v49 = vld [vmem:[#allocation23_spill] sm:$0xff] }
0x208e   : > { %10286 = vpow2.f32 %v1709_v59 }
0x208f   : > { %v10273_v46 = vpop.eup %10272  ;;  %10288 = vpow2.f32 %v2412_v30 }
0x2090   : > { %v10275_v58 = vpop.eup %10274  ;;  %9046 = vmatprep.mubr.f32.mxu0 %v10273_v46  ;;  %10290 = vpow2.f32 %v2410_v40 }
0x2091   : > { %9047 = vmatmul.mubr.f32.vlgmr.msra.gmra.mrb[44].mxu0 %v10275_v58  ;;  %10292 = vpow2.f32 %v2416_v62  ;;  %v3121_v58 = vmul.f32 1.442695, %v12250_v22 }
0x2092   : > { %10294 = vpow2.f32 %v2414_v33 }
0x2093   : > { %v10277_v50 = vpop.eup %10276  ;;  %10296 = vpow2.f32 %v3117_v7 }
0x2094   : > { %v10279_v8 = vpop.eup %10278  ;;  %9049 = vmatprep.mubr.f32.mxu0 %v10277_v50  ;;  %v13016_v50 = vld [vmem:[#allocation22_spill] sm:$0xff]  ;;  %10298 = vpow2.f32 %v3115_v63  ;;  %v12295_v63 = vsub.f32 %v13024_v27, %v11815_v18 }
0x2095   : > { %9050 = vmatmul.mubr.f32.gmra.mrb[46].mxu0 %v10279_v8  ;;  %v13017_v8 = vld [vmem:[#allocation18_spill] sm:$0xff]  ;;  %10300 = vpow2.f32 %v3121_v58  ;;  %v13028_v58 = vld [vmem:[#allocation28_spill] sm:$0xff] }
0x2096   : > { %v12260_v41 = vsub.f32 %v13017_v8, %v13016_v50  ;;  %10302 = vpow2.f32 %v3119_v26  ;;  %v4529_v16 = vmul.f32 1.442695, %v12295_v63  ;;  %v12305_v50 = vsub.f32 %v13028_v58, %v13027_v36 }
0x2098   : > { %v3822_v11 = vmul.f32 1.442695, %v12260_v41 }
0x209a   : > { %10304 = vpow2.f32 %v3822_v11  ;;  %v13031_v11 = vld [vmem:[#allocation34_spill] sm:$0xff] }
0x2164   : > { %v9048_v45 = vpop.f32.mrb[44].mxu0 }
0x2165   : > { %v12212_v13 = vadd.f32 %v9048_v45, %v12133_v56  ;;  %v6533_v52 = vpop.f32.mrb[45].mxu0  ;;  %v13019_v45 = vld [vmem:[#allocation19_spill] sm:$0xff] }
0x2166   : > { %v12215_v1 = vadd.f32 %v12133_v56, %v6533_v52  ;;  %v12265_v59 = vsub.f32 %v13019_v45, %v13018_v49  ;;  %v13029_v49 = vld [vmem:[#allocation33_spill] sm:$0xff] }
0x2167   : > { %6554 = vmax.xlane.f32.xlu1 %v12212_v13  ;;  %v13030_v45 = vld [vmem:[#allocation29_spill] sm:$0xff] }
0x2168   : > { %6552 = vmax.xlane.f32.xlu0 %v12215_v1  ;;  %v9051_v37 = vpop.f32.mrb[46].mxu0  ;;  %v3820_v5 = vmul.f32 1.442695, %v12265_v59 }
0x2169   : > { %v12230_v14 = vadd.f32 %v9051_v37, %v12133_v56  ;;  %v6543_v32 = vpop.f32.mrb[47].mxu0  ;;  %v13021_v37 = vld [vmem:[#allocation20_spill] sm:$0xff] }
0x216a   : > { %v12233_v29 = vadd.f32 %v12133_v56, %v6543_v32  ;;  %v10281_v56 = vpop.eup %10280  ;;  %v12270_v40 = vsub.f32 %v13021_v37, %v13020_v3  ;;  %v13023_v32 = vld [vmem:[#allocation21_spill] sm:$0xff]  ;;  %10306 = vpow2.f32 %v3820_v5  ;;  %v13032_v3 = vld [vmem:[#allocation30_spill] sm:$0xff] }
0x216b   : > { %6558 = vmax.xlane.f32.xlu1 %v12230_v14  ;;  %v10283_v57 = vpop.eup %10282  ;;  %v12275_v62 = vsub.f32 %v13023_v32, %v13022_v24  ;;  %v12315_v37 = vsub.f32 %v13032_v3, %v13031_v11 }
0x216c   : > { %6556 = vmax.xlane.f32.xlu0 %v12233_v29  ;;  %v10285_v9 = vpop.eup %10284  ;;  %v3826_v33 = vmul.f32 1.442695, %v12270_v40 }
0x216d   : > { %v10287_v46 = vpop.eup %10286  ;;  %v3824_v44 = vmul.f32 1.442695, %v12275_v62 }
0x216e   : > { %v10289_v52 = vpop.eup %10288  ;;  %10308 = vpow2.f32 %v3826_v33  ;;  %v12325_v33 = vsub.f32 %v12139_v10, %v12155_v31 }
0x216f   : > { %1715 = vadd.xlane.f32.xlu1 %v10281_v56  ;;  %v10291_v30 = vpop.eup %10290  ;;  %v12285_v56 = vsub.f32 %v11789_v15, %v11805_v35  ;;  %10310 = vpow2.f32 %v3824_v44 }
0x2170   : > { %1713 = vadd.xlane.f32.xlu0 %v10283_v57  ;;  %v10293_v19 = vpop.eup %10292  ;;  %10312 = vpow2.f32 %v4527_v17  ;;  %v12330_v17 = vsub.f32 %v12144_v34, %v12161_v4 }
0x2171   : > { %v10295_v43 = vpop.eup %10294  ;;  %v4525_v53 = vmul.f32 1.442695, %v12285_v56 }
0x2172   : > { %v10297_v57 = vpop.eup %10296 }
0x2173   : > { %1719 = vadd.xlane.f32.xlu1 %v10285_v9  ;;  %v10299_v7 = vpop.eup %10298  ;;  %v13026_v9 = vld [vmem:[#allocation27_spill] sm:$0xff]  ;;  %10314 = vpow2.f32 %v4525_v53  ;;  %v5941_v53 = vmul.f32 1.442695, %v12330_v17 }
0x2174   : > { %1717 = vadd.xlane.f32.xlu0 %v10287_v46  ;;  %v10301_v15 = vpop.eup %10300  ;;  %v12300_v46 = vsub.f32 %v13026_v9, %v13025_v55  ;;  %10316 = vpow2.f32 %v4531_v48 }
0x2175   : > { %v10303_v35 = vpop.eup %10302  ;;  %10318 = vpow2.f32 %v4529_v16 }
0x2176   : > { %v10305_v18 = vpop.eup %10304  ;;  %v5232_v26 = vmul.f32 1.442695, %v12300_v46 }
0x2177   : > { %2420 = vadd.xlane.f32.xlu1 %v10289_v52  ;;  %v10307_v8 = vpop.eup %10306  ;;  %v12310_v52 = vsub.f32 %v13030_v45, %v13029_v49 }
0x2178   : > { %2418 = vadd.xlane.f32.xlu0 %v10291_v30  ;;  %v5230_v30 = vmul.f32 1.442695, %v12305_v50  ;;  %v10309_v5 = vpop.eup %10308  ;;  %10320 = vpow2.f32 %v5232_v26 }
0x2179   : > { %v10311_v24 = vpop.eup %10310  ;;  %v5236_v32 = vmul.f32 1.442695, %v12310_v52 }
0x217a   : > { %10322 = vpow2.f32 %v5230_v30  ;;  %v10313_v44 = vpop.eup %10312 }
0x217b   : > { %2424 = vadd.xlane.f32.xlu1 %v10293_v19  ;;  %v12320_v19 = vsub.f32 %v12136_v51, %v12151_v12  ;;  %10324 = vpow2.f32 %v5236_v32  ;;  %v5935_v51 = vmul.f32 1.442695, %v12325_v33  ;;  %v12335_v12 = vsub.f32 %v12147_v60, %v12165_v6 }
0x217c   : > { %2422 = vadd.xlane.f32.xlu0 %v10295_v43  ;;  %v5234_v43 = vmul.f32 1.442695, %v12315_v37 }
0x217d   : > { %v5939_v27 = vmul.f32 1.442695, %v12335_v12 }
0x217e   : > { %10326 = vpow2.f32 %v5234_v43 }
0x217f   : > { %3125 = vadd.xlane.f32.xlu1 %v10297_v57  ;;  %v10315_v57 = vpop.eup %10314 }
0x2180   : > { %3123 = vadd.xlane.f32.xlu0 %v10299_v7  ;;  %v5937_v7 = vmul.f32 1.442695, %v12320_v19  ;;  %v10317_v10 = vpop.eup %10316 }
0x2181   : > { %v10319_v31 = vpop.eup %10318 }
0x2182   : > { %10328 = vpow2.f32 %v5937_v7  ;;  %v10321_v34 = vpop.eup %10320 }
0x2183   : > { %3129 = vadd.xlane.f32.xlu1 %v10301_v15  ;;  %10330 = vpow2.f32 %v5935_v51  ;;  %v13033_v51 = vlaneseq }
0x2184   : > { %3127 = vadd.xlane.f32.xlu0 %v10303_v35  ;;  %v10323_v4 = vpop.eup %10322  ;;  %10332 = vpow2.f32 %v5941_v53 }
0x2185   : > { %10334 = vpow2.f32 %v5939_v27  ;;  %v10325_v15 = vpop.eup %10324 }
0x2187   : > { %3830 = vadd.xlane.f32.xlu1 %v10305_v18 }
0x2188   : > { %3828 = vadd.xlane.f32.xlu0 %v10307_v8  ;;  %v10327_v35 = vpop.eup %10326 }
0x218b   : > { %3834 = vadd.xlane.f32.xlu1 %v10309_v5 }
0x218c   : > { %3832 = vadd.xlane.f32.xlu0 %v10311_v24  ;;  %v10329_v60 = vpop.eup %10328 }
0x218d   : > { %v10331_v6 = vpop.eup %10330 }
0x218e   : > { %v10333_v48 = vpop.eup %10332 }
0x218f   : > { %4535 = vadd.xlane.f32.xlu1 %v10313_v44  ;;  %v10335_v55 = vpop.eup %10334 }
0x2190   : > { %4533 = vadd.xlane.f32.xlu0 %v10315_v57 }
0x2193   : > { %4539 = vadd.xlane.f32.xlu1 %v10317_v10  ;;  %v1742_v10 = vshrl.u32 %v13033_v51, 7 }
0x2194   : > { %4537 = vadd.xlane.f32.xlu0 %v10319_v31 }
0x2197   : > { %5240 = vadd.xlane.f32.xlu1 %v10321_v34 }
0x2198   : > { %5238 = vadd.xlane.f32.xlu0 %v10323_v4 }
0x219b   : > { %5244 = vadd.xlane.f32.xlu1 %v10325_v15 }
0x219c   : > { %5242 = vadd.xlane.f32.xlu0 %v10327_v35 }
0x219f   : > { %5945 = vadd.xlane.f32.xlu1 %v10329_v60 }
0x21a0   : > { %5943 = vadd.xlane.f32.xlu0 %v10331_v6 }
0x21a3   : > { %5949 = vadd.xlane.f32.xlu1 %v10333_v48 }
0x21a4   : > { %5947 = vadd.xlane.f32.xlu0 %v10335_v55 }
0x21f4   : > { %v6555_v9 = vpop.xlane.xlu1 %6554 }
0x21f5   : > { %v12340_v16 = vsub.f32 %v12212_v13, %v6555_v9  ;;  %v6553_v36 = vpop.xlane.xlu0 %6552 }
0x21f6   : > { %v12343_v58 = vsub.f32 %v12215_v1, %v6553_v36 }
0x21f7   : > { %v6566_v18 = vmul.f32 1.442695, %v12340_v16 }
0x21f8   : > { %v6564_v8 = vmul.f32 1.442695, %v12343_v58  ;;  %v6559_v26 = vpop.xlane.xlu1 %6558 }
0x21f9   : > { %10336 = vpow2.f32 %v6566_v18  ;;  %v12348_v49 = vsub.f32 %v12230_v14, %v6559_v26  ;;  %v6557_v45 = vpop.xlane.xlu0 %6556  ;;  %v10474_v14 = vmov 1966171168  }
0x21fa   : > { %10338 = vpow2.f32 %v6564_v8  ;;  %v12351_v30 = vsub.f32 %v12233_v29, %v6557_v45  ;;  %v1739_v32 = vunpack.c.l.s4 %v10474_v14 }
0x21fb   : > { %v6570_v13 = vmul.f32 1.442695, %v12348_v49 }
0x21fc   : > { %v6568_v11 = vmul.f32 1.442695, %v12351_v30  ;;  %v1716_v1 = vpop.xlane.xlu1 %1715  ;;  %v1740_v7 = vunpack.c.0.s8 %v1739_v32 }
0x21fd   : > { %10340 = vpow2.f32 %v6570_v13  ;;  %v1714_v3 = vpop.xlane.xlu0 %1713 }
0x21fe   : > { %10342 = vpow2.f32 %v6568_v11  ;;  %v12356_v35 = vsub.s32 %v1740_v7, %v1742_v10 }
0x21ff   : > { %10344 = vlog2.f32 %v1716_v1 }
0x2200   : > { %10346 = vlog2.f32 %v1714_v3  ;;  %v1720_v5 = vpop.xlane.xlu1 %1719 }
0x2201   : > { %10348 = vlog2.f32 %v1720_v5  ;;  %v1718_v24 = vpop.xlane.xlu0 %1717 }
0x2202   : > { %10350 = vlog2.f32 %v1718_v24 }
0x2203   : > { %v10337_v43 = vpop.eup %10336 }
0x2204   : > { %v10339_v44 = vpop.eup %10338  ;;  %6574 = vadd.xlane.f32.xlu1 %v10337_v43  ;;  %v2421_v29 = vpop.xlane.xlu1 %2420 }
0x2205   : > { %6572 = vadd.xlane.f32.xlu0 %v10339_v44  ;;  %v2419_v57 = vpop.xlane.xlu0 %2418  ;;  %10352 = vlog2.f32 %v2421_v29 }
0x2206   : > { %10354 = vlog2.f32 %v2419_v57 }
0x2207   : > { %v10341_v31 = vpop.eup %10340 }
0x2208   : > { %v10343_v53 = vpop.eup %10342  ;;  %6578 = vadd.xlane.f32.xlu1 %v10341_v31  ;;  %v2425_v27 = vpop.xlane.xlu1 %2424 }
0x2209   : > { %v10345_v34 = vpop.eup %10344  ;;  %6576 = vadd.xlane.f32.xlu0 %v10343_v53  ;;  %v2423_v4 = vpop.xlane.xlu0 %2422  ;;  %10356 = vlog2.f32 %v2425_v27 }
0x220a   : > { %v10347_v15 = vpop.eup %10346  ;;  %v1724_v60 = vmul.f32 0.6931472, %v10345_v34  ;;  %10358 = vlog2.f32 %v2423_v4 }
0x220b   : > { %v10349_v6 = vpop.eup %10348  ;;  %v1722_v48 = vmul.f32 0.6931472, %v10347_v15 }
0x220c   : > { %v10351_v55 = vpop.eup %10350  ;;  %v1730_v9 = vsub.f32 %v12185_v21, %v1724_v60  ;;  %v1728_v36 = vmul.f32 0.6931472, %v10349_v6  ;;  %v3126_v18 = vpop.xlane.xlu1 %3125 }
0x220d   : > { %v1729_v8 = vsub.f32 %v12189_v25, %v1722_v48  ;;  %v1726_v26 = vmul.f32 0.6931472, %v10351_v55  ;;  %v3124_v45 = vpop.xlane.xlu0 %3123  ;;  %10360 = vlog2.f32 %v3126_v18 }
0x220e   : > { %v1786_v13 = vcombine.high %v1730_v9, %v1730_v9  ;;  %v1793_v11 = vrot.slane %v1730_v9, %v12356_v35  ;;  %v1732_v1 = vsub.f32 %v12194_v20, %v1728_v36  ;;  %10362 = vlog2.f32 %v3124_v45 }
0x220f   : > { %v1737_v3 = vcombine.high %v1729_v8, %v1729_v8  ;;  %v1744_v5 = vrot.slane %v1729_v8, %v12356_v35  ;;  %v12364_v21 = vsub.f32 %v12199_v2, %v1726_v26  ;;  %v10353_v34 = vpop.eup %10352 }
0x2210   : > { %v1800_v24 = vrot.slane %v1786_v13, %v12356_v35  ;;  %v1801_v14 = vcombine.high %v1793_v11, %v1793_v11  ;;  %v1809_v25 = vrot.slane %v1793_v11, %v12356_v35  ;;  %6999 = vst.sshfl [vmem:[%s12369_s23 + $0x40] sm:$0x1 pattern:$0x73625140] %v1793_v11  ;;  %v1884_v20 = vcombine.high %v1732_v1, %v1732_v1  ;;  %v10355_v48 = vpop.eup %10354 }
0x2211   : > { %v1751_v32 = vrot.slane %v1737_v3, %v12356_v35  ;;  %v1752_v2 = vcombine.high %v1744_v5, %v1744_v5  ;;  %v1760_v43 = vrot.slane %v1744_v5, %v12356_v35  ;;  %6995 = vst.sshfl [vmem:[%s12369_s23] sm:$0x1 pattern:$0x73625140] %v1744_v5  ;;  %v1891_v44 = vrot.slane %v1732_v1, %v12356_v35 }
0x2212   : > { %v1802_v29 = vcombine.high %v1800_v24, %v1800_v24  ;;  %v1816_v57 = vrot.slane %v1800_v24, %v12356_v35  ;;  %v1823_v7 = vrot.slane %v1801_v14, %v12356_v35  ;;  %v1831_v51 = vcombine.high %v1809_v25, %v1809_v25  ;;  %7000 = vst.sshfl [vmem:[%s12369_s23 + $0x48] sm:$0x1 pattern:$0x73625140] %v1801_v14 }
0x2213   : > { %7001 = vst.sshfl [vmem:[%s12369_s23 + $0x60] sm:$0x1 pattern:$0x73625140] %v1800_v24  ;;  %v1753_v10 = vcombine.high %v1751_v32, %v1751_v32  ;;  %v1767_v31 = vrot.slane %v1751_v32, %v12356_v35  ;;  %v1774_v53 = vrot.slane %v1752_v2, %v12356_v35  ;;  %v1782_v27 = vcombine.high %v1760_v43, %v1760_v43  ;;  %v10357_v8 = vpop.eup %10356 }
0x2214   : > { %6996 = vst.sshfl [vmem:[%s12369_s23 + $0x8] sm:$0x1 pattern:$0x73625140] %v1752_v2  ;;  %v1830_v4 = vrot.slane %v1802_v29, %v12356_v35  ;;  %v1832_v15 = vcombine.high %v1816_v57, %v1816_v57  ;;  %v1833_v60 = vcombine.high %v1823_v7, %v1823_v7  ;;  %1975 = vst [vmem:[%s12369_s23 + $0x50] sm:$0x1] %v1831_v51  ;;  %v10359_v1 = vpop.eup %10358 }
0x2215   : > { %6997 = vst.sshfl [vmem:[%s12369_s23 + $0x20] sm:$0x1 pattern:$0x73625140] %v1751_v32  ;;  %v1898_v6 = vrot.slane %v1884_v20, %v12356_v35  ;;  %v1781_v55 = vrot.slane %v1753_v10, %v12356_v35  ;;  %v1783_v9 = vcombine.high %v1767_v31, %v1767_v31  ;;  %v1784_v36 = vcombine.high %v1774_v53, %v1774_v53 }
0x2216   : > { %7007 = vst.sshfl [vmem:[%s12369_s23 + $0xc0] sm:$0x1 pattern:$0x73625140] %v1891_v44  ;;  %1967 = vst [vmem:[%s12369_s23 + $0x10] sm:$0x1] %v1782_v27  ;;  %v1899_v18 = vcombine.high %v1891_v44, %v1891_v44  ;;  %v1834_v26 = vcombine.high %v1830_v4, %v1830_v4  ;;  %v1907_v13 = vrot.slane %v1891_v44, %v12356_v35 }
0x2217   : > { %7002 = vst.sshfl [vmem:[%s12369_s23 + $0x68] sm:$0x1 pattern:$0x73625140] %v1802_v29  ;;  %1976 = vst [vmem:[%s12369_s23 + $0x58] sm:$0x1] %v1833_v60  ;;  %v1900_v45 = vcombine.high %v1898_v6, %v1898_v6  ;;  %v1914_v11 = vrot.slane %v1898_v6, %v12356_v35  ;;  %v1785_v3 = vcombine.high %v1781_v55, %v1781_v55  ;;  %v12405_v25 = vpop.eup %10360  ;;  %v12428_v55 = vpop.xlane.xlu1 %3129 }
0x2218   : > { %6998 = vst.sshfl [vmem:[%s12369_s23 + $0x28] sm:$0x1 pattern:$0x73625140] %v1753_v10  ;;  %1979 = vst [vmem:[%s12369_s23 + $0x70] sm:$0x1] %v1832_v15  ;;  %v1921_v5 = vrot.slane %v1899_v18, %v12356_v35  ;;  %v1835_v24 = vcombine.high %v12364_v21, %v12364_v21  ;;  %v1842_v14 = vrot.slane %v12364_v21, %v12356_v35  ;;  %v12410_v44 = vpop.eup %10362  ;;  %10364 = vlog2.f32 %v12428_v55 }
0x2219   : > { %7009 = vst.sshfl [vmem:[%s12369_s23 + $0xe0] sm:$0x1 pattern:$0x73625140] %v1898_v6  ;;  %1968 = vst [vmem:[%s12369_s23 + $0x18] sm:$0x1] %v1784_v36  ;;  %v1928_v20 = vrot.slane %v1900_v45, %v12356_v35  ;;  %v1929_v32 = vcombine.high %v1907_v13, %v1907_v13  ;;  %v1930_v2 = vcombine.high %v1914_v11, %v1914_v11 }
0x221a   : > { %1971 = vst [vmem:[%s12369_s23 + $0x30] sm:$0x1] %v1783_v9  ;;  %7008 = vst.sshfl [vmem:[%s12369_s23 + $0xc8] sm:$0x1 pattern:$0x73625140] %v1899_v18  ;;  %v1931_v29 = vcombine.high %v1921_v5, %v1921_v5  ;;  %v1849_v57 = vrot.slane %v1835_v24, %v12356_v35  ;;  %v1850_v21 = vcombine.high %v1842_v14, %v1842_v14 }
0x221b   : > { %1980 = vst [vmem:[%s12369_s23 + $0x78] sm:$0x1] %v1834_v26  ;;  %7010 = vst.sshfl [vmem:[%s12369_s23 + $0xe8] sm:$0x1 pattern:$0x73625140] %v1900_v45  ;;  %v1858_v7 = vrot.slane %v1842_v14, %v12356_v35  ;;  %v1932_v51 = vcombine.high %v1928_v20, %v1928_v20  ;;  %v12433_v26 = vpop.xlane.xlu0 %3127 }
0x221c   : > { %v2429_v43 = vmul.f32 0.6931472, %v10353_v34  ;;  %1972 = vst [vmem:[%s12369_s23 + $0x38] sm:$0x1] %v1785_v3  ;;  %1991 = vst [vmem:[%s12369_s23 + $0xd0] sm:$0x1] %v1929_v32  ;;  %v1851_v27 = vcombine.high %v1849_v57, %v1849_v57  ;;  %v1865_v34 = vrot.slane %v1849_v57, %v12356_v35  ;;  %v1872_v4 = vrot.slane %v1850_v21, %v12356_v35 }
0x221d   : > { %7003 = vst.sshfl [vmem:[%s12369_s23 + $0x80] sm:$0x1 pattern:$0x73625140] %v1842_v14  ;;  %1995 = vst [vmem:[%s12369_s23 + $0xf0] sm:$0x1] %v1930_v2  ;;  %v1880_v15 = vcombine.high %v1858_v7, %v1858_v7  ;;  %10366 = vlog2.f32 %v12433_v26 }
0x221e   : > { %v2435_v10 = vsub.f32 %v12204_v0, %v2429_v43  ;;  %v2427_v31 = vmul.f32 0.6931472, %v10355_v48  ;;  %v2433_v53 = vmul.f32 0.6931472, %v10357_v8  ;;  %1992 = vst [vmem:[%s12369_s23 + $0xd8] sm:$0x1] %v1931_v29  ;;  %v1879_v9 = vrot.slane %v1851_v27, %v12356_v35 }
0x221f   : > { %7004 = vst.sshfl [vmem:[%s12369_s23 + $0x88] sm:$0x1 pattern:$0x73625140] %v1850_v21  ;;  %1996 = vst [vmem:[%s12369_s23 + $0xf8] sm:$0x1] %v1932_v51  ;;  %v1881_v36 = vcombine.high %v1865_v34, %v1865_v34  ;;  %v1882_v18 = vcombine.high %v1872_v4, %v1872_v4 }
0x2220   : > { %7005 = vst.sshfl [vmem:[%s12369_s23 + $0xa0] sm:$0x1 pattern:$0x73625140] %v1849_v57  ;;  %v2491_v60 = vcombine.high %v2435_v10, %v2435_v10  ;;  %v2498_v6 = vrot.slane %v2435_v10, %v12356_v35  ;;  %v2434_v0 = vsub.f32 %v12209_v54, %v2427_v31  ;;  %v2437_v48 = vsub.f32 %v12221_v61, %v2433_v53  ;;  %v3831_v31 = vpop.xlane.xlu1 %3830 }
0x2221   : > { %1983 = vst [vmem:[%s12369_s23 + $0x90] sm:$0x1] %v1880_v15  ;;  %7006 = vst.sshfl [vmem:[%s12369_s23 + $0xa8] sm:$0x1 pattern:$0x73625140] %v1851_v27  ;;  %v1883_v11 = vcombine.high %v1879_v9, %v1879_v9  ;;  %v12460_v15 = vpop.xlane.xlu0 %3828  ;;  %10368 = vlog2.f32 %v3831_v31 }
0x2222   : > { %v2431_v8 = vmul.f32 0.6931472, %v10359_v1  ;;  %v2505_v45 = vrot.slane %v2491_v60, %v12356_v35  ;;  %v2506_v54 = vcombine.high %v2498_v6, %v2498_v6  ;;  %v2514_v61 = vrot.slane %v2498_v6, %v12356_v35  ;;  %7025 = vst.sshfl [vmem:[%s12369_s23 + $0x41] sm:$0x1 pattern:$0x73625140] %v2498_v6 }
0x2223   : > { %v2442_v13 = vcombine.high %v2434_v0, %v2434_v0  ;;  %1984 = vst [vmem:[%s12369_s23 + $0x98] sm:$0x1] %v1882_v18  ;;  %1987 = vst [vmem:[%s12369_s23 + $0xb0] sm:$0x1] %v1881_v36  ;;  %v2449_v3 = vrot.slane %v2434_v0, %v12356_v35  ;;  %v2589_v1 = vcombine.high %v2437_v48, %v2437_v48  ;;  %10370 = vlog2.f32 %v12460_v15 }
0x2224   : > { %v2596_v5 = vrot.slane %v2437_v48, %v12356_v35  ;;  %v2507_v24 = vcombine.high %v2505_v45, %v2505_v45  ;;  %v2521_v14 = vrot.slane %v2505_v45, %v12356_v35  ;;  %v2528_v20 = vrot.slane %v2506_v54, %v12356_v35  ;;  %7026 = vst.sshfl [vmem:[%s12369_s23 + $0x49] sm:$0x1 pattern:$0x73625140] %v2506_v54 }
0x2225   : > { %v2536_v32 = vcombine.high %v2514_v61, %v2514_v61  ;;  %7027 = vst.sshfl [vmem:[%s12369_s23 + $0x61] sm:$0x1 pattern:$0x73625140] %v2505_v45  ;;  %1988 = vst [vmem:[%s12369_s23 + $0xb8] sm:$0x1] %v1883_v11  ;;  %v2456_v2 = vrot.slane %v2442_v13, %v12356_v35  ;;  %v2457_v43 = vcombine.high %v2449_v3, %v2449_v3 }
0x2226   : > { %v2465_v29 = vrot.slane %v2449_v3, %v12356_v35  ;;  %7021 = vst.sshfl [vmem:[%s12369_s23 + $0x1] sm:$0x1 pattern:$0x73625140] %v2449_v3  ;;  %v2603_v57 = vrot.slane %v2589_v1, %v12356_v35  ;;  %v2535_v21 = vrot.slane %v2507_v24, %v12356_v35  ;;  %v2537_v7 = vcombine.high %v2521_v14, %v2521_v14 }
0x2227   : > { %7033 = vst.sshfl [vmem:[%s12369_s23 + $0xc1] sm:$0x1 pattern:$0x73625140] %v2596_v5  ;;  %v2538_v51 = vcombine.high %v2528_v20, %v2528_v20  ;;  %2680 = vst [vmem:[%s12369_s23 + $0x51] sm:$0x1] %v2536_v32  ;;  %v2604_v10 = vcombine.high %v2596_v5, %v2596_v5  ;;  %v2458_v53 = vcombine.high %v2456_v2, %v2456_v2 }
0x2228   : > { %7028 = vst.sshfl [vmem:[%s12369_s23 + $0x69] sm:$0x1 pattern:$0x73625140] %v2507_v24  ;;  %v2472_v27 = vrot.slane %v2456_v2, %v12356_v35  ;;  %v2479_v34 = vrot.slane %v2457_v43, %v12356_v35  ;;  %v2487_v4 = vcombine.high %v2465_v29, %v2465_v29  ;;  %v2539_v60 = vcombine.high %v2535_v21, %v2535_v21 }
0x2229   : > { %7022 = vst.sshfl [vmem:[%s12369_s23 + $0x9] sm:$0x1 pattern:$0x73625140] %v2457_v43  ;;  %2681 = vst [vmem:[%s12369_s23 + $0x59] sm:$0x1] %v2538_v51  ;;  %v2605_v6 = vcombine.high %v2603_v57, %v2603_v57  ;;  %v2612_v0 = vrot.slane %v2596_v5, %v12356_v35  ;;  %v2619_v48 = vrot.slane %v2603_v57, %v12356_v35 }
0x222a   : > { %7023 = vst.sshfl [vmem:[%s12369_s23 + $0x21] sm:$0x1 pattern:$0x73625140] %v2456_v2  ;;  %2684 = vst [vmem:[%s12369_s23 + $0x71] sm:$0x1] %v2537_v7  ;;  %v2486_v9 = vrot.slane %v2458_v53, %v12356_v35  ;;  %v2488_v36 = vcombine.high %v2472_v27, %v2472_v27  ;;  %v2489_v18 = vcombine.high %v2479_v34, %v2479_v34  ;;  %v12483_v2 = vpop.xlane.xlu1 %3834 }
0x222b   : > { %7035 = vst.sshfl [vmem:[%s12369_s23 + $0xe1] sm:$0x1 pattern:$0x73625140] %v2603_v57  ;;  %2672 = vst [vmem:[%s12369_s23 + $0x11] sm:$0x1] %v2487_v4  ;;  %v2626_v45 = vrot.slane %v2604_v10, %v12356_v35  ;;  %v2633_v54 = vrot.slane %v2605_v6, %v12356_v35  ;;  %v2634_v61 = vcombine.high %v2612_v0, %v2612_v0  ;;  %10372 = vlog2.f32 %v12483_v2 }
0x222c   : > { %7034 = vst.sshfl [vmem:[%s12369_s23 + $0xc9] sm:$0x1 pattern:$0x73625140] %v2604_v10  ;;  %2685 = vst [vmem:[%s12369_s23 + $0x79] sm:$0x1] %v2539_v60  ;;  %v2635_v13 = vcombine.high %v2619_v48, %v2619_v48  ;;  %v2436_v11 = vsub.f32 %v12227_v47, %v2431_v8  ;;  %v2490_v3 = vcombine.high %v2486_v9, %v2486_v9 }
0x222d   : > { %7024 = vst.sshfl [vmem:[%s12369_s23 + $0x29] sm:$0x1 pattern:$0x73625140] %v2458_v53  ;;  %2673 = vst [vmem:[%s12369_s23 + $0x19] sm:$0x1] %v2489_v18  ;;  %v2636_v1 = vcombine.high %v2626_v45, %v2626_v45  ;;  %v2637_v14 = vcombine.high %v2633_v54, %v2633_v54 }
0x222e   : > { %7036 = vst.sshfl [vmem:[%s12369_s23 + $0xe9] sm:$0x1 pattern:$0x73625140] %v2605_v6  ;;  %2676 = vst [vmem:[%s12369_s23 + $0x31] sm:$0x1] %v2488_v36  ;;  %v2540_v20 = vcombine.high %v2436_v11, %v2436_v11  ;;  %v2547_v32 = vrot.slane %v2436_v11, %v12356_v35  ;;  %v4536_v0 = vpop.xlane.xlu1 %4535 }
0x222f   : > { %v3134_v5 = vmul.f32 0.6931472, %v12405_v25  ;;  %v3132_v24 = vmul.f32 0.6931472, %v12410_v44  ;;  %2696 = vst [vmem:[%s12369_s23 + $0xd1] sm:$0x1] %v2634_v61  ;;  %v12490_v25 = vpop.xlane.xlu0 %3832 }
0x2230   : > { %2700 = vst [vmem:[%s12369_s23 + $0xf1] sm:$0x1] %v2635_v13  ;;  %2677 = vst [vmem:[%s12369_s23 + $0x39] sm:$0x1] %v2490_v3  ;;  %v2554_v44 = vrot.slane %v2540_v20, %v12356_v35  ;;  %v2555_v43 = vcombine.high %v2547_v32, %v2547_v32  ;;  %v2563_v55 = vrot.slane %v2547_v32, %v12356_v35  ;;  %10374 = vlog2.f32 %v12490_v25 }
0x2231   : > { %2697 = vst [vmem:[%s12369_s23 + $0xd9] sm:$0x1] %v2636_v1  ;;  %v3140_v47 = vsub.f32 %v12239_v28, %v3134_v5  ;;  %v3139_v8 = vsub.f32 %v12245_v23, %v3132_v24  ;;  %2701 = vst [vmem:[%s12369_s23 + $0xf9] sm:$0x1] %v2637_v14  ;;  %v10365_v14 = vpop.eup %10364  ;;  %10376 = vlog2.f32 %v4536_v0 }
0x2232   : > { %7029 = vst.sshfl [vmem:[%s12369_s23 + $0x81] sm:$0x1 pattern:$0x73625140] %v2547_v32  ;;  %v2556_v57 = vcombine.high %v2554_v44, %v2554_v44  ;;  %v2570_v21 = vrot.slane %v2554_v44, %v12356_v35  ;;  %v2577_v7 = vrot.slane %v2555_v43, %v12356_v35  ;;  %v2585_v51 = vcombine.high %v2563_v55, %v2563_v55 }
0x2233   : > { %v3196_v29 = vcombine.high %v3140_v47, %v3140_v47  ;;  %v3203_v28 = vrot.slane %v3140_v47, %v12356_v35  ;;  %v3147_v23 = vcombine.high %v3139_v8, %v3139_v8  ;;  %v3154_v26 = vrot.slane %v3139_v8, %v12356_v35  ;;  %7030 = vst.sshfl [vmem:[%s12369_s23 + $0x89] sm:$0x1 pattern:$0x73625140] %v2555_v43  ;;  %v4534_v45 = vpop.xlane.xlu0 %4533  ;;  %v10367_v8 = vpop.eup %10366 }
0x2234   : > { %7031 = vst.sshfl [vmem:[%s12369_s23 + $0xa1] sm:$0x1 pattern:$0x73625140] %v2554_v44  ;;  %v2584_v34 = vrot.slane %v2556_v57, %v12356_v35  ;;  %v2586_v4 = vcombine.high %v2570_v21, %v2570_v21  ;;  %v2587_v60 = vcombine.high %v2577_v7, %v2577_v7  ;;  %2688 = vst [vmem:[%s12369_s23 + $0x91] sm:$0x1] %v2585_v51  ;;  %10378 = vlog2.f32 %v4534_v45 }
0x2235   : > { %v3210_v10 = vrot.slane %v3196_v29, %v12356_v35  ;;  %v3211_v31 = vcombine.high %v3203_v28, %v3203_v28  ;;  %v3219_v53 = vrot.slane %v3203_v28, %v12356_v35  ;;  %7051 = vst.sshfl [vmem:[%s12369_s23 + $0x42] sm:$0x1 pattern:$0x73625140] %v3203_v28  ;;  %v3161_v27 = vrot.slane %v3147_v23, %v12356_v35  ;;  %v10369_v29 = vpop.eup %10368 }
0x2236   : > { %7047 = vst.sshfl [vmem:[%s12369_s23 + $0x2] sm:$0x1 pattern:$0x73625140] %v3154_v26  ;;  %v3162_v6 = vcombine.high %v3154_v26, %v3154_v26  ;;  %v2588_v54 = vcombine.high %v2584_v34, %v2584_v34  ;;  %2689 = vst [vmem:[%s12369_s23 + $0x99] sm:$0x1] %v2587_v60  ;;  %v3170_v13 = vrot.slane %v3154_v26, %v12356_v35  ;;  %v4540_v26 = vpop.xlane.xlu1 %4539 }
0x2237   : > { %7032 = vst.sshfl [vmem:[%s12369_s23 + $0xa9] sm:$0x1 pattern:$0x73625140] %v2556_v57  ;;  %v3212_v48 = vcombine.high %v3210_v10, %v3210_v10  ;;  %v3226_v9 = vrot.slane %v3210_v10, %v12356_v35  ;;  %v3233_v36 = vrot.slane %v3211_v31, %v12356_v35  ;;  %v3241_v18 = vcombine.high %v3219_v53, %v3219_v53  ;;  %v4538_v21 = vpop.xlane.xlu0 %4537 }
0x2238   : > { %7052 = vst.sshfl [vmem:[%s12369_s23 + $0x4a] sm:$0x1 pattern:$0x73625140] %v3211_v31  ;;  %2692 = vst [vmem:[%s12369_s23 + $0xb1] sm:$0x1] %v2586_v4  ;;  %v3163_v61 = vcombine.high %v3161_v27, %v3161_v27  ;;  %v3177_v11 = vrot.slane %v3161_v27, %v12356_v35  ;;  %v3184_v24 = vrot.slane %v3162_v6, %v12356_v35  ;;  %10380 = vlog2.f32 %v4540_v26 }
0x2239   : > { %7053 = vst.sshfl [vmem:[%s12369_s23 + $0x62] sm:$0x1 pattern:$0x73625140] %v3210_v10  ;;  %v3240_v3 = vrot.slane %v3212_v48, %v12356_v35  ;;  %v3242_v1 = vcombine.high %v3226_v9, %v3226_v9  ;;  %v3243_v5 = vcombine.high %v3233_v36, %v3233_v36  ;;  %3385 = vst [vmem:[%s12369_s23 + $0x52] sm:$0x1] %v3241_v18  ;;  %10382 = vlog2.f32 %v4538_v21  ;;  %v10371_v36 = vpop.eup %10370 }
0x223a   : > { %7049 = vst.sshfl [vmem:[%s12369_s23 + $0x22] sm:$0x1 pattern:$0x73625140] %v3161_v27  ;;  %2693 = vst [vmem:[%s12369_s23 + $0xb9] sm:$0x1] %v2588_v54  ;;  %v3191_v20 = vrot.slane %v3163_v61, %v12356_v35  ;;  %v3192_v32 = vcombine.high %v3170_v13, %v3170_v13  ;;  %v3193_v47 = vcombine.high %v3177_v11, %v3177_v11  ;;  %v10373_v13 = vpop.eup %10372 }
0x223b   : > { %7048 = vst.sshfl [vmem:[%s12369_s23 + $0xa] sm:$0x1 pattern:$0x73625140] %v3162_v6  ;;  %v3244_v44 = vcombine.high %v3240_v3, %v3240_v3  ;;  %3386 = vst [vmem:[%s12369_s23 + $0x5a] sm:$0x1] %v3243_v5  ;;  %v3194_v43 = vcombine.high %v3184_v24, %v3184_v24  ;;  %v10375_v24 = vpop.eup %10374 }
0x223c   : > { %7054 = vst.sshfl [vmem:[%s12369_s23 + $0x6a] sm:$0x1 pattern:$0x73625140] %v3212_v48  ;;  %3389 = vst [vmem:[%s12369_s23 + $0x72] sm:$0x1] %v3242_v1  ;;  %v3195_v28 = vcombine.high %v3191_v20, %v3191_v20 }
0x223d   : > { %7050 = vst.sshfl [vmem:[%s12369_s23 + $0x2a] sm:$0x1 pattern:$0x73625140] %v3163_v61  ;;  %v3138_v55 = vmul.f32 0.6931472, %v10365_v14 }
0x223e   : > { %3377 = vst [vmem:[%s12369_s23 + $0x12] sm:$0x1] %v3192_v32  ;;  %3381 = vst [vmem:[%s12369_s23 + $0x32] sm:$0x1] %v3193_v47  ;;  %v3136_v23 = vmul.f32 0.6931472, %v10367_v8  ;;  %v10377_v8 = vpop.eup %10376 }
0x223f   : > { %3390 = vst [vmem:[%s12369_s23 + $0x7a] sm:$0x1] %v3244_v44  ;;  %3378 = vst [vmem:[%s12369_s23 + $0x1a] sm:$0x1] %v3194_v43  ;;  %v3142_v15 = vsub.f32 %v12250_v22, %v3138_v55  ;;  %v3839_v57 = vmul.f32 0.6931472, %v10369_v29 }
0x2240   : > { %3382 = vst [vmem:[%s12369_s23 + $0x3a] sm:$0x1] %v3195_v28  ;;  %v3141_v7 = vsub.f32 %v12255_v39, %v3136_v23  ;;  %v10379_v28 = vpop.eup %10378 }
0x2241   : > { %v3294_v2 = vcombine.high %v3142_v15, %v3142_v15  ;;  %v3301_v51 = vrot.slane %v3142_v15, %v12356_v35  ;;  %v3845_v10 = vsub.f32 %v12260_v41, %v3839_v57  ;;  %v3837_v15 = vmul.f32 0.6931472, %v10371_v36 }
0x2242   : > { %v3245_v25 = vcombine.high %v3141_v7, %v3141_v7  ;;  %v3252_v31 = vrot.slane %v3141_v7, %v12356_v35  ;;  %v3843_v57 = vmul.f32 0.6931472, %v10373_v13  ;;  %v10381_v21 = vpop.eup %10380 }
0x2243   : > { %v3308_v22 = vrot.slane %v3294_v2, %v12356_v35  ;;  %v3309_v53 = vcombine.high %v3301_v51, %v3301_v51  ;;  %v3317_v27 = vrot.slane %v3301_v51, %v12356_v35  ;;  %7059 = vst.sshfl [vmem:[%s12369_s23 + $0xc2] sm:$0x1 pattern:$0x73625140] %v3301_v51  ;;  %v3901_v39 = vcombine.high %v3845_v10, %v3845_v10 }
0x2244   : > { %v3259_v34 = vrot.slane %v3245_v25, %v12356_v35  ;;  %v3260_v4 = vcombine.high %v3252_v31, %v3252_v31  ;;  %v3268_v41 = vrot.slane %v3252_v31, %v12356_v35  ;;  %7055 = vst.sshfl [vmem:[%s12369_s23 + $0x82] sm:$0x1 pattern:$0x73625140] %v3252_v31  ;;  %v3908_v60 = vrot.slane %v3845_v10, %v12356_v35  ;;  %v12577_v25 = vpop.eup %10382 }
0x2245   : > { %v3310_v6 = vcombine.high %v3308_v22, %v3308_v22  ;;  %v3324_v0 = vrot.slane %v3308_v22, %v12356_v35  ;;  %v3331_v48 = vrot.slane %v3309_v53, %v12356_v35  ;;  %v3339_v9 = vcombine.high %v3317_v27, %v3317_v27  ;;  %7060 = vst.sshfl [vmem:[%s12369_s23 + $0xca] sm:$0x1 pattern:$0x73625140] %v3309_v53 }
0x2246   : > { %7061 = vst.sshfl [vmem:[%s12369_s23 + $0xe2] sm:$0x1 pattern:$0x73625140] %v3308_v22  ;;  %v3261_v18 = vcombine.high %v3259_v34, %v3259_v34  ;;  %v3275_v45 = vrot.slane %v3259_v34, %v12356_v35  ;;  %v3282_v54 = vrot.slane %v3260_v4, %v12356_v35  ;;  %v3290_v61 = vcombine.high %v3268_v41, %v3268_v41 }
0x2247   : > { %7056 = vst.sshfl [vmem:[%s12369_s23 + $0x8a] sm:$0x1 pattern:$0x73625140] %v3260_v4  ;;  %v3338_v11 = vrot.slane %v3310_v6, %v12356_v35  ;;  %v3340_v3 = vcombine.high %v3324_v0, %v3324_v0  ;;  %v3341_v1 = vcombine.high %v3331_v48, %v3331_v48  ;;  %3401 = vst [vmem:[%s12369_s23 + $0xd2] sm:$0x1] %v3339_v9 }
0x2248   : > { %7057 = vst.sshfl [vmem:[%s12369_s23 + $0xa2] sm:$0x1 pattern:$0x73625140] %v3259_v34  ;;  %v3915_v5 = vrot.slane %v3901_v39, %v12356_v35  ;;  %v3289_v14 = vrot.slane %v3261_v18, %v12356_v35  ;;  %v3291_v20 = vcombine.high %v3275_v45, %v3275_v45  ;;  %v3292_v32 = vcombine.high %v3282_v54, %v3282_v54 }
0x2249   : > { %7077 = vst.sshfl [vmem:[%s12369_s23 + $0x43] sm:$0x1 pattern:$0x73625140] %v3908_v60  ;;  %3393 = vst [vmem:[%s12369_s23 + $0x92] sm:$0x1] %v3290_v61  ;;  %v3916_v47 = vcombine.high %v3908_v60, %v3908_v60  ;;  %v3342_v44 = vcombine.high %v3338_v11, %v3338_v11  ;;  %v3924_v55 = vrot.slane %v3908_v60, %v12356_v35 }
0x224a   : > { %7062 = vst.sshfl [vmem:[%s12369_s23 + $0xea] sm:$0x1 pattern:$0x73625140] %v3310_v6  ;;  %3402 = vst [vmem:[%s12369_s23 + $0xda] sm:$0x1] %v3341_v1  ;;  %v3917_v43 = vcombine.high %v3915_v5, %v3915_v5  ;;  %v3931_v29 = vrot.slane %v3915_v5, %v12356_v35  ;;  %v3293_v23 = vcombine.high %v3289_v14, %v3289_v14 }
0x224b   : > { %7058 = vst.sshfl [vmem:[%s12369_s23 + $0xaa] sm:$0x1 pattern:$0x73625140] %v3261_v18  ;;  %3405 = vst [vmem:[%s12369_s23 + $0xf2] sm:$0x1] %v3340_v3  ;;  %v3938_v26 = vrot.slane %v3916_v47, %v12356_v35  ;;  %v3946_v2 = vcombine.high %v3924_v55, %v3924_v55  ;;  %v3844_v22 = vsub.f32 %v12265_v59, %v3837_v15 }
0x224c   : > { %7079 = vst.sshfl [vmem:[%s12369_s23 + $0x63] sm:$0x1 pattern:$0x73625140] %v3915_v5  ;;  %3394 = vst [vmem:[%s12369_s23 + $0x9a] sm:$0x1] %v3292_v32  ;;  %v3945_v7 = vrot.slane %v3917_v43, %v12356_v35  ;;  %v3947_v51 = vcombine.high %v3931_v29, %v3931_v29  ;;  %v3847_v53 = vsub.f32 %v12270_v40, %v3843_v57 }
0x224d   : > { %3397 = vst [vmem:[%s12369_s23 + $0xb2] sm:$0x1] %v3291_v20  ;;  %7078 = vst.sshfl [vmem:[%s12369_s23 + $0x4b] sm:$0x1 pattern:$0x73625140] %v3916_v47  ;;  %v3948_v31 = vcombine.high %v3938_v26, %v3938_v26  ;;  %v3852_v60 = vcombine.high %v3844_v22, %v3844_v22  ;;  %v3859_v6 = vrot.slane %v3844_v22, %v12356_v35 }
0x224e   : > { %3406 = vst [vmem:[%s12369_s23 + $0xfa] sm:$0x1] %v3342_v44  ;;  %7080 = vst.sshfl [vmem:[%s12369_s23 + $0x6b] sm:$0x1 pattern:$0x73625140] %v3917_v43  ;;  %v3949_v39 = vcombine.high %v3945_v7, %v3945_v7  ;;  %v3999_v0 = vcombine.high %v3847_v53, %v3847_v53  ;;  %v4006_v59 = vrot.slane %v3847_v53, %v12356_v35  ;;  %v5241_v7 = vpop.xlane.xlu1 %5240 }
0x224f   : > { %v3841_v10 = vmul.f32 0.6931472, %v10375_v24  ;;  %3398 = vst [vmem:[%s12369_s23 + $0xba] sm:$0x1] %v3293_v23  ;;  %v4544_v27 = vmul.f32 0.6931472, %v10377_v8  ;;  %v3866_v36 = vrot.slane %v3852_v60, %v12356_v35  ;;  %v3867_v18 = vcombine.high %v3859_v6, %v3859_v6 }
0x2250   : > { %4090 = vst [vmem:[%s12369_s23 + $0x53] sm:$0x1] %v3946_v2  ;;  %4094 = vst [vmem:[%s12369_s23 + $0x73] sm:$0x1] %v3947_v51  ;;  %v4542_v4 = vmul.f32 0.6931472, %v10379_v28  ;;  %v3875_v45 = vrot.slane %v3859_v6, %v12356_v35  ;;  %v4013_v54 = vrot.slane %v3999_v0, %v12356_v35  ;;  %v4014_v61 = vcombine.high %v4006_v59, %v4006_v59  ;;  %v5239_v0 = vpop.xlane.xlu0 %5238 }
0x2251   : > { %v3846_v34 = vsub.f32 %v12275_v62, %v3841_v10  ;;  %v12585_v41 = vmul.f32 0.6931472, %v10381_v21  ;;  %4091 = vst [vmem:[%s12369_s23 + $0x5b] sm:$0x1] %v3948_v31  ;;  %4095 = vst [vmem:[%s12369_s23 + $0x7b] sm:$0x1] %v3949_v39  ;;  %v4550_v9 = vsub.f32 %v12280_v38, %v4544_v27  ;;  %v4022_v13 = vrot.slane %v4006_v59, %v12356_v35 }
0x2252   : > { %v12594_v62 = vsub.f32 %v12285_v56, %v4542_v4  ;;  %7073 = vst.sshfl [vmem:[%s12369_s23 + $0x3] sm:$0x1 pattern:$0x73625140] %v3859_v6  ;;  %v3868_v11 = vcombine.high %v3866_v36, %v3866_v36  ;;  %v3882_v3 = vrot.slane %v3866_v36, %v12356_v35  ;;  %v3889_v1 = vrot.slane %v3867_v18, %v12356_v35 }
0x2253   : > { %v3950_v40 = vcombine.high %v3846_v34, %v3846_v34  ;;  %v3957_v48 = vrot.slane %v3846_v34, %v12356_v35  ;;  %7085 = vst.sshfl [vmem:[%s12369_s23 + $0xc3] sm:$0x1 pattern:$0x73625140] %v4006_v59  ;;  %v3897_v5 = vcombine.high %v3875_v45, %v3875_v45  ;;  %v4015_v24 = vcombine.high %v4013_v54, %v4013_v54 }
0x2254   : > { %7074 = vst.sshfl [vmem:[%s12369_s23 + $0xb] sm:$0x1 pattern:$0x73625140] %v3867_v18  ;;  %v4029_v14 = vrot.slane %v4013_v54, %v12356_v35  ;;  %v4036_v20 = vrot.slane %v4014_v61, %v12356_v35  ;;  %v4044_v32 = vcombine.high %v4022_v13, %v4022_v13  ;;  %v3896_v47 = vrot.slane %v3868_v11, %v12356_v35 }
0x2255   : > { %v3964_v38 = vrot.slane %v3950_v40, %v12356_v35  ;;  %v3965_v56 = vcombine.high %v3957_v48, %v3957_v48  ;;  %7081 = vst.sshfl [vmem:[%s12369_s23 + $0x83] sm:$0x1 pattern:$0x73625140] %v3957_v48  ;;  %v3898_v8 = vcombine.high %v3882_v3, %v3882_v3  ;;  %v3899_v44 = vcombine.high %v3889_v1, %v3889_v1 }
0x2256   : > { %7075 = vst.sshfl [vmem:[%s12369_s23 + $0x23] sm:$0x1 pattern:$0x73625140] %v3866_v36  ;;  %4082 = vst [vmem:[%s12369_s23 + $0x13] sm:$0x1] %v3897_v5  ;;  %v4043_v55 = vrot.slane %v4015_v24, %v12356_v35  ;;  %v4045_v29 = vcombine.high %v4029_v14, %v4029_v14  ;;  %v4046_v28 = vcombine.high %v4036_v20, %v4036_v20  ;;  %10384 = vlog2.f32 %v5241_v7 }
0x2257   : > { %7087 = vst.sshfl [vmem:[%s12369_s23 + $0xe3] sm:$0x1 pattern:$0x73625140] %v4013_v54  ;;  %v3966_v43 = vcombine.high %v3964_v38, %v3964_v38  ;;  %4106 = vst [vmem:[%s12369_s23 + $0xd3] sm:$0x1] %v4044_v32  ;;  %v3973_v23 = vrot.slane %v3957_v48, %v12356_v35  ;;  %v3900_v26 = vcombine.high %v3896_v47, %v3896_v47  ;;  %v5243_v47 = vpop.xlane.xlu0 %5242  ;;  %10386 = vlog2.f32 %v5239_v0 }
0x2258   : > { %7086 = vst.sshfl [vmem:[%s12369_s23 + $0xcb] sm:$0x1 pattern:$0x73625140] %v4014_v61  ;;  %4083 = vst [vmem:[%s12369_s23 + $0x1b] sm:$0x1] %v3899_v44  ;;  %v3980_v15 = vrot.slane %v3964_v38, %v12356_v35  ;;  %v3987_v57 = vrot.slane %v3965_v56, %v12356_v35  ;;  %v4047_v2 = vcombine.high %v4043_v55, %v4043_v55 }
0x2259   : > { %7082 = vst.sshfl [vmem:[%s12369_s23 + $0x8b] sm:$0x1 pattern:$0x73625140] %v3965_v56  ;;  %4086 = vst [vmem:[%s12369_s23 + $0x33] sm:$0x1] %v3898_v8  ;;  %v3994_v21 = vrot.slane %v3966_v43, %v12356_v35  ;;  %v3995_v51 = vcombine.high %v3973_v23, %v3973_v23  ;;  %v4606_v10 = vcombine.high %v4550_v9, %v4550_v9 }
0x225a   : > { %7083 = vst.sshfl [vmem:[%s12369_s23 + $0xa3] sm:$0x1 pattern:$0x73625140] %v3964_v38  ;;  %4107 = vst [vmem:[%s12369_s23 + $0xdb] sm:$0x1] %v4046_v28  ;;  %v4613_v31 = vrot.slane %v4550_v9, %v12356_v35  ;;  %v3996_v22 = vcombine.high %v3980_v15, %v3980_v15  ;;  %v3997_v53 = vcombine.high %v3987_v57, %v3987_v57 }
0x225b   : > { %7076 = vst.sshfl [vmem:[%s12369_s23 + $0x2b] sm:$0x1 pattern:$0x73625140] %v3868_v11  ;;  %4110 = vst [vmem:[%s12369_s23 + $0xf3] sm:$0x1] %v4045_v29  ;;  %v3998_v27 = vcombine.high %v3994_v21, %v3994_v21  ;;  %v4557_v39 = vcombine.high %v12594_v62, %v12594_v62  ;;  %v4620_v34 = vrot.slane %v4606_v10, %v12356_v35 }
0x225c   : > { %7088 = vst.sshfl [vmem:[%s12369_s23 + $0xeb] sm:$0x1 pattern:$0x73625140] %v4015_v24  ;;  %4087 = vst [vmem:[%s12369_s23 + $0x3b] sm:$0x1] %v3900_v26  ;;  %v4621_v4 = vcombine.high %v4613_v31, %v4613_v31  ;;  %v4629_v60 = vrot.slane %v4613_v31, %v12356_v35  ;;  %v4564_v6 = vrot.slane %v12594_v62, %v12356_v35 }
0x225d   : > { %7084 = vst.sshfl [vmem:[%s12369_s23 + $0xab] sm:$0x1 pattern:$0x73625140] %v3966_v43  ;;  %4111 = vst [vmem:[%s12369_s23 + $0xfb] sm:$0x1] %v4047_v2  ;;  %v4571_v59 = vrot.slane %v4557_v39, %v12356_v35  ;;  %v4552_v40 = vsub.f32 %v12290_v42, %v12585_v41  ;;  %v4622_v9 = vcombine.high %v4620_v34, %v4620_v34  ;;  %v5245_v41 = vpop.xlane.xlu1 %5244  ;;  %v5944_v39 = vpop.xlane.xlu0 %5943 }
0x225e   : > { %4098 = vst [vmem:[%s12369_s23 + $0x93] sm:$0x1] %v3995_v51  ;;  %7103 = vst.sshfl [vmem:[%s12369_s23 + $0x44] sm:$0x1 pattern:$0x73625140] %v4613_v31  ;;  %v4636_v36 = vrot.slane %v4620_v34, %v12356_v35  ;;  %v4643_v62 = vrot.slane %v4621_v4, %v12356_v35  ;;  %v4651_v18 = vcombine.high %v4629_v60, %v4629_v60  ;;  %10388 = vlog2.f32 %v5245_v41 }
0x225f   : > { %4099 = vst [vmem:[%s12369_s23 + $0x9b] sm:$0x1] %v3997_v53  ;;  %4102 = vst [vmem:[%s12369_s23 + $0xb3] sm:$0x1] %v3996_v22  ;;  %v4546_v48 = vmul.f32 0.6931472, %v12577_v25  ;;  %v4572_v45 = vcombine.high %v4564_v6, %v4564_v6  ;;  %v4573_v54 = vcombine.high %v4571_v59, %v4571_v59  ;;  %v4580_v42 = vrot.slane %v4564_v6, %v12356_v35 }
0x2260   : > { %4103 = vst [vmem:[%s12369_s23 + $0xbb] sm:$0x1] %v3998_v27  ;;  %7104 = vst.sshfl [vmem:[%s12369_s23 + $0x4c] sm:$0x1 pattern:$0x73625140] %v4621_v4  ;;  %v4587_v25 = vrot.slane %v4571_v59, %v12356_v35  ;;  %v4650_v61 = vrot.slane %v4622_v9, %v12356_v35  ;;  %v4652_v13 = vcombine.high %v4636_v36, %v4636_v36  ;;  %v10385_v2 = vpop.eup %10384  ;;  %10390 = vlog2.f32 %v5243_v47 }
0x2261   : > { %7105 = vst.sshfl [vmem:[%s12369_s23 + $0x64] sm:$0x1 pattern:$0x73625140] %v4620_v34  ;;  %v4653_v38 = vcombine.high %v4643_v62, %v4643_v62  ;;  %4795 = vst [vmem:[%s12369_s23 + $0x54] sm:$0x1] %v4651_v18  ;;  %v4704_v56 = vcombine.high %v4552_v40, %v4552_v40  ;;  %v4594_v11 = vrot.slane %v4572_v45, %v12356_v35  ;;  %v5946_v26 = vpop.xlane.xlu1 %5945  ;;  %v10387_v18 = vpop.eup %10386 }
0x2262   : > { %7099 = vst.sshfl [vmem:[%s12369_s23 + $0x4] sm:$0x1 pattern:$0x73625140] %v4564_v6  ;;  %v4601_v3 = vrot.slane %v4573_v54, %v12356_v35  ;;  %v4602_v1 = vcombine.high %v4580_v42, %v4580_v42  ;;  %v4603_v5 = vcombine.high %v4587_v25, %v4587_v25  ;;  %v4654_v24 = vcombine.high %v4650_v61, %v4650_v61  ;;  %v5948_v41 = vpop.xlane.xlu0 %5947 }
0x2263   : > { %7101 = vst.sshfl [vmem:[%s12369_s23 + $0x24] sm:$0x1 pattern:$0x73625140] %v4571_v59  ;;  %4796 = vst [vmem:[%s12369_s23 + $0x5c] sm:$0x1] %v4653_v38  ;;  %v4711_v14 = vrot.slane %v4552_v40, %v12356_v35  ;;  %v4718_v20 = vrot.slane %v4704_v56, %v12356_v35  ;;  %v4551_v32 = vsub.f32 %v12295_v63, %v4546_v48  ;;  %10392 = vlog2.f32 %v5946_v26 }
0x2264   : > { %7106 = vst.sshfl [vmem:[%s12369_s23 + $0x6c] sm:$0x1 pattern:$0x73625140] %v4622_v9  ;;  %4799 = vst [vmem:[%s12369_s23 + $0x74] sm:$0x1] %v4652_v13  ;;  %v4604_v8 = vcombine.high %v4594_v11, %v4594_v11  ;;  %v4605_v44 = vcombine.high %v4601_v3, %v4601_v3  ;;  %10394 = vlog2.f32 %v5944_v39 }
0x2265   : > { %7100 = vst.sshfl [vmem:[%s12369_s23 + $0xc] sm:$0x1 pattern:$0x73625140] %v4572_v45  ;;  %4787 = vst [vmem:[%s12369_s23 + $0x14] sm:$0x1] %v4602_v1  ;;  %v4719_v43 = vcombine.high %v4711_v14, %v4711_v14  ;;  %v4720_v55 = vcombine.high %v4718_v20, %v4718_v20  ;;  %v4727_v29 = vrot.slane %v4711_v14, %v12356_v35  ;;  %v5950_v62 = vpop.xlane.xlu1 %5949 }
0x2266   : > { %7102 = vst.sshfl [vmem:[%s12369_s23 + $0x2c] sm:$0x1 pattern:$0x73625140] %v4573_v54  ;;  %4791 = vst [vmem:[%s12369_s23 + $0x34] sm:$0x1] %v4603_v5  ;;  %v4734_v28 = vrot.slane %v4718_v20, %v12356_v35  ;;  %v4655_v63 = vcombine.high %v4551_v32, %v4551_v32  ;;  %v4662_v23 = vrot.slane %v4551_v32, %v12356_v35  ;;  %10396 = vlog2.f32 %v5950_v62 }
0x2267   : > { %4800 = vst [vmem:[%s12369_s23 + $0x7c] sm:$0x1] %v4654_v24  ;;  %7111 = vst.sshfl [vmem:[%s12369_s23 + $0xc4] sm:$0x1 pattern:$0x73625140] %v4711_v14  ;;  %v4741_v15 = vrot.slane %v4719_v43, %v12356_v35  ;;  %v4748_v57 = vrot.slane %v4720_v55, %v12356_v35  ;;  %v4749_v21 = vcombine.high %v4727_v29, %v4727_v29  ;;  %10398 = vlog2.f32 %v5948_v41 }
0x2268   : > { %7113 = vst.sshfl [vmem:[%s12369_s23 + $0xe4] sm:$0x1 pattern:$0x73625140] %v4718_v20  ;;  %4788 = vst [vmem:[%s12369_s23 + $0x1c] sm:$0x1] %v4604_v8  ;;  %v4750_v7 = vcombine.high %v4734_v28, %v4734_v28  ;;  %v4669_v51 = vrot.slane %v4655_v63, %v12356_v35  ;;  %v4670_v10 = vcombine.high %v4662_v23, %v4662_v23  ;;  %v10389_v61 = vpop.eup %10388 }
0x2269   : > { %4792 = vst [vmem:[%s12369_s23 + $0x3c] sm:$0x1] %v4605_v44  ;;  %7112 = vst.sshfl [vmem:[%s12369_s23 + $0xcc] sm:$0x1 pattern:$0x73625140] %v4719_v43  ;;  %v4678_v31 = vrot.slane %v4662_v23, %v12356_v35  ;;  %v4751_v22 = vcombine.high %v4741_v15, %v4741_v15  ;;  %v4752_v53 = vcombine.high %v4748_v57, %v4748_v57 }
0x226a   : > { %7114 = vst.sshfl [vmem:[%s12369_s23 + $0xec] sm:$0x1 pattern:$0x73625140] %v4720_v55  ;;  %4811 = vst [vmem:[%s12369_s23 + $0xd4] sm:$0x1] %v4749_v21  ;;  %v4671_v34 = vcombine.high %v4669_v51, %v4669_v51  ;;  %v4685_v4 = vrot.slane %v4669_v51, %v12356_v35  ;;  %v4692_v60 = vrot.slane %v4670_v10, %v12356_v35  ;;  %v10391_v3 = vpop.eup %10390 }
0x226b   : > { %7107 = vst.sshfl [vmem:[%s12369_s23 + $0x84] sm:$0x1 pattern:$0x73625140] %v4662_v23  ;;  %4815 = vst [vmem:[%s12369_s23 + $0xf4] sm:$0x1] %v4750_v7  ;;  %v4700_v6 = vcombine.high %v4678_v31, %v4678_v31 }
0x226c   : > { %v5249_v27 = vmul.f32 0.6931472, %v10385_v2  ;;  %7108 = vst.sshfl [vmem:[%s12369_s23 + $0x8c] sm:$0x1 pattern:$0x73625140] %v4670_v10  ;;  %v4699_v59 = vrot.slane %v4671_v34, %v12356_v35  ;;  %v4701_v40 = vcombine.high %v4685_v4, %v4685_v4  ;;  %v4702_v48 = vcombine.high %v4692_v60, %v4692_v60 }
0x226d   : > { %7109 = vst.sshfl [vmem:[%s12369_s23 + $0xa4] sm:$0x1 pattern:$0x73625140] %v4669_v51  ;;  %4812 = vst [vmem:[%s12369_s23 + $0xdc] sm:$0x1] %v4751_v22  ;;  %v10393_v24 = vpop.eup %10392 }
0x226e   : > { %4816 = vst [vmem:[%s12369_s23 + $0xfc] sm:$0x1] %v4752_v53  ;;  %v5255_v0 = vsub.f32 %v12300_v46, %v5249_v27  ;;  %4803 = vst [vmem:[%s12369_s23 + $0x94] sm:$0x1] %v4700_v6  ;;  %v4703_v45 = vcombine.high %v4699_v59, %v4699_v59  ;;  %v5247_v25 = vmul.f32 0.6931472, %v10387_v18 }
0x226f   : > { %7110 = vst.sshfl [vmem:[%s12369_s23 + $0xac] sm:$0x1 pattern:$0x73625140] %v4671_v34  ;;  %4804 = vst [vmem:[%s12369_s23 + $0x9c] sm:$0x1] %v4702_v48 }
0x2270   : > { %v5311_v9 = vcombine.high %v5255_v0, %v5255_v0  ;;  %v5318_v36 = vrot.slane %v5255_v0, %v12356_v35  ;;  %4807 = vst [vmem:[%s12369_s23 + $0xb4] sm:$0x1] %v4701_v40  ;;  %4808 = vst [vmem:[%s12369_s23 + $0xbc] sm:$0x1] %v4703_v45  ;;  %v5254_v1 = vsub.f32 %v12305_v50, %v5247_v25  ;;  %v5253_v5 = vmul.f32 0.6931472, %v10389_v61 }
0x2271   : > { %v5251_v47 = vmul.f32 0.6931472, %v10391_v3  ;;  %v5954_v55 = vmul.f32 0.6931472, %v10393_v24 }
0x2272   : > { %v5325_v46 = vrot.slane %v5311_v9, %v12356_v35  ;;  %v5326_v54 = vcombine.high %v5318_v36, %v5318_v36  ;;  %v5334_v42 = vrot.slane %v5318_v36, %v12356_v35  ;;  %7129 = vst.sshfl [vmem:[%s12369_s23 + $0x45] sm:$0x1 pattern:$0x73625140] %v5318_v36  ;;  %v5262_v8 = vcombine.high %v5254_v1, %v5254_v1 }
0x2273   : > { %v5269_v44 = vrot.slane %v5254_v1, %v12356_v35  ;;  %v5257_v43 = vsub.f32 %v12310_v52, %v5253_v5  ;;  %v5256_v29 = vsub.f32 %v12315_v37, %v5251_v47  ;;  %v5960_v21 = vsub.f32 %v12320_v19, %v5954_v55  ;;  %v10395_v37 = vpop.eup %10394 }
0x2274   : > { %v5327_v13 = vcombine.high %v5325_v46, %v5325_v46  ;;  %v5341_v38 = vrot.slane %v5325_v46, %v12356_v35  ;;  %v5348_v56 = vrot.slane %v5326_v54, %v12356_v35  ;;  %v5356_v11 = vcombine.high %v5334_v42, %v5334_v42  ;;  %7130 = vst.sshfl [vmem:[%s12369_s23 + $0x4d] sm:$0x1 pattern:$0x73625140] %v5326_v54  ;;  %v10397_v27 = vpop.eup %10396 }
0x2275   : > { %7131 = vst.sshfl [vmem:[%s12369_s23 + $0x65] sm:$0x1 pattern:$0x73625140] %v5325_v46  ;;  %v5276_v28 = vrot.slane %v5262_v8, %v12356_v35  ;;  %v5277_v63 = vcombine.high %v5269_v44, %v5269_v44  ;;  %v5285_v23 = vrot.slane %v5269_v44, %v12356_v35  ;;  %v5409_v26 = vcombine.high %v5257_v43, %v5257_v43  ;;  %v10399_v48 = vpop.eup %10398 }
0x2276   : > { %v5355_v14 = vrot.slane %v5327_v13, %v12356_v35  ;;  %v5357_v20 = vcombine.high %v5341_v38, %v5341_v38  ;;  %v5358_v32 = vcombine.high %v5348_v56, %v5348_v56  ;;  %5500 = vst [vmem:[%s12369_s23 + $0x55] sm:$0x1] %v5356_v11  ;;  %7132 = vst.sshfl [vmem:[%s12369_s23 + $0x6d] sm:$0x1 pattern:$0x73625140] %v5327_v13 }
0x2277   : > { %7125 = vst.sshfl [vmem:[%s12369_s23 + $0x5] sm:$0x1 pattern:$0x73625140] %v5269_v44  ;;  %v5416_v15 = vrot.slane %v5257_v43, %v12356_v35  ;;  %v5360_v52 = vcombine.high %v5256_v29, %v5256_v29  ;;  %v5367_v57 = vrot.slane %v5256_v29, %v12356_v35  ;;  %v5278_v7 = vcombine.high %v5276_v28, %v5276_v28 }
0x2278   : > { %v5359_v50 = vcombine.high %v5355_v14, %v5355_v14  ;;  %5501 = vst [vmem:[%s12369_s23 + $0x5d] sm:$0x1] %v5358_v32  ;;  %5504 = vst [vmem:[%s12369_s23 + $0x75] sm:$0x1] %v5357_v20  ;;  %v5292_v2 = vrot.slane %v5276_v28, %v12356_v35  ;;  %v5299_v51 = vrot.slane %v5277_v63, %v12356_v35  ;;  %v5952_v3 = vmul.f32 0.6931472, %v10395_v37 }
0x2279   : > { %v5307_v10 = vcombine.high %v5285_v23, %v5285_v23  ;;  %7126 = vst.sshfl [vmem:[%s12369_s23 + $0xd] sm:$0x1 pattern:$0x73625140] %v5277_v63  ;;  %v5423_v31 = vrot.slane %v5409_v26, %v12356_v35  ;;  %v5424_v22 = vcombine.high %v5416_v15, %v5416_v15  ;;  %v5432_v53 = vrot.slane %v5416_v15, %v12356_v35 }
0x227a   : > { %5505 = vst [vmem:[%s12369_s23 + $0x7d] sm:$0x1] %v5359_v50  ;;  %7127 = vst.sshfl [vmem:[%s12369_s23 + $0x25] sm:$0x1 pattern:$0x73625140] %v5276_v28  ;;  %v5374_v19 = vrot.slane %v5360_v52, %v12356_v35  ;;  %v5306_v39 = vrot.slane %v5278_v7, %v12356_v35  ;;  %v5308_v34 = vcombine.high %v5292_v2, %v5292_v2 }
0x227b   : > { %7137 = vst.sshfl [vmem:[%s12369_s23 + $0xc5] sm:$0x1 pattern:$0x73625140] %v5416_v15  ;;  %v5309_v4 = vcombine.high %v5299_v51, %v5299_v51  ;;  %5492 = vst [vmem:[%s12369_s23 + $0x15] sm:$0x1] %v5307_v10  ;;  %v5375_v60 = vcombine.high %v5367_v57, %v5367_v57  ;;  %v5425_v6 = vcombine.high %v5423_v31, %v5423_v31 }
0x227c   : > { %7133 = vst.sshfl [vmem:[%s12369_s23 + $0x85] sm:$0x1 pattern:$0x73625140] %v5367_v57  ;;  %v5439_v0 = vrot.slane %v5423_v31, %v12356_v35  ;;  %v5446_v59 = vrot.slane %v5424_v22, %v12356_v35  ;;  %v5454_v40 = vcombine.high %v5432_v53, %v5432_v53  ;;  %v5310_v9 = vcombine.high %v5306_v39, %v5306_v39 }
0x227d   : > { %7128 = vst.sshfl [vmem:[%s12369_s23 + $0x2d] sm:$0x1 pattern:$0x73625140] %v5278_v7  ;;  %5493 = vst [vmem:[%s12369_s23 + $0x1d] sm:$0x1] %v5309_v4  ;;  %v5376_v36 = vcombine.high %v5374_v19, %v5374_v19  ;;  %v5383_v62 = vrot.slane %v5367_v57, %v12356_v35  ;;  %v5390_v18 = vrot.slane %v5374_v19, %v12356_v35 }
0x227e   : > { %7138 = vst.sshfl [vmem:[%s12369_s23 + $0xcd] sm:$0x1 pattern:$0x73625140] %v5424_v22  ;;  %5496 = vst [vmem:[%s12369_s23 + $0x35] sm:$0x1] %v5308_v34  ;;  %v5453_v45 = vrot.slane %v5425_v6, %v12356_v35  ;;  %v5455_v46 = vcombine.high %v5439_v0, %v5439_v0  ;;  %v5456_v54 = vcombine.high %v5446_v59, %v5446_v59 }
0x227f   : > { %7139 = vst.sshfl [vmem:[%s12369_s23 + $0xe5] sm:$0x1 pattern:$0x73625140] %v5423_v31  ;;  %5516 = vst [vmem:[%s12369_s23 + $0xd5] sm:$0x1] %v5454_v40  ;;  %v5397_v42 = vrot.slane %v5375_v60, %v12356_v35  ;;  %v5404_v25 = vrot.slane %v5376_v36, %v12356_v35  ;;  %v5405_v41 = vcombine.high %v5383_v62, %v5383_v62 }
0x2280   : > { %7135 = vst.sshfl [vmem:[%s12369_s23 + $0xa5] sm:$0x1 pattern:$0x73625140] %v5374_v19  ;;  %5497 = vst [vmem:[%s12369_s23 + $0x3d] sm:$0x1] %v5310_v9  ;;  %v5406_v61 = vcombine.high %v5390_v18, %v5390_v18  ;;  %v6016_v13 = vcombine.high %v5960_v21, %v5960_v21  ;;  %v5457_v38 = vcombine.high %v5453_v45, %v5453_v45 }
0x2281   : > { %7134 = vst.sshfl [vmem:[%s12369_s23 + $0x8d] sm:$0x1 pattern:$0x73625140] %v5375_v60  ;;  %5517 = vst [vmem:[%s12369_s23 + $0xdd] sm:$0x1] %v5456_v54  ;;  %v5407_v56 = vcombine.high %v5397_v42, %v5397_v42  ;;  %v6023_v11 = vrot.slane %v5960_v21, %v12356_v35  ;;  %v5408_v1 = vcombine.high %v5404_v25, %v5404_v25 }
0x2282   : > { %7140 = vst.sshfl [vmem:[%s12369_s23 + $0xed] sm:$0x1 pattern:$0x73625140] %v5425_v6  ;;  %5520 = vst [vmem:[%s12369_s23 + $0xf5] sm:$0x1] %v5455_v46  ;;  %v6030_v5 = vrot.slane %v6016_v13, %v12356_v35  ;;  %v5959_v47 = vsub.f32 %v12325_v33, %v5952_v3 }
0x2283   : > { %7136 = vst.sshfl [vmem:[%s12369_s23 + $0xad] sm:$0x1 pattern:$0x73625140] %v5376_v36  ;;  %5508 = vst [vmem:[%s12369_s23 + $0x95] sm:$0x1] %v5405_v41  ;;  %v6031_v20 = vcombine.high %v6023_v11, %v6023_v11  ;;  %v6039_v32 = vrot.slane %v6023_v11, %v12356_v35 }
0x2284   : > { %5512 = vst [vmem:[%s12369_s23 + $0xb5] sm:$0x1] %v5406_v61  ;;  %v5958_v24 = vmul.f32 0.6931472, %v10397_v27  ;;  %v5956_v14 = vmul.f32 0.6931472, %v10399_v48  ;;  %v6032_v8 = vcombine.high %v6030_v5, %v6030_v5  ;;  %v6046_v44 = vrot.slane %v6030_v5, %v12356_v35 }
0x2285   : > { %5521 = vst [vmem:[%s12369_s23 + $0xfd] sm:$0x1] %v5457_v38  ;;  %5509 = vst [vmem:[%s12369_s23 + $0x9d] sm:$0x1] %v5407_v56  ;;  %v6053_v50 = vrot.slane %v6031_v20, %v12356_v35  ;;  %v6061_v29 = vcombine.high %v6039_v32, %v6039_v32  ;;  %v5967_v28 = vcombine.high %v5959_v47, %v5959_v47 }
0x2286   : > { %7155 = vst.sshfl [vmem:[%s12369_s23 + $0x46] sm:$0x1 pattern:$0x73625140] %v6023_v11  ;;  %5513 = vst [vmem:[%s12369_s23 + $0xbd] sm:$0x1] %v5408_v1  ;;  %v5962_v43 = vsub.f32 %v12330_v17, %v5958_v24  ;;  %v5961_v55 = vsub.f32 %v12335_v12, %v5956_v14  ;;  %v5974_v63 = vrot.slane %v5959_v47, %v12356_v35 }
0x2287   : > { %7157 = vst.sshfl [vmem:[%s12369_s23 + $0x66] sm:$0x1 pattern:$0x73625140] %v6030_v5  ;;  %v6060_v33 = vrot.slane %v6032_v8, %v12356_v35  ;;  %v6062_v23 = vcombine.high %v6046_v44, %v6046_v44  ;;  %v6063_v15 = vcombine.high %v6053_v50, %v6053_v50  ;;  %6205 = vst [vmem:[%s12369_s23 + $0x56] sm:$0x1] %v6061_v29 }
0x2288   : > { %7156 = vst.sshfl [vmem:[%s12369_s23 + $0x4e] sm:$0x1 pattern:$0x73625140] %v6031_v20  ;;  %v6114_v26 = vcombine.high %v5962_v43, %v5962_v43  ;;  %v6121_v17 = vrot.slane %v5962_v43, %v12356_v35  ;;  %v5981_v12 = vrot.slane %v5967_v28, %v12356_v35  ;;  %v5982_v52 = vcombine.high %v5974_v63, %v5974_v63 }
0x2289   : > { %7158 = vst.sshfl [vmem:[%s12369_s23 + $0x6e] sm:$0x1 pattern:$0x73625140] %v6032_v8  ;;  %v5990_v57 = vrot.slane %v5974_v63, %v12356_v35  ;;  %v6064_v21 = vcombine.high %v6060_v33, %v6060_v33  ;;  %6209 = vst [vmem:[%s12369_s23 + $0x76] sm:$0x1] %v6062_v23  ;;  %v6065_v6 = vcombine.high %v5961_v55, %v5961_v55 }
0x228a   : > { %7151 = vst.sshfl [vmem:[%s12369_s23 + $0x6] sm:$0x1 pattern:$0x73625140] %v5974_v63  ;;  %v6128_v37 = vrot.slane %v6114_v26, %v12356_v35  ;;  %v6129_v7 = vcombine.high %v6121_v17, %v6121_v17  ;;  %v6137_v2 = vrot.slane %v6121_v17, %v12356_v35  ;;  %6206 = vst [vmem:[%s12369_s23 + $0x5e] sm:$0x1] %v6063_v15 }
0x228b   : > { %7163 = vst.sshfl [vmem:[%s12369_s23 + $0xc6] sm:$0x1 pattern:$0x73625140] %v6121_v17  ;;  %v5983_v51 = vcombine.high %v5981_v12, %v5981_v12  ;;  %v5997_v10 = vrot.slane %v5981_v12, %v12356_v35  ;;  %v6004_v31 = vrot.slane %v5982_v52, %v12356_v35  ;;  %v6012_v22 = vcombine.high %v5990_v57, %v5990_v57 }
0x228c   : > { %7152 = vst.sshfl [vmem:[%s12369_s23 + $0xe] sm:$0x1 pattern:$0x73625140] %v5982_v52  ;;  %6210 = vst [vmem:[%s12369_s23 + $0x7e] sm:$0x1] %v6064_v21  ;;  %v6130_v53 = vcombine.high %v6128_v37, %v6128_v37  ;;  %v6144_v19 = vrot.slane %v6128_v37, %v12356_v35  ;;  %v6151_v27 = vrot.slane %v6129_v7, %v12356_v35 }
0x228d   : > { %7153 = vst.sshfl [vmem:[%s12369_s23 + $0x26] sm:$0x1 pattern:$0x73625140] %v5981_v12  ;;  %v6159_v39 = vcombine.high %v6137_v2, %v6137_v2  ;;  %v6011_v34 = vrot.slane %v5983_v51, %v12356_v35  ;;  %v6013_v4 = vcombine.high %v5997_v10, %v5997_v10  ;;  %v6014_v60 = vcombine.high %v6004_v31, %v6004_v31 }
0x228e   : > { %7164 = vst.sshfl [vmem:[%s12369_s23 + $0xce] sm:$0x1 pattern:$0x73625140] %v6129_v7  ;;  %6197 = vst [vmem:[%s12369_s23 + $0x16] sm:$0x1] %v6012_v22  ;;  %v6158_v0 = vrot.slane %v6130_v53, %v12356_v35  ;;  %v6160_v59 = vcombine.high %v6144_v19, %v6144_v19  ;;  %v6161_v40 = vcombine.high %v6151_v27, %v6151_v27 }
0x228f   : > { %7165 = vst.sshfl [vmem:[%s12369_s23 + $0xe6] sm:$0x1 pattern:$0x73625140] %v6128_v37  ;;  %6221 = vst [vmem:[%s12369_s23 + $0xd6] sm:$0x1] %v6159_v39  ;;  %v6072_v48 = vrot.slane %v5961_v55, %v12356_v35  ;;  %v6015_v9 = vcombine.high %v6011_v34, %v6011_v34  ;;  %v6079_v36 = vrot.slane %v6065_v6, %v12356_v35 }
0x2290   : > { %7154 = vst.sshfl [vmem:[%s12369_s23 + $0x2e] sm:$0x1 pattern:$0x73625140] %v5983_v51  ;;  %6198 = vst [vmem:[%s12369_s23 + $0x1e] sm:$0x1] %v6014_v60  ;;  %v6162_v62 = vcombine.high %v6158_v0, %v6158_v0 }
0x2291   : > { %7166 = vst.sshfl [vmem:[%s12369_s23 + $0xee] sm:$0x1 pattern:$0x73625140] %v6130_v53  ;;  %6201 = vst [vmem:[%s12369_s23 + $0x36] sm:$0x1] %v6013_v4  ;;  %v6080_v18 = vcombine.high %v6072_v48, %v6072_v48  ;;  %v6088_v45 = vrot.slane %v6072_v48, %v12356_v35  ;;  %v6081_v46 = vcombine.high %v6079_v36, %v6079_v36  ;;  %v6575_v56 = vpop.xlane.xlu1 %6574 }
0x2292   : > { %6222 = vst [vmem:[%s12369_s23 + $0xde] sm:$0x1] %v6161_v40  ;;  %6225 = vst [vmem:[%s12369_s23 + $0xf6] sm:$0x1] %v6160_v59  ;;  %v6095_v54 = vrot.slane %v6079_v36, %v12356_v35  ;;  %10400 = vlog2.f32 %v6575_v56  ;;  %v6573_v11 = vpop.xlane.xlu0 %6572 }
0x2293   : > { %7159 = vst.sshfl [vmem:[%s12369_s23 + $0x86] sm:$0x1 pattern:$0x73625140] %v6072_v48  ;;  %6202 = vst [vmem:[%s12369_s23 + $0x3e] sm:$0x1] %v6015_v9  ;;  %v6102_v42 = vrot.slane %v6080_v18, %v12356_v35  ;;  %v6110_v25 = vcombine.high %v6088_v45, %v6088_v45  ;;  %v6109_v41 = vrot.slane %v6081_v46, %v12356_v35  ;;  %10402 = vlog2.f32 %v6573_v11 }
0x2294   : > { %7161 = vst.sshfl [vmem:[%s12369_s23 + $0xa6] sm:$0x1 pattern:$0x73625140] %v6079_v36  ;;  %6226 = vst [vmem:[%s12369_s23 + $0xfe] sm:$0x1] %v6162_v62  ;;  %v6111_v61 = vcombine.high %v6095_v54, %v6095_v54 }
0x2295   : > { %7160 = vst.sshfl [vmem:[%s12369_s23 + $0x8e] sm:$0x1 pattern:$0x73625140] %v6080_v18  ;;  %v6112_v13 = vcombine.high %v6102_v42, %v6102_v42  ;;  %6213 = vst [vmem:[%s12369_s23 + $0x96] sm:$0x1] %v6110_v25  ;;  %v6113_v38 = vcombine.high %v6109_v41, %v6109_v41  ;;  %v6579_v3 = vpop.xlane.xlu1 %6578 }
0x2296   : > { %7162 = vst.sshfl [vmem:[%s12369_s23 + $0xae] sm:$0x1 pattern:$0x73625140] %v6081_v46  ;;  %6217 = vst [vmem:[%s12369_s23 + $0xb6] sm:$0x1] %v6111_v61  ;;  %10404 = vlog2.f32 %v6579_v3  ;;  %v6577_v1 = vpop.xlane.xlu0 %6576 }
0x2297   : > { %6214 = vst [vmem:[%s12369_s23 + $0x9e] sm:$0x1] %v6112_v13  ;;  %6218 = vst [vmem:[%s12369_s23 + $0xbe] sm:$0x1] %v6113_v38  ;;  %10406 = vlog2.f32 %v6577_v1 }
0x229c   : > { %v10401_v5 = vpop.eup %10400 }
0x229d   : > { %v10403_v24 = vpop.eup %10402  ;;  %v6583_v14 = vmul.f32 0.6931472, %v10401_v5 }
0x229e   : > { %v6581_v20 = vmul.f32 0.6931472, %v10403_v24 }
0x229f   : > { %v6589_v32 = vsub.f32 %v12340_v16, %v6583_v14 }
0x22a0   : > { %v10405_v47 = vpop.eup %10404  ;;  %v6588_v8 = vsub.f32 %v12343_v58, %v6581_v20 }
0x22a1   : > { %v10407_v44 = vpop.eup %10406  ;;  %v6645_v43 = vcombine.high %v6589_v32, %v6589_v32  ;;  %v6652_v55 = vrot.slane %v6589_v32, %v12356_v35  ;;  %v6587_v50 = vmul.f32 0.6931472, %v10405_v47 }
0x22a2   : > { %v6596_v29 = vcombine.high %v6588_v8, %v6588_v8  ;;  %v6603_v28 = vrot.slane %v6588_v8, %v12356_v35  ;;  %v6585_v63 = vmul.f32 0.6931472, %v10407_v44 }
0x22a3   : > { %v6659_v33 = vrot.slane %v6645_v43, %v12356_v35  ;;  %v6660_v23 = vcombine.high %v6652_v55, %v6652_v55  ;;  %v6668_v16 = vrot.slane %v6652_v55, %v12356_v35  ;;  %7177 = vst.sshfl [vmem:[%s12369_s23 + $0x47] sm:$0x1 pattern:$0x73625140] %v6652_v55  ;;  %v6591_v58 = vsub.f32 %v12348_v49, %v6587_v50 }
0x22a4   : > { %v6610_v26 = vrot.slane %v6596_v29, %v12356_v35  ;;  %v6611_v17 = vcombine.high %v6603_v28, %v6603_v28  ;;  %v6619_v15 = vrot.slane %v6603_v28, %v12356_v35  ;;  %7173 = vst.sshfl [vmem:[%s12369_s23 + $0x7] sm:$0x1 pattern:$0x73625140] %v6603_v28  ;;  %v6590_v12 = vsub.f32 %v12351_v30, %v6585_v63 }
0x22a5   : > { %v6661_v52 = vcombine.high %v6659_v33, %v6659_v33  ;;  %v6675_v57 = vrot.slane %v6659_v33, %v12356_v35  ;;  %v6682_v21 = vrot.slane %v6660_v23, %v12356_v35  ;;  %v6690_v37 = vcombine.high %v6668_v16, %v6668_v16  ;;  %7178 = vst.sshfl [vmem:[%s12369_s23 + $0x4f] sm:$0x1 pattern:$0x73625140] %v6660_v23 }
0x22a6   : > { %7179 = vst.sshfl [vmem:[%s12369_s23 + $0x67] sm:$0x1 pattern:$0x73625140] %v6659_v33  ;;  %v6612_v49 = vcombine.high %v6610_v26, %v6610_v26  ;;  %v6626_v7 = vrot.slane %v6610_v26, %v12356_v35  ;;  %v6633_v2 = vrot.slane %v6611_v17, %v12356_v35  ;;  %v6641_v51 = vcombine.high %v6619_v15, %v6619_v15 }
0x22a7   : > { %7174 = vst.sshfl [vmem:[%s12369_s23 + $0xf] sm:$0x1 pattern:$0x73625140] %v6611_v17  ;;  %v6689_v30 = vrot.slane %v6661_v52, %v12356_v35  ;;  %v6691_v10 = vcombine.high %v6675_v57, %v6675_v57  ;;  %v6692_v31 = vcombine.high %v6682_v21, %v6682_v21  ;;  %6834 = vst [vmem:[%s12369_s23 + $0x57] sm:$0x1] %v6690_v37 }
0x22a8   : > { %7175 = vst.sshfl [vmem:[%s12369_s23 + $0x27] sm:$0x1 pattern:$0x73625140] %v6610_v26  ;;  %v6743_v22 = vcombine.high %v6591_v58, %v6591_v58  ;;  %v6640_v53 = vrot.slane %v6612_v49, %v12356_v35  ;;  %v6642_v19 = vcombine.high %v6626_v7, %v6626_v7  ;;  %v6643_v27 = vcombine.high %v6633_v2, %v6633_v2 }
0x22a9   : > { %7180 = vst.sshfl [vmem:[%s12369_s23 + $0x6f] sm:$0x1 pattern:$0x73625140] %v6661_v52  ;;  %6826 = vst [vmem:[%s12369_s23 + $0x17] sm:$0x1] %v6641_v51  ;;  %v6750_v39 = vrot.slane %v6591_v58, %v12356_v35  ;;  %v6693_v34 = vcombine.high %v6689_v30, %v6689_v30  ;;  %v6694_v60 = vcombine.high %v6590_v12, %v6590_v12 }
0x22aa   : > { %7176 = vst.sshfl [vmem:[%s12369_s23 + $0x2f] sm:$0x1 pattern:$0x73625140] %v6612_v49  ;;  %6835 = vst [vmem:[%s12369_s23 + $0x5f] sm:$0x1] %v6692_v31  ;;  %v6757_v4 = vrot.slane %v6743_v22, %v12356_v35  ;;  %v6701_v6 = vrot.slane %v6590_v12, %v12356_v35  ;;  %v6644_v0 = vcombine.high %v6640_v53, %v6640_v53 }
0x22ab   : > { %6838 = vst [vmem:[%s12369_s23 + $0x77] sm:$0x1] %v6691_v10  ;;  %6827 = vst [vmem:[%s12369_s23 + $0x1f] sm:$0x1] %v6643_v27  ;;  %v6758_v59 = vcombine.high %v6750_v39, %v6750_v39  ;;  %v6766_v40 = vrot.slane %v6750_v39, %v12356_v35  ;;  %v6708_v36 = vrot.slane %v6694_v60, %v12356_v35 }
0x22ac   : > { %6830 = vst [vmem:[%s12369_s23 + $0x37] sm:$0x1] %v6642_v19  ;;  %7185 = vst.sshfl [vmem:[%s12369_s23 + $0xc7] sm:$0x1 pattern:$0x73625140] %v6750_v39  ;;  %v6759_v48 = vcombine.high %v6757_v4, %v6757_v4  ;;  %v6773_v9 = vrot.slane %v6757_v4, %v12356_v35  ;;  %v6709_v62 = vcombine.high %v6701_v6, %v6701_v6 }
0x22ad   : > { %6839 = vst [vmem:[%s12369_s23 + $0x7f] sm:$0x1] %v6693_v34  ;;  %7187 = vst.sshfl [vmem:[%s12369_s23 + $0xe7] sm:$0x1 pattern:$0x73625140] %v6757_v4  ;;  %v6780_v18 = vrot.slane %v6758_v59, %v12356_v35  ;;  %v6788_v45 = vcombine.high %v6766_v40, %v6766_v40  ;;  %v6717_v46 = vrot.slane %v6701_v6, %v12356_v35 }
0x22ae   : > { %7181 = vst.sshfl [vmem:[%s12369_s23 + $0x87] sm:$0x1 pattern:$0x73625140] %v6701_v6  ;;  %6831 = vst [vmem:[%s12369_s23 + $0x3f] sm:$0x1] %v6644_v0  ;;  %v6787_v54 = vrot.slane %v6759_v48, %v12356_v35  ;;  %v6789_v42 = vcombine.high %v6773_v9, %v6773_v9  ;;  %v6710_v25 = vcombine.high %v6708_v36, %v6708_v36 }
0x22af   : > { %7186 = vst.sshfl [vmem:[%s12369_s23 + $0xcf] sm:$0x1 pattern:$0x73625140] %v6758_v59  ;;  %v6724_v41 = vrot.slane %v6708_v36, %v12356_v35  ;;  %v6790_v61 = vcombine.high %v6780_v18, %v6780_v18  ;;  %6850 = vst [vmem:[%s12369_s23 + $0xd7] sm:$0x1] %v6788_v45  ;;  %v6731_v13 = vrot.slane %v6709_v62, %v12356_v35 }
0x22b0   : > { %7188 = vst.sshfl [vmem:[%s12369_s23 + $0xef] sm:$0x1 pattern:$0x73625140] %v6759_v48  ;;  %v6739_v38 = vcombine.high %v6717_v46, %v6717_v46  ;;  %v6791_v56 = vcombine.high %v6787_v54, %v6787_v54  ;;  %6854 = vst [vmem:[%s12369_s23 + $0xf7] sm:$0x1] %v6789_v42  ;;  %v6738_v11 = vrot.slane %v6710_v25, %v12356_v35 }
0x22b1   : > { %7182 = vst.sshfl [vmem:[%s12369_s23 + $0x8f] sm:$0x1 pattern:$0x73625140] %v6709_v62  ;;  %v6740_v3 = vcombine.high %v6724_v41, %v6724_v41  ;;  %6851 = vst [vmem:[%s12369_s23 + $0xdf] sm:$0x1] %v6790_v61  ;;  %v6741_v1 = vcombine.high %v6731_v13, %v6731_v13 }
0x22b2   : > { %7183 = vst.sshfl [vmem:[%s12369_s23 + $0xa7] sm:$0x1 pattern:$0x73625140] %v6708_v36  ;;  %6842 = vst [vmem:[%s12369_s23 + $0x97] sm:$0x1] %v6739_v38  ;;  %v6742_v5 = vcombine.high %v6738_v11, %v6738_v11 }
0x22b3   : > { %7184 = vst.sshfl [vmem:[%s12369_s23 + $0xaf] sm:$0x1 pattern:$0x73625140] %v6710_v25  ;;  %6855 = vst [vmem:[%s12369_s23 + $0xff] sm:$0x1] %v6791_v56 }
0x22b4   : > { %6846 = vst [vmem:[%s12369_s23 + $0xb7] sm:$0x1] %v6740_v3  ;;  %6843 = vst [vmem:[%s12369_s23 + $0x9f] sm:$0x1] %v6741_v1 }
0x22b5   : > { %6847 = vst [vmem:[%s12369_s23 + $0xbf] sm:$0x1] %v6742_v5 }
0x22b6   : > { %10421 = shalt.err (!%p10418_p7)
}
0x22b7   : > { %s10422_s17 = scalar_lea.hbm %s12879_s10, 4096  ;;  %s10426_s23 = scalar_lea.hbm %s12939_s8, 8192 }
0x22b8   : > { %p10423_p10 = scmp.ne.s32.totalorder %s12879_s10, %s10422_s17  ;;  %p10427_p13 = scmp.lt.u32.totalorder %s12879_s10, %s12939_s8 }
0x22b9   : > { %p10428_p0 = scmp.lt.u32.totalorder %s10426_s23, %s10422_s17  ;;  %p10430_p2 = scmp.lt.u32.totalorder %s10422_s17, %s12879_s10 }
0x22ba   : > { %p10424_p11 = pnand %p10423_p10, %p10562_p6 }
0x22bb   : > { %p10429_p1 = por %p10428_p0, %p10427_p13 }
0x22bc   : > { %p10425_p12 = pneg %p10424_p11 }
0x22bd   : > { %p10431_p3 = por %p10430_p2, %p10429_p1 }
0x22bf   : > { %p10432_p4 = pnand %p10431_p3, %p10425_p12 }
0x22c1   : > { %10435 = shalt.err (!%p10432_p4)
}
0x22c2   : > { %s10476_s25 = smov 128   ;;  %s10477_s26 = smov 8  }
0x22c3   : > { %10108 = dma.vmem_to_hbm [thread:$0]  (%p10562_p6), %s12881_s24, 4096, %s12879_s10, %s12889_s12, %s10476_s25, %s10476_s25, %s10477_s26  }
0x22c4 PF: > { %s6885_s13 = sand.u32 1, %s10458_s27   ;;  %p10111_p5 = pnand %p6952_p9, %p10566_p8 }
0x22c5   : > { %s6886_s20 = scalar_lea.sflag [#allocation4], %s6885_s13 }
0x22c6   : > { %10453 = dma.done.wait (!%p10111_p5), %s6886_s20, 4096  }
0x22c7   : > { %10455 = vsyncadd (!%p10111_p5), %s6886_s20, 4294963200  ;;  %p18_p7 = scmp.ge.s32.totalorder %s10548_s11, 4   ;;  %s13034_s27 = smov %s10462_s28 }
0x22c8   : > { %s13035_s28 = smov %s10466_s29  ;;  %s13036_s29 = smov %s10560_s14 }
0x22c9   : > { %s13037_s30 = smov %s10548_s11  ;;  %20 = sbr.rel (!%p18_p7) target bundleno = 3 (0x3), region = 140 }
0x22d0   :  { %6891 = vsyncpa [#allocation4], 1 }
0x22d1   :  { %6893 = vsyncpa [#allocation4 + $0x1], 1 }

</bundles_post_ra>
